<compile_context>
chip_gen: v5e
topology: v5e:2x2
jax: 0.10.0
libtpu: 0.0.40
codegen_flags: <defaults>
</compile_context>

<pallas_src>
import functools
import numpy as np
import jax
import jax.numpy as jnp
from jax.experimental import pallas as pl
from jax.experimental.pallas import tpu as pltpu

TILE_M = 512
BN_EPS = 1e-5
VMEM_LIMIT = 48 * 1024 * 1024


# --------------------- 1x1 conv (+folded-BN bias, +ReLU) ---------------------
def _mm_bias_kernel(x_ref, w_ref, b_ref, o_ref, *, relu):
    # (tm, K)bf16 @ (K, C)bf16 on the MXU, f32 accumulate, f32 epilogue.
    y = jnp.dot(x_ref[...], w_ref[...], preferred_element_type=jnp.float32)
    y = y + b_ref[...]
    if relu:
        y = jnp.maximum(y, 0.0)
    o_ref[...] = y.astype(o_ref.dtype)


def matmul_bias(x2d, w2d, bias, *, relu, out_dtype):
    """x2d: (M, K) bf16, w2d: (K, C) bf16 (BN scale folded), bias: (C,) f32."""
    M, K = x2d.shape
    Kw, C = w2d.shape
    assert K == Kw
    tm = M if M <= TILE_M else TILE_M
    grid_m = pl.cdiv(M, tm)  # ragged tail (if any) is masked by Pallas
    return pl.pallas_call(
        functools.partial(_mm_bias_kernel, relu=relu),
        out_shape=jax.ShapeDtypeStruct((M, C), out_dtype),
        grid_spec=pltpu.PrefetchScalarGridSpec(
            num_scalar_prefetch=0,
            grid=(grid_m,),
            in_specs=[
                pl.BlockSpec((tm, K), lambda i: (i, 0)),
                pl.BlockSpec((K, C), lambda i: (0, 0)),
                pl.BlockSpec((1, C), lambda i: (0, 0)),
            ],
            out_specs=pl.BlockSpec((tm, C), lambda i: (i, 0)),
        ),
        compiler_params=pltpu.CompilerParams(
            dimension_semantics=("parallel",),
            vmem_limit_bytes=VMEM_LIMIT),
    )(x2d, w2d, bias.reshape(1, C))


# --------------- 3x3 strided conv (+folded-BN bias, +ReLU) -------------------
def _conv3x3_kernel(x_ref, w_ref, b_ref, o_ref, *, kh, kw, s, Ho, Wo):
    # x_ref: (s*s, Hq, Wq, Ci) bf16 -- stride-parity-split padded image (1 batch elem)
    # w_ref: (kh*kw, Ci, Co) bf16   -- per-tap weights, BN scale folded
    # b_ref: (1, Co) f32
    # o_ref: (1, Ho*Wo, Co)
    co = o_ref.shape[-1]
    acc = jnp.zeros((Ho * Wo, co), jnp.float32)
    for i in range(kh):
        for j in range(kw):
            p = (i % s) * s + (j % s)      # which stride-parity grid
            di, dj = i // s, j // s        # unit-stride offset inside that grid
            win = x_ref[p, di:di + Ho, dj:dj + Wo, :]        # (Ho, Wo, Ci) bf16
            patch = win.reshape(Ho * Wo, win.shape[-1])      # in-VMEM "im2col"
            acc = acc + jnp.dot(patch, w_ref[i * kw + j],
                                preferred_element_type=jnp.float32)
    y = jnp.maximum(acc + b_ref[...], 0.0)
    o_ref[...] = y[None].astype(o_ref.dtype)


def conv3x3_bn_relu(x_nhwc, p, stride, *, out_dtype=jnp.bfloat16):
    """Masked 3x3 conv (stride) + folded eval-mode BN + ReLU. x_nhwc is bf16."""
    N, H, W, Ci = x_nhwc.shape
    kh = kw = 3
    pad = 1
    s = int(stride)

    scale = p["gamma"] / jnp.sqrt(p["running_var"] + BN_EPS)
    bias = (p["beta"] - p["running_mean"] * scale).astype(jnp.float32)
    w = p["weight"] * scale[:, None, None, None]             # fold BN scale
    Co = w.shape[0]
    w3 = jnp.transpose(w, (2, 3, 1, 0)).reshape(kh * kw, Ci, Co).astype(jnp.bfloat16)

    Hp, Wp = H + 2 * pad, W + 2 * pad
    Ho = (Hp - kh) // s + 1
    Wo = (Wp - kw) // s + 1
    xp = jnp.pad(x_nhwc, ((0, 0), (pad, pad), (pad, pad), (0, 0)))
    # Stride-parity split so every tap window inside the kernel is unit-stride.
    Hq, Wq = -(-Hp // s), -(-Wp // s)
    grids = []
    for a in range(s):
        for b in range(s):
            g = xp[:, a::s, b::s, :]
            g = jnp.pad(g, ((0, 0), (0, Hq - g.shape[1]), (0, Wq - g.shape[2]), (0, 0)))
            grids.append(g)
    xq = jnp.stack(grids, axis=1).reshape(N * s * s, Hq, Wq, Ci)

    out = pl.pallas_call(
        functools.partial(_conv3x3_kernel, kh=kh, kw=kw, s=s, Ho=Ho, Wo=Wo),
        out_shape=jax.ShapeDtypeStruct((N, Ho * Wo, Co), out_dtype),
        grid_spec=pltpu.PrefetchScalarGridSpec(
            num_scalar_prefetch=0,
            grid=(N,),
            in_specs=[
                pl.BlockSpec((s * s, Hq, Wq, Ci), lambda n: (n, 0, 0, 0)),
                pl.BlockSpec((kh * kw, Ci, Co), lambda n: (0, 0, 0)),
                pl.BlockSpec((1, Co), lambda n: (0, 0)),
            ],
            out_specs=pl.BlockSpec((1, Ho * Wo, Co), lambda n: (n, 0, 0)),
        ),
        compiler_params=pltpu.CompilerParams(
            dimension_semantics=("parallel",),
            vmem_limit_bytes=VMEM_LIMIT),
    )(xq, w3, bias.reshape(1, Co))
    return out.reshape(N, Ho, Wo, Co)


# ------------------------------ forward pass ---------------------------------
def _fold_1x1(p):
    scale = p["gamma"] / jnp.sqrt(p["running_var"] + BN_EPS)
    bias = (p["beta"] - p["running_mean"] * scale).astype(jnp.float32)
    w2d = jnp.transpose(p["weight"][:, :, 0, 0] * scale[:, None]).astype(jnp.bfloat16)
    return w2d, bias


def talk_bottleneck_forward(x_nchw, params, stride):
    x = jnp.transpose(x_nchw, (0, 2, 3, 1))                   # NCHW -> NHWC
    N, H, W, Cin = x.shape
    # a: 1x1 conv + BN + ReLU (bf16 intermediate)
    wa, ba = _fold_1x1(params["a"])
    ya = matmul_bias(x.reshape(N * H * W, Cin).astype(jnp.bfloat16), wa, ba,
                     relu=True, out_dtype=jnp.bfloat16)
    Ci = ya.shape[-1]
    ya = ya.reshape(N, H, W, Ci)
    # b: 3x3 strided conv + BN + ReLU (in-VMEM patch extraction, bf16 intermediate)
    yb = conv3x3_bn_relu(ya, params["b"], stride, out_dtype=jnp.bfloat16)
    _, Ho, Wo, _ = yb.shape
    # c: 1x1 conv + BN (no ReLU), f32 output
    wc, bc = _fold_1x1(params["c"])
    yc = matmul_bias(yb.reshape(N * Ho * Wo, Ci), wc, bc,
                     relu=False, out_dtype=jnp.float32)
    Cout = yc.shape[-1]
    return jnp.transpose(yc.reshape(N, Ho, Wo, Cout), (0, 3, 1, 2))   # -> NCHW


# --------------------------- parameter construction --------------------------
def _graph_mask(cout, cin, seed):
    """Deterministic relational-graph channel-connectivity mask (Cout, Cin)."""
    rng = np.random.default_rng(seed)
    mask = (rng.random((cout, cin)) < 0.5).astype(np.float32)
    for o in range(cout):              # guarantee every output node has an edge
        mask[o, o % cin] = 1.0
    return jnp.asarray(mask)


def _make_conv_bn_params(key, cin, cout, kh, kw, seed):
    kw_, kg, kb = jax.random.split(key, 3)
    fan_in = cin * kh * kw
    w = jax.random.normal(kw_, (cout, cin, kh, kw), jnp.float32) * np.sqrt(2.0 / fan_in)
    w = w * _graph_mask(cout, cin, seed)[:, :, None, None]
    return {
        "weight": w,
        "gamma": 1.0 + 0.1 * jax.random.normal(kg, (cout,), jnp.float32),
        "beta": 0.1 * jax.random.normal(kb, (cout,), jnp.float32),
        "running_mean": jnp.zeros((cout,), jnp.float32) + 0.05,
        "running_var": jnp.ones((cout,), jnp.float32) * 0.9,
    }


def make_params(key, dim_in, dim_out, seed=1):
    dim_inner = int(round(dim_out / 4))
    ka, kb, kc = jax.random.split(key, 3)
    return {
        "a": _make_conv_bn_params(ka, dim_in, dim_inner, 1, 1, seed + 0),
        "b": _make_conv_bn_params(kb, dim_inner, dim_inner, 3, 3, seed + 1),
        "c": _make_conv_bn_params(kc, dim_inner, dim_out, 1, 1, seed + 2),
    }


# --------------------------- reference (same precision policy) ---------------
def _ref_conv_bn(x_nhwc, p, stride, pad, relu):
    # Matches the kernel's numerics: BN scale folded into bf16 weights, bf16
    # activations, f32 accumulation, f32 bias/ReLU epilogue.
    scale = p["gamma"] / jnp.sqrt(p["running_var"] + BN_EPS)
    bias = p["beta"] - p["running_mean"] * scale
    w = (p["weight"] * scale[:, None, None, None]).astype(jnp.bfloat16)
    w_hwio = jnp.transpose(w, (2, 3, 1, 0))
    y = jax.lax.conv_general_dilated(
        x_nhwc.astype(jnp.bfloat16), w_hwio, (stride, stride),
        [(pad, pad), (pad, pad)],
        dimension_numbers=("NHWC", "HWIO", "NHWC"),
        preferred_element_type=jnp.float32)
    y = y + bias
    return jnp.maximum(y, 0.0) if relu else y


def ref_forward(x_nchw, params, stride):
    x = jnp.transpose(x_nchw, (0, 2, 3, 1))
    a = _ref_conv_bn(x, params["a"], 1, 0, True).astype(jnp.bfloat16)
    b = _ref_conv_bn(a, params["b"], stride, 1, True).astype(jnp.bfloat16)
    c = _ref_conv_bn(b, params["c"], 1, 0, False)
    return jnp.transpose(c, (0, 3, 1, 2))


if __name__ == "__main__":
    # Small but representative config: dim_inner = dim_out / 4 = 64.
    dim_in, dim_out, stride = 64, 256, 2
    N, H, W = 2, 32, 32

    key = jax.random.PRNGKey(0)
    kx, kp = jax.random.split(key)
    x = jax.random.normal(kx, (N, dim_in, H, W), jnp.float32)   # NCHW like PyTorch
    params = make_params(kp, dim_in, dim_out, seed=1)

    fwd = jax.jit(lambda a: talk_bottleneck_forward(a, params, stride))
    out = jax.block_until_ready(fwd(x))
    assert out.shape == (N, dim_out, H // stride, W // stride), out.shape

    ref = jax.block_until_ready(jax.jit(lambda a: ref_forward(a, params, stride))(x))
    max_err = float(jnp.max(jnp.abs(out - ref)))
    assert jnp.allclose(out, ref, atol=2e-2, rtol=2e-2), max_err

    print("KERNEL_OK")
</pallas_src>

<mosaic_0001>
module attributes {stable_mosaic.version = 11 : i64} {
  func.func @_mm_bias_kernel(%arg0: i32, %arg1: memref<512x64xbf16, #tpu.memory_space<vmem>>, %arg2: memref<64x64xbf16, #tpu.memory_space<vmem>>, %arg3: memref<1x64xf32, #tpu.memory_space<vmem>>, %arg4: memref<512x64xbf16, #tpu.memory_space<vmem>>) attributes {dimension_semantics = [#tpu.dimension_semantics<parallel>], iteration_bounds = array<i64: 4>, scalar_prefetch = 0 : i64, scratch_operands = 0 : i64, tpu.core_type = #tpu.core_type<tc>, window_params = [{transform_indices = @transform_0, window_bounds = array<i64: 512, 64>}, {pipeline_mode = #tpu.pipeline_mode<synchronous>, transform_indices = @transform_1, window_bounds = array<i64: 64, 64>}, {pipeline_mode = #tpu.pipeline_mode<synchronous>, transform_indices = @transform_2, window_bounds = array<i64: 1, 64>}, {transform_indices = @transform_3, window_bounds = array<i64: 512, 64>}]} {
    %c0 = arith.constant 0 : index
    %c0_0 = arith.constant 0 : index
    %0 = vector.load %arg1[%c0, %c0_0] : memref<512x64xbf16, #tpu.memory_space<vmem>>, vector<512x64xbf16>
    %c0_1 = arith.constant 0 : index
    %c0_2 = arith.constant 0 : index
    %1 = vector.load %arg2[%c0_1, %c0_2] : memref<64x64xbf16, #tpu.memory_space<vmem>>, vector<64x64xbf16>
    %cst = arith.constant dense<0.000000e+00> : vector<512x64xf32>
    %2 = tpu.matmul %0, %1, %cst {dimension_numbers = #tpu.dot_dimension_numbers<[1], [0], [0], [1], [0, 0, 1, 1], [], []>} : vector<512x64xbf16>, vector<64x64xbf16>, vector<512x64xf32> -> vector<512x64xf32>
    %c0_3 = arith.constant 0 : index
    %c0_4 = arith.constant 0 : index
    %3 = vector.load %arg3[%c0_3, %c0_4] : memref<1x64xf32, #tpu.memory_space<vmem>>, vector<1x64xf32>
    %4 = vector.broadcast %3 : vector<1x64xf32> to vector<512x64xf32>
    %5 = arith.addf %2, %4 : vector<512x64xf32>
    %cst_5 = arith.constant 0.000000e+00 : f32
    %6 = vector.broadcast %cst_5 : f32 to vector<512x64xf32>
    %7 = arith.maximumf %5, %6 : vector<512x64xf32>
    %8 = arith.truncf %7 : vector<512x64xf32> to vector<512x64xbf16>
    %c0_6 = arith.constant 0 : index
    %c0_7 = arith.constant 0 : index
    %9 = vector.load %arg4[%c0_6, %c0_7] : memref<512x64xbf16, #tpu.memory_space<vmem>>, vector<512x64xbf16>
    tpu.vector_store %arg4[%c0_6, %c0_7], %8 {strides = array<i32>} : memref<512x64xbf16, #tpu.memory_space<vmem>>, vector<512x64xbf16>,
    return
  }
  func.func @transform_0(%arg0: i32) -> (i32, i32) {
    %c0_i32 = arith.constant 0 : i32
    %c0_i32_0 = arith.constant 0 : i32
    return %arg0, %c0_i32 : i32, i32
  }
  func.func @transform_1(%arg0: i32) -> (i32, i32) {
    %c0_i32 = arith.constant 0 : i32
    %c0_i32_0 = arith.constant 0 : i32
    %c0_i32_1 = arith.constant 0 : i32
    return %c0_i32, %c0_i32_0 : i32, i32
  }
  func.func @transform_2(%arg0: i32) -> (i32, i32) {
    %c0_i32 = arith.constant 0 : i32
    %c0_i32_0 = arith.constant 0 : i32
    %c0_i32_1 = arith.constant 0 : i32
    return %c0_i32, %c0_i32_0 : i32, i32
  }
  func.func @transform_3(%arg0: i32) -> (i32, i32) {
    %c0_i32 = arith.constant 0 : i32
    %c0_i32_0 = arith.constant 0 : i32
    return %arg0, %c0_i32 : i32, i32
  }
}

module attributes {stable_mosaic.version = 11 : i64} {
  func.func @_conv3x3_kernel(%arg0: i32, %arg1: memref<4x17x17x64xbf16, #tpu.memory_space<vmem>>, %arg2: memref<9x64x64xbf16, #tpu.memory_space<vmem>>, %arg3: memref<1x64xf32, #tpu.memory_space<vmem>>, %arg4: memref<1x256x64xbf16, #tpu.memory_space<vmem>>) attributes {dimension_semantics = [#tpu.dimension_semantics<parallel>], iteration_bounds = array<i64: 2>, scalar_prefetch = 0 : i64, scratch_operands = 0 : i64, tpu.core_type = #tpu.core_type<tc>, window_params = [{transform_indices = @transform_0, window_bounds = array<i64: 4, 17, 17, 64>}, {pipeline_mode = #tpu.pipeline_mode<synchronous>, transform_indices = @transform_1, window_bounds = array<i64: 9, 64, 64>}, {pipeline_mode = #tpu.pipeline_mode<synchronous>, transform_indices = @transform_2, window_bounds = array<i64: 1, 64>}, {transform_indices = @transform_3, window_bounds = array<i64: 1, 256, 64>}]} {
    %cst = arith.constant 0.000000e+00 : f32
    %0 = vector.broadcast %cst : f32 to vector<256x64xf32>
    %c0 = arith.constant 0 : index
    %c0_0 = arith.constant 0 : index
    %c0_1 = arith.constant 0 : index
    %c0_2 = arith.constant 0 : index
    %1 = vector.load %arg1[%c0, %c0_0, %c0_1, %c0_2] : memref<4x17x17x64xbf16, #tpu.memory_space<vmem>>, vector<1x16x16x64xbf16>
    %2 = vector.shape_cast %1 : vector<1x16x16x64xbf16> to vector<16x16x64xbf16>
    %3 = vector.shape_cast %2 : vector<16x16x64xbf16> to vector<256x64xbf16>
    %c0_3 = arith.constant 0 : index
    %c0_4 = arith.constant 0 : index
    %c0_5 = arith.constant 0 : index
    %4 = vector.load %arg2[%c0_3, %c0_4, %c0_5] : memref<9x64x64xbf16, #tpu.memory_space<vmem>>, vector<1x64x64xbf16>
    %5 = vector.shape_cast %4 : vector<1x64x64xbf16> to vector<64x64xbf16>
    %cst_6 = arith.constant dense<0.000000e+00> : vector<256x64xf32>
    %6 = tpu.matmul %3, %5, %cst_6 {dimension_numbers = #tpu.dot_dimension_numbers<[1], [0], [0], [1], [0, 0, 1, 1], [], []>} : vector<256x64xbf16>, vector<64x64xbf16>, vector<256x64xf32> -> vector<256x64xf32>
    %7 = arith.addf %0, %6 : vector<256x64xf32>
    %c1 = arith.constant 1 : index
    %c0_7 = arith.constant 0 : index
    %c0_8 = arith.constant 0 : index
    %c0_9 = arith.constant 0 : index
    %8 = vector.load %arg1[%c1, %c0_7, %c0_8, %c0_9] : memref<4x17x17x64xbf16, #tpu.memory_space<vmem>>, vector<1x16x16x64xbf16>
    %9 = vector.shape_cast %8 : vector<1x16x16x64xbf16> to vector<16x16x64xbf16>
    %10 = vector.shape_cast %9 : vector<16x16x64xbf16> to vector<256x64xbf16>
    %c1_10 = arith.constant 1 : index
    %c0_11 = arith.constant 0 : index
    %c0_12 = arith.constant 0 : index
    %11 = vector.load %arg2[%c1_10, %c0_11, %c0_12] : memref<9x64x64xbf16, #tpu.memory_space<vmem>>, vector<1x64x64xbf16>
    %12 = vector.shape_cast %11 : vector<1x64x64xbf16> to vector<64x64xbf16>
    %cst_13 = arith.constant dense<0.000000e+00> : vector<256x64xf32>
    %13 = tpu.matmul %10, %12, %cst_13 {dimension_numbers = #tpu.dot_dimension_numbers<[1], [0], [0], [1], [0, 0, 1, 1], [], []>} : vector<256x64xbf16>, vector<64x64xbf16>, vector<256x64xf32> -> vector<256x64xf32>
    %14 = arith.addf %7, %13 : vector<256x64xf32>
    %c0_14 = arith.constant 0 : index
    %c0_15 = arith.constant 0 : index
    %c1_16 = arith.constant 1 : index
    %c0_17 = arith.constant 0 : index
    %15 = vector.load %arg1[%c0_14, %c0_15, %c1_16, %c0_17] : memref<4x17x17x64xbf16, #tpu.memory_space<vmem>>, vector<1x16x16x64xbf16>
    %16 = vector.shape_cast %15 : vector<1x16x16x64xbf16> to vector<16x16x64xbf16>
    %17 = vector.shape_cast %16 : vector<16x16x64xbf16> to vector<256x64xbf16>
    %c2 = arith.constant 2 : index
    %c0_18 = arith.constant 0 : index
    %c0_19 = arith.constant 0 : index
    %18 = vector.load %arg2[%c2, %c0_18, %c0_19] : memref<9x64x64xbf16, #tpu.memory_space<vmem>>, vector<1x64x64xbf16>
    %19 = vector.shape_cast %18 : vector<1x64x64xbf16> to vector<64x64xbf16>
    %cst_20 = arith.constant dense<0.000000e+00> : vector<256x64xf32>
    %20 = tpu.matmul %17, %19, %cst_20 {dimension_numbers = #tpu.dot_dimension_numbers<[1], [0], [0], [1], [0, 0, 1, 1], [], []>} : vector<256x64xbf16>, vector<64x64xbf16>, vector<256x64xf32> -> vector<256x64xf32>
    %21 = arith.addf %14, %20 : vector<256x64xf32>
    %c2_21 = arith.constant 2 : index
    %c0_22 = arith.constant 0 : index
    %c0_23 = arith.constant 0 : index
    %c0_24 = arith.constant 0 : index
    %22 = vector.load %arg1[%c2_21, %c0_22, %c0_23, %c0_24] : memref<4x17x17x64xbf16, #tpu.memory_space<vmem>>, vector<1x16x16x64xbf16>
    %23 = vector.shape_cast %22 : vector<1x16x16x64xbf16> to vector<16x16x64xbf16>
    %24 = vector.shape_cast %23 : vector<16x16x64xbf16> to vector<256x64xbf16>
    %c3 = arith.constant 3 : index
    %c0_25 = arith.constant 0 : index
    %c0_26 = arith.constant 0 : index
    %25 = vector.load %arg2[%c3, %c0_25, %c0_26] : memref<9x64x64xbf16, #tpu.memory_space<vmem>>, vector<1x64x64xbf16>
    %26 = vector.shape_cast %25 : vector<1x64x64xbf16> to vector<64x64xbf16>
    %cst_27 = arith.constant dense<0.000000e+00> : vector<256x64xf32>
    %27 = tpu.matmul %24, %26, %cst_27 {dimension_numbers = #tpu.dot_dimension_numbers<[1], [0], [0], [1], [0, 0, 1, 1], [], []>} : vector<256x64xbf16>, vector<64x64xbf16>, vector<256x64xf32> -> vector<256x64xf32>
    %28 = arith.addf %21, %27 : vector<256x64xf32>
    %c3_28 = arith.constant 3 : index
    %c0_29 = arith.constant 0 : index
    %c0_30 = arith.constant 0 : index
    %c0_31 = arith.constant 0 : index
    %29 = vector.load %arg1[%c3_28, %c0_29, %c0_30, %c0_31] : memref<4x17x17x64xbf16, #tpu.memory_space<vmem>>, vector<1x16x16x64xbf16>
    %30 = vector.shape_cast %29 : vector<1x16x16x64xbf16> to vector<16x16x64xbf16>
    %31 = vector.shape_cast %30 : vector<16x16x64xbf16> to vector<256x64xbf16>
    %c4 = arith.constant 4 : index
    %c0_32 = arith.constant 0 : index
    %c0_33 = arith.constant 0 : index
    %32 = vector.load %arg2[%c4, %c0_32, %c0_33] : memref<9x64x64xbf16, #tpu.memory_space<vmem>>, vector<1x64x64xbf16>
    %33 = vector.shape_cast %32 : vector<1x64x64xbf16> to vector<64x64xbf16>
    %cst_34 = arith.constant dense<0.000000e+00> : vector<256x64xf32>
    %34 = tpu.matmul %31, %33, %cst_34 {dimension_numbers = #tpu.dot_dimension_numbers<[1], [0], [0], [1], [0, 0, 1, 1], [], []>} : vector<256x64xbf16>, vector<64x64xbf16>, vector<256x64xf32> -> vector<256x64xf32>
    %35 = arith.addf %28, %34 : vector<256x64xf32>
    %c2_35 = arith.constant 2 : index
    %c0_36 = arith.constant 0 : index
    %c1_37 = arith.constant 1 : index
    %c0_38 = arith.constant 0 : index
    %36 = vector.load %arg1[%c2_35, %c0_36, %c1_37, %c0_38] : memref<4x17x17x64xbf16, #tpu.memory_space<vmem>>, vector<1x16x16x64xbf16>
    %37 = vector.shape_cast %36 : vector<1x16x16x64xbf16> to vector<16x16x64xbf16>
    %38 = vector.shape_cast %37 : vector<16x16x64xbf16> to vector<256x64xbf16>
    %c5 = arith.constant 5 : index
    %c0_39 = arith.constant 0 : index
    %c0_40 = arith.constant 0 : index
    %39 = vector.load %arg2[%c5, %c0_39, %c0_40] : memref<9x64x64xbf16, #tpu.memory_space<vmem>>, vector<1x64x64xbf16>
    %40 = vector.shape_cast %39 : vector<1x64x64xbf16> to vector<64x64xbf16>
    %cst_41 = arith.constant dense<0.000000e+00> : vector<256x64xf32>
    %41 = tpu.matmul %38, %40, %cst_41 {dimension_numbers = #tpu.dot_dimension_numbers<[1], [0], [0], [1], [0, 0, 1, 1], [], []>} : vector<256x64xbf16>, vector<64x64xbf16>, vector<256x64xf32> -> vector<256x64xf32>
    %42 = arith.addf %35, %41 : vector<256x64xf32>
    %c0_42 = arith.constant 0 : index
    %c1_43 = arith.constant 1 : index
    %c0_44 = arith.constant 0 : index
    %c0_45 = arith.constant 0 : index
    %43 = vector.load %arg1[%c0_42, %c1_43, %c0_44, %c0_45] : memref<4x17x17x64xbf16, #tpu.memory_space<vmem>>, vector<1x16x16x64xbf16>
    %44 = vector.shape_cast %43 : vector<1x16x16x64xbf16> to vector<16x16x64xbf16>
    %45 = vector.shape_cast %44 : vector<16x16x64xbf16> to vector<256x64xbf16>
    %c6 = arith.constant 6 : index
    %c0_46 = arith.constant 0 : index
    %c0_47 = arith.constant 0 : index
    %46 = vector.load %arg2[%c6, %c0_46, %c0_47] : memref<9x64x64xbf16, #tpu.memory_space<vmem>>, vector<1x64x64xbf16>
    %47 = vector.shape_cast %46 : vector<1x64x64xbf16> to vector<64x64xbf16>
    %cst_48 = arith.constant dense<0.000000e+00> : vector<256x64xf32>
    %48 = tpu.matmul %45, %47, %cst_48 {dimension_numbers = #tpu.dot_dimension_numbers<[1], [0], [0], [1], [0, 0, 1, 1], [], []>} : vector<256x64xbf16>, vector<64x64xbf16>, vector<256x64xf32> -> vector<256x64xf32>
    %49 = arith.addf %42, %48 : vector<256x64xf32>
    %c1_49 = arith.constant 1 : index
    %c1_50 = arith.constant 1 : index
    %c0_51 = arith.constant 0 : index
    %c0_52 = arith.constant 0 : index
    %50 = vector.load %arg1[%c1_49, %c1_50, %c0_51, %c0_52] : memref<4x17x17x64xbf16, #tpu.memory_space<vmem>>, vector<1x16x16x64xbf16>
    %51 = vector.shape_cast %50 : vector<1x16x16x64xbf16> to vector<16x16x64xbf16>
    %52 = vector.shape_cast %51 : vector<16x16x64xbf16> to vector<256x64xbf16>
    %c7 = arith.constant 7 : index
    %c0_53 = arith.constant 0 : index
    %c0_54 = arith.constant 0 : index
    %53 = vector.load %arg2[%c7, %c0_53, %c0_54] : memref<9x64x64xbf16, #tpu.memory_space<vmem>>, vector<1x64x64xbf16>
    %54 = vector.shape_cast %53 : vector<1x64x64xbf16> to vector<64x64xbf16>
    %cst_55 = arith.constant dense<0.000000e+00> : vector<256x64xf32>
    %55 = tpu.matmul %52, %54, %cst_55 {dimension_numbers = #tpu.dot_dimension_numbers<[1], [0], [0], [1], [0, 0, 1, 1], [], []>} : vector<256x64xbf16>, vector<64x64xbf16>, vector<256x64xf32> -> vector<256x64xf32>
    %56 = arith.addf %49, %55 : vector<256x64xf32>
    %c0_56 = arith.constant 0 : index
    %c1_57 = arith.constant 1 : index
    %c1_58 = arith.constant 1 : index
    %c0_59 = arith.constant 0 : index
    %57 = vector.load %arg1[%c0_56, %c1_57, %c1_58, %c0_59] : memref<4x17x17x64xbf16, #tpu.memory_space<vmem>>, vector<1x16x16x64xbf16>
    %58 = vector.shape_cast %57 : vector<1x16x16x64xbf16> to vector<16x16x64xbf16>
    %59 = vector.shape_cast %58 : vector<16x16x64xbf16> to vector<256x64xbf16>
    %c8 = arith.constant 8 : index
    %c0_60 = arith.constant 0 : index
    %c0_61 = arith.constant 0 : index
    %60 = vector.load %arg2[%c8, %c0_60, %c0_61] : memref<9x64x64xbf16, #tpu.memory_space<vmem>>, vector<1x64x64xbf16>
    %61 = vector.shape_cast %60 : vector<1x64x64xbf16> to vector<64x64xbf16>
    %cst_62 = arith.constant dense<0.000000e+00> : vector<256x64xf32>
    %62 = tpu.matmul %59, %61, %cst_62 {dimension_numbers = #tpu.dot_dimension_numbers<[1], [0], [0], [1], [0, 0, 1, 1], [], []>} : vector<256x64xbf16>, vector<64x64xbf16>, vector<256x64xf32> -> vector<256x64xf32>
    %63 = arith.addf %56, %62 : vector<256x64xf32>
    %c0_63 = arith.constant 0 : index
    %c0_64 = arith.constant 0 : index
    %64 = vector.load %arg3[%c0_63, %c0_64] : memref<1x64xf32, #tpu.memory_space<vmem>>, vector<1x64xf32>
    %65 = vector.broadcast %64 : vector<1x64xf32> to vector<256x64xf32>
    %66 = arith.addf %63, %65 : vector<256x64xf32>
    %cst_65 = arith.constant 0.000000e+00 : f32
    %67 = vector.broadcast %cst_65 : f32 to vector<256x64xf32>
    %68 = arith.maximumf %66, %67 : vector<256x64xf32>
    %69 = vector.shape_cast %68 : vector<256x64xf32> to vector<1x256x64xf32>
    %70 = arith.truncf %69 : vector<1x256x64xf32> to vector<1x256x64xbf16>
    %c0_66 = arith.constant 0 : index
    %c0_67 = arith.constant 0 : index
    %c0_68 = arith.constant 0 : index
    %71 = vector.load %arg4[%c0_66, %c0_67, %c0_68] : memref<1x256x64xbf16, #tpu.memory_space<vmem>>, vector<1x256x64xbf16>
    tpu.vector_store %arg4[%c0_66, %c0_67, %c0_68], %70 {strides = array<i32>} : memref<1x256x64xbf16, #tpu.memory_space<vmem>>, vector<1x256x64xbf16>,
    return
  }
  func.func @transform_0(%arg0: i32) -> (i32, i32, i32, i32) {
    %c0_i32 = arith.constant 0 : i32
    %c0_i32_0 = arith.constant 0 : i32
    %c0_i32_1 = arith.constant 0 : i32
    %c0_i32_2 = arith.constant 0 : i32
    return %arg0, %c0_i32, %c0_i32_0, %c0_i32_1 : i32, i32, i32, i32
  }
  func.func @transform_1(%arg0: i32) -> (i32, i32, i32) {
    %c0_i32 = arith.constant 0 : i32
    %c0_i32_0 = arith.constant 0 : i32
    %c0_i32_1 = arith.constant 0 : i32
    %c0_i32_2 = arith.constant 0 : i32
    return %c0_i32, %c0_i32_0, %c0_i32_1 : i32, i32, i32
  }
  func.func @transform_2(%arg0: i32) -> (i32, i32) {
    %c0_i32 = arith.constant 0 : i32
    %c0_i32_0 = arith.constant 0 : i32
    %c0_i32_1 = arith.constant 0 : i32
    return %c0_i32, %c0_i32_0 : i32, i32
  }
  func.func @transform_3(%arg0: i32) -> (i32, i32, i32) {
    %c0_i32 = arith.constant 0 : i32
    %c0_i32_0 = arith.constant 0 : i32
    %c0_i32_1 = arith.constant 0 : i32
    return %arg0, %c0_i32, %c0_i32_0 : i32, i32, i32
  }
}

module attributes {stable_mosaic.version = 11 : i64} {
  func.func @_mm_bias_kernel(%arg0: i32, %arg1: memref<512x64xbf16, #tpu.memory_space<vmem>>, %arg2: memref<64x256xbf16, #tpu.memory_space<vmem>>, %arg3: memref<1x256xf32, #tpu.memory_space<vmem>>, %arg4: memref<512x256xf32, #tpu.memory_space<vmem>>) attributes {dimension_semantics = [#tpu.dimension_semantics<parallel>], iteration_bounds = array<i64: 1>, scalar_prefetch = 0 : i64, scratch_operands = 0 : i64, tpu.core_type = #tpu.core_type<tc>, window_params = [{transform_indices = @transform_0, window_bounds = array<i64: 512, 64>}, {pipeline_mode = #tpu.pipeline_mode<synchronous>, transform_indices = @transform_1, window_bounds = array<i64: 64, 256>}, {pipeline_mode = #tpu.pipeline_mode<synchronous>, transform_indices = @transform_2, window_bounds = array<i64: 1, 256>}, {transform_indices = @transform_3, window_bounds = array<i64: 512, 256>}]} {
    %c0 = arith.constant 0 : index
    %c0_0 = arith.constant 0 : index
    %0 = vector.load %arg1[%c0, %c0_0] : memref<512x64xbf16, #tpu.memory_space<vmem>>, vector<512x64xbf16>
    %c0_1 = arith.constant 0 : index
    %c0_2 = arith.constant 0 : index
    %1 = vector.load %arg2[%c0_1, %c0_2] : memref<64x256xbf16, #tpu.memory_space<vmem>>, vector<64x256xbf16>
    %cst = arith.constant dense<0.000000e+00> : vector<512x256xf32>
    %2 = tpu.matmul %0, %1, %cst {dimension_numbers = #tpu.dot_dimension_numbers<[1], [0], [0], [1], [0, 0, 1, 1], [], []>} : vector<512x64xbf16>, vector<64x256xbf16>, vector<512x256xf32> -> vector<512x256xf32>
    %c0_3 = arith.constant 0 : index
    %c0_4 = arith.constant 0 : index
    %3 = vector.load %arg3[%c0_3, %c0_4] : memref<1x256xf32, #tpu.memory_space<vmem>>, vector<1x256xf32>
    %4 = vector.broadcast %3 : vector<1x256xf32> to vector<512x256xf32>
    %5 = arith.addf %2, %4 : vector<512x256xf32>
    %c0_5 = arith.constant 0 : index
    %c0_6 = arith.constant 0 : index
    %6 = vector.load %arg4[%c0_5, %c0_6] : memref<512x256xf32, #tpu.memory_space<vmem>>, vector<512x256xf32>
    tpu.vector_store %arg4[%c0_5, %c0_6], %5 {strides = array<i32>} : memref<512x256xf32, #tpu.memory_space<vmem>>, vector<512x256xf32>,
    return
  }
  func.func @transform_0(%arg0: i32) -> (i32, i32) {
    %c0_i32 = arith.constant 0 : i32
    %c0_i32_0 = arith.constant 0 : i32
    return %arg0, %c0_i32 : i32, i32
  }
  func.func @transform_1(%arg0: i32) -> (i32, i32) {
    %c0_i32 = arith.constant 0 : i32
    %c0_i32_0 = arith.constant 0 : i32
    %c0_i32_1 = arith.constant 0 : i32
    return %c0_i32, %c0_i32_0 : i32, i32
  }
  func.func @transform_2(%arg0: i32) -> (i32, i32) {
    %c0_i32 = arith.constant 0 : i32
    %c0_i32_0 = arith.constant 0 : i32
    %c0_i32_1 = arith.constant 0 : i32
    return %c0_i32, %c0_i32_0 : i32, i32
  }
  func.func @transform_3(%arg0: i32) -> (i32, i32) {
    %c0_i32 = arith.constant 0 : i32
    %c0_i32_0 = arith.constant 0 : i32
    return %arg0, %c0_i32 : i32, i32
  }
}

</mosaic_0001>

<bundles_post_ra>
// kernel: _lambda_.3
= control target key start
LH: loop header
LB: loop body
LE: loop exit
PB: predicated region body
PF: predicated region fallthrough
CT: control target
= control target key end

     0   :  { %s1222_s12 = smov 0   ;;  %s1523_s0 = inlined_call_operand.vmem [shape: bf16[2048,64], index: 0, kind: input, shape index: {}]   ;;  %s1524_s1 = inlined_call_operand.vmem [shape: bf16[64,64], index: 1, kind: input, shape index: {}]   ;;  %s1525_s2 = inlined_call_operand.vmem [shape: f32[1,64], index: 2, kind: input, shape index: {}]   ;;  %s1526_s3 = inlined_call_operand.vmem [shape: bf16[2048,64], index: 3, kind: output, shape index: {}]  }
   0x1 LB: > { %s950_s13 = sadd.s32 4294967295, %s1200_s12   ;;  %p954_p0 = scmp.ge.s32.totalorder %s1200_s12, 1  ;;  %s1200_s12 = sphi %s1222_s12, %s13_s12  }
   0x2   : > { %p138_p1 = scmp.lt.s32.totalorder %s1200_s12, 5 }
   0x4   : > { %p139_p2 = pnand %p954_p0, %p138_p1 }
   0x5   : > { %s955_s16 = sshll.u32 (!%p139_p2), %s950_s13, 6 }
   0x6   : > { %142 = sbr.rel (%p139_p2) target bundleno = 288 (0x120), region = 32  ;;  %p163_p3 = scmp.lt.s32.totalorder (!%p139_p2), %s955_s16, 255 }
   0xb   : > { %v1172_v0 = vld [vmem:[%s1524_s1 + $0x18] sm:$0xff]  ;;  %v1171_v1 = vld [vmem:[%s1524_s1 + $0x10] sm:$0xff]  ;;  %s1528_s16 = smov (!%p163_p3, %s955_s16), 255  ;;  %v1170_v2 = vld [vmem:[%s1524_s1 + $0x8] sm:$0xff]  ;;  %vm435_vm0 = vcmask 523264   ;;  %vm829_vm1 = vcmask 519168  }
   0xc   : > { %536 = vmatpush.bf16.msra.mxu0 %v1172_v0  ;;  %1173 = vmatpush.bf16.msra.mxu1 %v1172_v0  ;;  %s956_s21 = sshll.u32 %s1528_s16, 2  ;;  %v1169_v3 = vld [vmem:[%s1524_s1] sm:$0xff] }
   0xd   : > { %1174 = vmatpush.bf16.msra.mxu2 %v1172_v0  ;;  %1175 = vmatpush.bf16.msra.mxu3 %v1172_v0  ;;  %s1250_s26 = scalar_lea.vmem %s1523_s0, %s956_s21  ;;  %v1319_v36 = vld [vmem:[%s1525_s2] ss:$0 sm:$0xff]  ;;  %s1328_s4 = scalar_lea.vmem %s1526_s3, %s956_s21 }
   0xe   : > { %v1137_v4 = vld [vmem:[%s1250_s26] sm:$0xff]  ;;  %v1138_v8 = vld [vmem:[%s1250_s26 + $0x8] sm:$0xff]  ;;  %v1139_v12 = vld [vmem:[%s1250_s26 + $0x10] sm:$0xff] }
   0xf   : > { %v1145_v5 = vld [vmem:[%s1250_s26 + $0x40] sm:$0xff]  ;;  %v1146_v9 = vld [vmem:[%s1250_s26 + $0x48] sm:$0xff]  ;;  %v1147_v13 = vld [vmem:[%s1250_s26 + $0x50] sm:$0xff] }
  0x10   : > { %537 = vmatpush.bf16.msra.mxu0 %v1171_v1  ;;  %1176 = vmatpush.bf16.msra.mxu1 %v1171_v1  ;;  %v1153_v6 = vld [vmem:[%s1250_s26 + $0x80] sm:$0xff]  ;;  %v1154_v10 = vld [vmem:[%s1250_s26 + $0x88] sm:$0xff]  ;;  %v1155_v14 = vld [vmem:[%s1250_s26 + $0x90] sm:$0xff] }
  0x11   : > { %1177 = vmatpush.bf16.msra.mxu2 %v1171_v1  ;;  %1178 = vmatpush.bf16.msra.mxu3 %v1171_v1  ;;  %v1161_v7 = vld [vmem:[%s1250_s26 + $0xc0] sm:$0xff]  ;;  %v1162_v11 = vld [vmem:[%s1250_s26 + $0xc8] sm:$0xff]  ;;  %v1163_v15 = vld [vmem:[%s1250_s26 + $0xd0] sm:$0xff] }
  0x12   : > { %v1140_v16 = vld [vmem:[%s1250_s26 + $0x18] sm:$0xff]  ;;  %v1141_v20 = vld [vmem:[%s1250_s26 + $0x20] sm:$0xff]  ;;  %v1142_v24 = vld [vmem:[%s1250_s26 + $0x28] sm:$0xff] }
  0x13   : > { %v1148_v17 = vld [vmem:[%s1250_s26 + $0x58] sm:$0xff]  ;;  %v1149_v21 = vld [vmem:[%s1250_s26 + $0x60] sm:$0xff]  ;;  %v1150_v25 = vld [vmem:[%s1250_s26 + $0x68] sm:$0xff] }
  0x14   : > { %538 = vmatpush.bf16.msra.mxu0 %v1170_v2  ;;  %1179 = vmatpush.bf16.msra.mxu1 %v1170_v2  ;;  %v1156_v18 = vld [vmem:[%s1250_s26 + $0x98] sm:$0xff]  ;;  %v1157_v22 = vld [vmem:[%s1250_s26 + $0xa0] sm:$0xff]  ;;  %v1158_v26 = vld [vmem:[%s1250_s26 + $0xa8] sm:$0xff] }
  0x15   : > { %1180 = vmatpush.bf16.msra.mxu2 %v1170_v2  ;;  %1181 = vmatpush.bf16.msra.mxu3 %v1170_v2  ;;  %v1164_v19 = vld [vmem:[%s1250_s26 + $0xd8] sm:$0xff]  ;;  %v1165_v23 = vld [vmem:[%s1250_s26 + $0xe0] sm:$0xff]  ;;  %v1166_v27 = vld [vmem:[%s1250_s26 + $0xe8] sm:$0xff] }
  0x16   : > { %v1143_v28 = vld [vmem:[%s1250_s26 + $0x30] sm:$0xff]  ;;  %v1144_v32 = vld [vmem:[%s1250_s26 + $0x38] sm:$0xff] }
  0x17   : > { %v1151_v29 = vld [vmem:[%s1250_s26 + $0x70] sm:$0xff]  ;;  %v1152_v33 = vld [vmem:[%s1250_s26 + $0x78] sm:$0xff] }
  0x18   : > { %539 = vmatpush.bf16.msra.mxu0 %v1169_v3  ;;  %1182 = vmatpush.bf16.msra.mxu1 %v1169_v3  ;;  %v1159_v30 = vld [vmem:[%s1250_s26 + $0xb0] sm:$0xff]  ;;  %v1160_v34 = vld [vmem:[%s1250_s26 + $0xb8] sm:$0xff] }
  0x19   : > { %1183 = vmatpush.bf16.msra.mxu2 %v1169_v3  ;;  %1184 = vmatpush.bf16.msra.mxu3 %v1169_v3  ;;  %v1167_v31 = vld [vmem:[%s1250_s26 + $0xf0] sm:$0xff]  ;;  %v1168_v35 = vld [vmem:[%s1250_s26 + $0xf8] sm:$0xff] }
  0x1b   : > { %1103 = vmatmul.msk.bf16.vlgmr.msra.gmra.mxu0 %vm435_vm0, %v1137_v4  ;;  %1111 = vmatmul.msk.bf16.vlgmr.msra.gmra.mxu1 %vm435_vm0, %v1145_v5 }
  0x1c   : > { %1119 = vmatmul.msk.bf16.vlgmr.msra.gmra.mxu2 %vm435_vm0, %v1153_v6  ;;  %1127 = vmatmul.msk.bf16.vlgmr.msra.gmra.mxu3 %vm435_vm0, %v1161_v7 }
  0x2b   : > { %1104 = vmatmul.msk.bf16.gmra.mxu0 %vm435_vm0, %v1138_v8  ;;  %1112 = vmatmul.msk.bf16.gmra.mxu1 %vm435_vm0, %v1146_v9 }
  0x2c   : > { %1120 = vmatmul.msk.bf16.gmra.mxu2 %vm435_vm0, %v1154_v10  ;;  %1128 = vmatmul.msk.bf16.gmra.mxu3 %vm435_vm0, %v1162_v11 }
  0x3b   : > { %1105 = vmatmul.msk.bf16.gmra.mxu0 %vm435_vm0, %v1139_v12  ;;  %1113 = vmatmul.msk.bf16.gmra.mxu1 %vm435_vm0, %v1147_v13 }
  0x3c   : > { %1121 = vmatmul.msk.bf16.gmra.mxu2 %vm435_vm0, %v1155_v14  ;;  %1129 = vmatmul.msk.bf16.gmra.mxu3 %vm435_vm0, %v1163_v15 }
  0x4b   : > { %1106 = vmatmul.msk.bf16.gmra.mxu0 %vm435_vm0, %v1140_v16  ;;  %1114 = vmatmul.msk.bf16.gmra.mxu1 %vm435_vm0, %v1148_v17 }
  0x4c   : > { %1122 = vmatmul.msk.bf16.gmra.mxu2 %vm435_vm0, %v1156_v18  ;;  %1130 = vmatmul.msk.bf16.gmra.mxu3 %vm435_vm0, %v1164_v19 }
  0x5b   : > { %1107 = vmatmul.msk.bf16.gmra.mxu0 %vm435_vm0, %v1141_v20  ;;  %1115 = vmatmul.msk.bf16.gmra.mxu1 %vm435_vm0, %v1149_v21 }
  0x5c   : > { %1123 = vmatmul.msk.bf16.gmra.mxu2 %vm435_vm0, %v1157_v22  ;;  %1131 = vmatmul.msk.bf16.gmra.mxu3 %vm435_vm0, %v1165_v23 }
  0x6b   : > { %1108 = vmatmul.msk.bf16.gmra.mxu0 %vm435_vm0, %v1142_v24  ;;  %1116 = vmatmul.msk.bf16.gmra.mxu1 %vm435_vm0, %v1150_v25 }
  0x6c   : > { %1124 = vmatmul.msk.bf16.gmra.mxu2 %vm435_vm0, %v1158_v26  ;;  %1132 = vmatmul.msk.bf16.gmra.mxu3 %vm435_vm0, %v1166_v27 }
  0x7b   : > { %1109 = vmatmul.msk.bf16.gmra.mxu0 %vm435_vm0, %v1143_v28  ;;  %1117 = vmatmul.msk.bf16.gmra.mxu1 %vm435_vm0, %v1151_v29 }
  0x7c   : > { %1125 = vmatmul.msk.bf16.gmra.mxu2 %vm435_vm0, %v1159_v30  ;;  %1133 = vmatmul.msk.bf16.gmra.mxu3 %vm435_vm0, %v1167_v31 }
  0x8b   : > { %1110 = vmatmul.msk.bf16.gmra.mxu0 %vm435_vm0, %v1144_v32  ;;  %1118 = vmatmul.msk.bf16.gmra.mxu1 %vm435_vm0, %v1152_v33 }
  0x8c   : > { %1126 = vmatmul.msk.bf16.gmra.mxu2 %vm435_vm0, %v1160_v34  ;;  %1134 = vmatmul.msk.bf16.gmra.mxu3 %vm435_vm0, %v1168_v35 }
  0x98   : > { %v541_v37 = vpop.f32.mrf.mxu0  ;;  %v581_v38 = vpop.f32.mrf.mxu1 }
  0x99   : > { %v542_v39 = vadd.f32 %v1319_v36, %v541_v37  ;;  %v582_v40 = vadd.f32 %v1319_v36, %v581_v38 }
  0x9b   : > { %v701_v41 = vmax.f32 %v542_v39, 0.0  ;;  %v717_v42 = vmax.f32 %v582_v40, 0.0 }
  0x9d   : > { %v765_v43 = vpack.c.bf16 %v701_v41, %v701_v41  ;;  %v781_v44 = vpack.c.bf16 %v717_v42, %v717_v42 }
  0x9f   : > { %830 = vst.msk [vmem:[%s1328_s4] sm:$0xf] %vm829_vm1, %v765_v43  ;;  %v621_v45 = vpop.f32.mrf.mxu2  ;;  %v661_v46 = vpop.f32.mrf.mxu3 }
  0xa0   : > { %846 = vst.msk [vmem:[%s1328_s4 + $0x40] sm:$0xf] %vm829_vm1, %v781_v44  ;;  %v622_v47 = vadd.f32 %v1319_v36, %v621_v45  ;;  %v662_v48 = vadd.f32 %v1319_v36, %v661_v46  ;;  %v543_v49 = vpop.f32.mrf.mxu0  ;;  %v583_v50 = vpop.f32.mrf.mxu1 }
  0xa1   : > { %v544_v51 = vadd.f32 %v1319_v36, %v543_v49  ;;  %v584_v52 = vadd.f32 %v1319_v36, %v583_v50 }
  0xa2   : > { %v733_v53 = vmax.f32 %v622_v47, 0.0  ;;  %v749_v54 = vmax.f32 %v662_v48, 0.0 }
  0xa3   : > { %v702_v55 = vmax.f32 %v544_v51, 0.0  ;;  %v718_v56 = vmax.f32 %v584_v52, 0.0 }
  0xa4   : > { %v797_v57 = vpack.c.bf16 %v733_v53, %v733_v53  ;;  %v813_v58 = vpack.c.bf16 %v749_v54, %v749_v54 }
  0xa5   : > { %v766_v59 = vpack.c.bf16 %v702_v55, %v702_v55  ;;  %v782_v60 = vpack.c.bf16 %v718_v56, %v718_v56 }
  0xa6   : > { %862 = vst.msk [vmem:[%s1328_s4 + $0x80] sm:$0xf] %vm829_vm1, %v797_v57 }
  0xa7   : > { %878 = vst.msk [vmem:[%s1328_s4 + $0xc0] sm:$0xf] %vm829_vm1, %v813_v58  ;;  %v623_v61 = vpop.f32.mrf.mxu2  ;;  %v663_v62 = vpop.f32.mrf.mxu3 }
  0xa8   : > { %831 = vst.msk [vmem:[%s1328_s4 + $0x4] sm:$0xf] %vm829_vm1, %v766_v59  ;;  %v624_v63 = vadd.f32 %v1319_v36, %v623_v61  ;;  %v664_v0 = vadd.f32 %v1319_v36, %v663_v62  ;;  %v546_v1 = vpop.f32.mrf.mxu0  ;;  %v586_v2 = vpop.f32.mrf.mxu1 }
  0xa9   : > { %847 = vst.msk [vmem:[%s1328_s4 + $0x44] sm:$0xf] %vm829_vm1, %v782_v60  ;;  %v547_v3 = vadd.f32 %v1319_v36, %v546_v1  ;;  %v587_v4 = vadd.f32 %v1319_v36, %v586_v2 }
  0xaa   : > { %v734_v5 = vmax.f32 %v624_v63, 0.0  ;;  %v750_v6 = vmax.f32 %v664_v0, 0.0 }
  0xab   : > { %v703_v7 = vmax.f32 %v547_v3, 0.0  ;;  %v719_v8 = vmax.f32 %v587_v4, 0.0 }
  0xac   : > { %v798_v9 = vpack.c.bf16 %v734_v5, %v734_v5  ;;  %v814_v10 = vpack.c.bf16 %v750_v6, %v750_v6 }
  0xad   : > { %v767_v11 = vpack.c.bf16 %v703_v7, %v703_v7  ;;  %v783_v12 = vpack.c.bf16 %v719_v8, %v719_v8 }
  0xae   : > { %863 = vst.msk [vmem:[%s1328_s4 + $0x84] sm:$0xf] %vm829_vm1, %v798_v9 }
  0xaf   : > { %879 = vst.msk [vmem:[%s1328_s4 + $0xc4] sm:$0xf] %vm829_vm1, %v814_v10  ;;  %v626_v13 = vpop.f32.mrf.mxu2  ;;  %v666_v14 = vpop.f32.mrf.mxu3 }
  0xb0   : > { %832 = vst.msk [vmem:[%s1328_s4 + $0x8] sm:$0xf] %vm829_vm1, %v767_v11  ;;  %v627_v15 = vadd.f32 %v1319_v36, %v626_v13  ;;  %v667_v16 = vadd.f32 %v1319_v36, %v666_v14  ;;  %v548_v17 = vpop.f32.mrf.mxu0  ;;  %v588_v18 = vpop.f32.mrf.mxu1 }
  0xb1   : > { %848 = vst.msk [vmem:[%s1328_s4 + $0x48] sm:$0xf] %vm829_vm1, %v783_v12  ;;  %v549_v19 = vadd.f32 %v1319_v36, %v548_v17  ;;  %v589_v20 = vadd.f32 %v1319_v36, %v588_v18 }
  0xb2   : > { %v735_v21 = vmax.f32 %v627_v15, 0.0  ;;  %v751_v22 = vmax.f32 %v667_v16, 0.0 }
  0xb3   : > { %v704_v23 = vmax.f32 %v549_v19, 0.0  ;;  %v720_v24 = vmax.f32 %v589_v20, 0.0 }
  0xb4   : > { %v799_v25 = vpack.c.bf16 %v735_v21, %v735_v21  ;;  %v815_v26 = vpack.c.bf16 %v751_v22, %v751_v22 }
  0xb5   : > { %v768_v27 = vpack.c.bf16 %v704_v23, %v704_v23  ;;  %v784_v28 = vpack.c.bf16 %v720_v24, %v720_v24 }
  0xb6   : > { %864 = vst.msk [vmem:[%s1328_s4 + $0x88] sm:$0xf] %vm829_vm1, %v799_v25 }
  0xb7   : > { %880 = vst.msk [vmem:[%s1328_s4 + $0xc8] sm:$0xf] %vm829_vm1, %v815_v26  ;;  %v628_v29 = vpop.f32.mrf.mxu2  ;;  %v668_v30 = vpop.f32.mrf.mxu3 }
  0xb8   : > { %833 = vst.msk [vmem:[%s1328_s4 + $0xc] sm:$0xf] %vm829_vm1, %v768_v27  ;;  %v629_v31 = vadd.f32 %v1319_v36, %v628_v29  ;;  %v669_v32 = vadd.f32 %v1319_v36, %v668_v30  ;;  %v551_v33 = vpop.f32.mrf.mxu0  ;;  %v591_v34 = vpop.f32.mrf.mxu1 }
  0xb9   : > { %849 = vst.msk [vmem:[%s1328_s4 + $0x4c] sm:$0xf] %vm829_vm1, %v784_v28  ;;  %v552_v35 = vadd.f32 %v1319_v36, %v551_v33  ;;  %v592_v37 = vadd.f32 %v1319_v36, %v591_v34 }
  0xba   : > { %v736_v38 = vmax.f32 %v629_v31, 0.0  ;;  %v752_v39 = vmax.f32 %v669_v32, 0.0 }
  0xbb   : > { %v705_v40 = vmax.f32 %v552_v35, 0.0  ;;  %v721_v41 = vmax.f32 %v592_v37, 0.0 }
  0xbc   : > { %v800_v42 = vpack.c.bf16 %v736_v38, %v736_v38  ;;  %v816_v43 = vpack.c.bf16 %v752_v39, %v752_v39 }
  0xbd   : > { %v769_v44 = vpack.c.bf16 %v705_v40, %v705_v40  ;;  %v785_v45 = vpack.c.bf16 %v721_v41, %v721_v41 }
  0xbe   : > { %865 = vst.msk [vmem:[%s1328_s4 + $0x8c] sm:$0xf] %vm829_vm1, %v800_v42 }
  0xbf   : > { %881 = vst.msk [vmem:[%s1328_s4 + $0xcc] sm:$0xf] %vm829_vm1, %v816_v43  ;;  %v631_v46 = vpop.f32.mrf.mxu2  ;;  %v671_v47 = vpop.f32.mrf.mxu3 }
  0xc0   : > { %834 = vst.msk [vmem:[%s1328_s4 + $0x10] sm:$0xf] %vm829_vm1, %v769_v44  ;;  %v632_v48 = vadd.f32 %v1319_v36, %v631_v46  ;;  %v672_v49 = vadd.f32 %v1319_v36, %v671_v47  ;;  %v553_v50 = vpop.f32.mrf.mxu0  ;;  %v593_v51 = vpop.f32.mrf.mxu1 }
  0xc1   : > { %850 = vst.msk [vmem:[%s1328_s4 + $0x50] sm:$0xf] %vm829_vm1, %v785_v45  ;;  %v554_v52 = vadd.f32 %v1319_v36, %v553_v50  ;;  %v594_v53 = vadd.f32 %v1319_v36, %v593_v51 }
  0xc2   : > { %v737_v54 = vmax.f32 %v632_v48, 0.0  ;;  %v753_v55 = vmax.f32 %v672_v49, 0.0 }
  0xc3   : > { %v706_v56 = vmax.f32 %v554_v52, 0.0  ;;  %v722_v57 = vmax.f32 %v594_v53, 0.0 }
  0xc4   : > { %v801_v58 = vpack.c.bf16 %v737_v54, %v737_v54  ;;  %v817_v59 = vpack.c.bf16 %v753_v55, %v753_v55 }
  0xc5   : > { %v770_v60 = vpack.c.bf16 %v706_v56, %v706_v56  ;;  %v786_v61 = vpack.c.bf16 %v722_v57, %v722_v57 }
  0xc6   : > { %866 = vst.msk [vmem:[%s1328_s4 + $0x90] sm:$0xf] %vm829_vm1, %v801_v58 }
  0xc7   : > { %882 = vst.msk [vmem:[%s1328_s4 + $0xd0] sm:$0xf] %vm829_vm1, %v817_v59  ;;  %v633_v62 = vpop.f32.mrf.mxu2  ;;  %v673_v63 = vpop.f32.mrf.mxu3 }
  0xc8   : > { %835 = vst.msk [vmem:[%s1328_s4 + $0x14] sm:$0xf] %vm829_vm1, %v770_v60  ;;  %v634_v0 = vadd.f32 %v1319_v36, %v633_v62  ;;  %v674_v1 = vadd.f32 %v1319_v36, %v673_v63  ;;  %v556_v2 = vpop.f32.mrf.mxu0  ;;  %v596_v3 = vpop.f32.mrf.mxu1 }
  0xc9   : > { %851 = vst.msk [vmem:[%s1328_s4 + $0x54] sm:$0xf] %vm829_vm1, %v786_v61  ;;  %v557_v4 = vadd.f32 %v1319_v36, %v556_v2  ;;  %v597_v5 = vadd.f32 %v1319_v36, %v596_v3 }
  0xca   : > { %v738_v6 = vmax.f32 %v634_v0, 0.0  ;;  %v754_v7 = vmax.f32 %v674_v1, 0.0 }
  0xcb   : > { %v707_v8 = vmax.f32 %v557_v4, 0.0  ;;  %v723_v9 = vmax.f32 %v597_v5, 0.0 }
  0xcc   : > { %v802_v10 = vpack.c.bf16 %v738_v6, %v738_v6  ;;  %v818_v11 = vpack.c.bf16 %v754_v7, %v754_v7 }
  0xcd   : > { %v771_v12 = vpack.c.bf16 %v707_v8, %v707_v8  ;;  %v787_v13 = vpack.c.bf16 %v723_v9, %v723_v9 }
  0xce   : > { %867 = vst.msk [vmem:[%s1328_s4 + $0x94] sm:$0xf] %vm829_vm1, %v802_v10 }
  0xcf   : > { %883 = vst.msk [vmem:[%s1328_s4 + $0xd4] sm:$0xf] %vm829_vm1, %v818_v11  ;;  %v636_v14 = vpop.f32.mrf.mxu2  ;;  %v676_v15 = vpop.f32.mrf.mxu3 }
  0xd0   : > { %836 = vst.msk [vmem:[%s1328_s4 + $0x18] sm:$0xf] %vm829_vm1, %v771_v12  ;;  %v637_v16 = vadd.f32 %v1319_v36, %v636_v14  ;;  %v677_v17 = vadd.f32 %v1319_v36, %v676_v15  ;;  %v558_v18 = vpop.f32.mrf.mxu0  ;;  %v598_v19 = vpop.f32.mrf.mxu1 }
  0xd1   : > { %852 = vst.msk [vmem:[%s1328_s4 + $0x58] sm:$0xf] %vm829_vm1, %v787_v13  ;;  %v559_v20 = vadd.f32 %v1319_v36, %v558_v18  ;;  %v599_v21 = vadd.f32 %v1319_v36, %v598_v19 }
  0xd2   : > { %v739_v22 = vmax.f32 %v637_v16, 0.0  ;;  %v755_v23 = vmax.f32 %v677_v17, 0.0 }
  0xd3   : > { %v708_v24 = vmax.f32 %v559_v20, 0.0  ;;  %v724_v25 = vmax.f32 %v599_v21, 0.0 }
  0xd4   : > { %v803_v26 = vpack.c.bf16 %v739_v22, %v739_v22  ;;  %v819_v27 = vpack.c.bf16 %v755_v23, %v755_v23 }
  0xd5   : > { %v772_v28 = vpack.c.bf16 %v708_v24, %v708_v24  ;;  %v788_v29 = vpack.c.bf16 %v724_v25, %v724_v25 }
  0xd6   : > { %868 = vst.msk [vmem:[%s1328_s4 + $0x98] sm:$0xf] %vm829_vm1, %v803_v26 }
  0xd7   : > { %884 = vst.msk [vmem:[%s1328_s4 + $0xd8] sm:$0xf] %vm829_vm1, %v819_v27  ;;  %v638_v30 = vpop.f32.mrf.mxu2  ;;  %v678_v31 = vpop.f32.mrf.mxu3 }
  0xd8   : > { %837 = vst.msk [vmem:[%s1328_s4 + $0x1c] sm:$0xf] %vm829_vm1, %v772_v28  ;;  %v639_v32 = vadd.f32 %v1319_v36, %v638_v30  ;;  %v679_v33 = vadd.f32 %v1319_v36, %v678_v31  ;;  %v561_v34 = vpop.f32.mrf.mxu0  ;;  %v601_v35 = vpop.f32.mrf.mxu1 }
  0xd9   : > { %853 = vst.msk [vmem:[%s1328_s4 + $0x5c] sm:$0xf] %vm829_vm1, %v788_v29  ;;  %v562_v37 = vadd.f32 %v1319_v36, %v561_v34  ;;  %v602_v38 = vadd.f32 %v1319_v36, %v601_v35 }
  0xda   : > { %v740_v39 = vmax.f32 %v639_v32, 0.0  ;;  %v756_v40 = vmax.f32 %v679_v33, 0.0 }
  0xdb   : > { %v709_v41 = vmax.f32 %v562_v37, 0.0  ;;  %v725_v42 = vmax.f32 %v602_v38, 0.0 }
  0xdc   : > { %v804_v43 = vpack.c.bf16 %v740_v39, %v740_v39  ;;  %v820_v44 = vpack.c.bf16 %v756_v40, %v756_v40 }
  0xdd   : > { %v773_v45 = vpack.c.bf16 %v709_v41, %v709_v41  ;;  %v789_v46 = vpack.c.bf16 %v725_v42, %v725_v42 }
  0xde   : > { %869 = vst.msk [vmem:[%s1328_s4 + $0x9c] sm:$0xf] %vm829_vm1, %v804_v43 }
  0xdf   : > { %885 = vst.msk [vmem:[%s1328_s4 + $0xdc] sm:$0xf] %vm829_vm1, %v820_v44  ;;  %v641_v47 = vpop.f32.mrf.mxu2  ;;  %v681_v48 = vpop.f32.mrf.mxu3 }
  0xe0   : > { %838 = vst.msk [vmem:[%s1328_s4 + $0x20] sm:$0xf] %vm829_vm1, %v773_v45  ;;  %v642_v49 = vadd.f32 %v1319_v36, %v641_v47  ;;  %v682_v50 = vadd.f32 %v1319_v36, %v681_v48  ;;  %v563_v51 = vpop.f32.mrf.mxu0  ;;  %v603_v52 = vpop.f32.mrf.mxu1 }
  0xe1   : > { %854 = vst.msk [vmem:[%s1328_s4 + $0x60] sm:$0xf] %vm829_vm1, %v789_v46  ;;  %v564_v53 = vadd.f32 %v1319_v36, %v563_v51  ;;  %v604_v54 = vadd.f32 %v1319_v36, %v603_v52 }
  0xe2   : > { %v741_v55 = vmax.f32 %v642_v49, 0.0  ;;  %v757_v56 = vmax.f32 %v682_v50, 0.0 }
  0xe3   : > { %v710_v57 = vmax.f32 %v564_v53, 0.0  ;;  %v726_v58 = vmax.f32 %v604_v54, 0.0 }
  0xe4   : > { %v805_v59 = vpack.c.bf16 %v741_v55, %v741_v55  ;;  %v821_v60 = vpack.c.bf16 %v757_v56, %v757_v56 }
  0xe5   : > { %v774_v61 = vpack.c.bf16 %v710_v57, %v710_v57  ;;  %v790_v62 = vpack.c.bf16 %v726_v58, %v726_v58 }
  0xe6   : > { %870 = vst.msk [vmem:[%s1328_s4 + $0xa0] sm:$0xf] %vm829_vm1, %v805_v59 }
  0xe7   : > { %886 = vst.msk [vmem:[%s1328_s4 + $0xe0] sm:$0xf] %vm829_vm1, %v821_v60  ;;  %v643_v63 = vpop.f32.mrf.mxu2  ;;  %v683_v0 = vpop.f32.mrf.mxu3 }
  0xe8   : > { %839 = vst.msk [vmem:[%s1328_s4 + $0x24] sm:$0xf] %vm829_vm1, %v774_v61  ;;  %v644_v1 = vadd.f32 %v1319_v36, %v643_v63  ;;  %v684_v2 = vadd.f32 %v1319_v36, %v683_v0  ;;  %v566_v3 = vpop.f32.mrf.mxu0  ;;  %v606_v4 = vpop.f32.mrf.mxu1 }
  0xe9   : > { %855 = vst.msk [vmem:[%s1328_s4 + $0x64] sm:$0xf] %vm829_vm1, %v790_v62  ;;  %v567_v5 = vadd.f32 %v1319_v36, %v566_v3  ;;  %v607_v6 = vadd.f32 %v1319_v36, %v606_v4 }
  0xea   : > { %v742_v7 = vmax.f32 %v644_v1, 0.0  ;;  %v758_v8 = vmax.f32 %v684_v2, 0.0 }
  0xeb   : > { %v711_v9 = vmax.f32 %v567_v5, 0.0  ;;  %v727_v10 = vmax.f32 %v607_v6, 0.0 }
  0xec   : > { %v806_v11 = vpack.c.bf16 %v742_v7, %v742_v7  ;;  %v822_v12 = vpack.c.bf16 %v758_v8, %v758_v8 }
  0xed   : > { %v775_v13 = vpack.c.bf16 %v711_v9, %v711_v9  ;;  %v791_v14 = vpack.c.bf16 %v727_v10, %v727_v10 }
  0xee   : > { %871 = vst.msk [vmem:[%s1328_s4 + $0xa4] sm:$0xf] %vm829_vm1, %v806_v11 }
  0xef   : > { %887 = vst.msk [vmem:[%s1328_s4 + $0xe4] sm:$0xf] %vm829_vm1, %v822_v12  ;;  %v646_v15 = vpop.f32.mrf.mxu2  ;;  %v686_v16 = vpop.f32.mrf.mxu3 }
  0xf0   : > { %840 = vst.msk [vmem:[%s1328_s4 + $0x28] sm:$0xf] %vm829_vm1, %v775_v13  ;;  %v647_v17 = vadd.f32 %v1319_v36, %v646_v15  ;;  %v687_v18 = vadd.f32 %v1319_v36, %v686_v16  ;;  %v568_v19 = vpop.f32.mrf.mxu0  ;;  %v608_v20 = vpop.f32.mrf.mxu1 }
  0xf1   : > { %856 = vst.msk [vmem:[%s1328_s4 + $0x68] sm:$0xf] %vm829_vm1, %v791_v14  ;;  %v569_v21 = vadd.f32 %v1319_v36, %v568_v19  ;;  %v609_v22 = vadd.f32 %v1319_v36, %v608_v20 }
  0xf2   : > { %v743_v23 = vmax.f32 %v647_v17, 0.0  ;;  %v759_v24 = vmax.f32 %v687_v18, 0.0 }
  0xf3   : > { %v712_v25 = vmax.f32 %v569_v21, 0.0  ;;  %v728_v26 = vmax.f32 %v609_v22, 0.0 }
  0xf4   : > { %v807_v27 = vpack.c.bf16 %v743_v23, %v743_v23  ;;  %v823_v28 = vpack.c.bf16 %v759_v24, %v759_v24 }
  0xf5   : > { %v776_v29 = vpack.c.bf16 %v712_v25, %v712_v25  ;;  %v792_v30 = vpack.c.bf16 %v728_v26, %v728_v26 }
  0xf6   : > { %872 = vst.msk [vmem:[%s1328_s4 + $0xa8] sm:$0xf] %vm829_vm1, %v807_v27 }
  0xf7   : > { %888 = vst.msk [vmem:[%s1328_s4 + $0xe8] sm:$0xf] %vm829_vm1, %v823_v28  ;;  %v648_v31 = vpop.f32.mrf.mxu2  ;;  %v688_v32 = vpop.f32.mrf.mxu3 }
  0xf8   : > { %841 = vst.msk [vmem:[%s1328_s4 + $0x2c] sm:$0xf] %vm829_vm1, %v776_v29  ;;  %v649_v33 = vadd.f32 %v1319_v36, %v648_v31  ;;  %v689_v34 = vadd.f32 %v1319_v36, %v688_v32  ;;  %v571_v35 = vpop.f32.mrf.mxu0  ;;  %v611_v37 = vpop.f32.mrf.mxu1 }
  0xf9   : > { %857 = vst.msk [vmem:[%s1328_s4 + $0x6c] sm:$0xf] %vm829_vm1, %v792_v30  ;;  %v572_v38 = vadd.f32 %v1319_v36, %v571_v35  ;;  %v612_v39 = vadd.f32 %v1319_v36, %v611_v37 }
  0xfa   : > { %v744_v40 = vmax.f32 %v649_v33, 0.0  ;;  %v760_v41 = vmax.f32 %v689_v34, 0.0 }
  0xfb   : > { %v713_v42 = vmax.f32 %v572_v38, 0.0  ;;  %v729_v43 = vmax.f32 %v612_v39, 0.0 }
  0xfc   : > { %v808_v44 = vpack.c.bf16 %v744_v40, %v744_v40  ;;  %v824_v45 = vpack.c.bf16 %v760_v41, %v760_v41 }
  0xfd   : > { %v777_v46 = vpack.c.bf16 %v713_v42, %v713_v42  ;;  %v793_v47 = vpack.c.bf16 %v729_v43, %v729_v43 }
  0xfe   : > { %873 = vst.msk [vmem:[%s1328_s4 + $0xac] sm:$0xf] %vm829_vm1, %v808_v44 }
  0xff   : > { %889 = vst.msk [vmem:[%s1328_s4 + $0xec] sm:$0xf] %vm829_vm1, %v824_v45  ;;  %v651_v48 = vpop.f32.mrf.mxu2  ;;  %v691_v49 = vpop.f32.mrf.mxu3 }
 0x100   : > { %842 = vst.msk [vmem:[%s1328_s4 + $0x30] sm:$0xf] %vm829_vm1, %v777_v46  ;;  %v652_v50 = vadd.f32 %v1319_v36, %v651_v48  ;;  %v692_v51 = vadd.f32 %v1319_v36, %v691_v49  ;;  %v573_v52 = vpop.f32.mrf.mxu0  ;;  %v613_v53 = vpop.f32.mrf.mxu1 }
 0x101   : > { %858 = vst.msk [vmem:[%s1328_s4 + $0x70] sm:$0xf] %vm829_vm1, %v793_v47  ;;  %v574_v54 = vadd.f32 %v1319_v36, %v573_v52  ;;  %v614_v55 = vadd.f32 %v1319_v36, %v613_v53 }
 0x102   : > { %v745_v56 = vmax.f32 %v652_v50, 0.0  ;;  %v761_v57 = vmax.f32 %v692_v51, 0.0 }
 0x103   : > { %v714_v58 = vmax.f32 %v574_v54, 0.0  ;;  %v730_v59 = vmax.f32 %v614_v55, 0.0 }
 0x104   : > { %v809_v60 = vpack.c.bf16 %v745_v56, %v745_v56  ;;  %v825_v61 = vpack.c.bf16 %v761_v57, %v761_v57 }
 0x105   : > { %v778_v62 = vpack.c.bf16 %v714_v58, %v714_v58  ;;  %v794_v63 = vpack.c.bf16 %v730_v59, %v730_v59 }
 0x106   : > { %874 = vst.msk [vmem:[%s1328_s4 + $0xb0] sm:$0xf] %vm829_vm1, %v809_v60 }
 0x107   : > { %890 = vst.msk [vmem:[%s1328_s4 + $0xf0] sm:$0xf] %vm829_vm1, %v825_v61  ;;  %v653_v0 = vpop.f32.mrf.mxu2  ;;  %v693_v1 = vpop.f32.mrf.mxu3 }
 0x108   : > { %843 = vst.msk [vmem:[%s1328_s4 + $0x34] sm:$0xf] %vm829_vm1, %v778_v62  ;;  %v654_v2 = vadd.f32 %v1319_v36, %v653_v0  ;;  %v694_v3 = vadd.f32 %v1319_v36, %v693_v1  ;;  %v576_v4 = vpop.f32.mrf.mxu0  ;;  %v616_v5 = vpop.f32.mrf.mxu1 }
 0x109   : > { %859 = vst.msk [vmem:[%s1328_s4 + $0x74] sm:$0xf] %vm829_vm1, %v794_v63  ;;  %v577_v6 = vadd.f32 %v1319_v36, %v576_v4  ;;  %v617_v7 = vadd.f32 %v1319_v36, %v616_v5 }
 0x10a   : > { %v746_v8 = vmax.f32 %v654_v2, 0.0  ;;  %v762_v9 = vmax.f32 %v694_v3, 0.0 }
 0x10b   : > { %v715_v10 = vmax.f32 %v577_v6, 0.0  ;;  %v731_v11 = vmax.f32 %v617_v7, 0.0 }
 0x10c   : > { %v810_v12 = vpack.c.bf16 %v746_v8, %v746_v8  ;;  %v826_v13 = vpack.c.bf16 %v762_v9, %v762_v9 }
 0x10d   : > { %v779_v14 = vpack.c.bf16 %v715_v10, %v715_v10  ;;  %v795_v15 = vpack.c.bf16 %v731_v11, %v731_v11 }
 0x10e   : > { %875 = vst.msk [vmem:[%s1328_s4 + $0xb4] sm:$0xf] %vm829_vm1, %v810_v12 }
 0x10f   : > { %891 = vst.msk [vmem:[%s1328_s4 + $0xf4] sm:$0xf] %vm829_vm1, %v826_v13  ;;  %v656_v16 = vpop.f32.mrf.mxu2  ;;  %v696_v17 = vpop.f32.mrf.mxu3 }
 0x110   : > { %844 = vst.msk [vmem:[%s1328_s4 + $0x38] sm:$0xf] %vm829_vm1, %v779_v14  ;;  %v657_v18 = vadd.f32 %v1319_v36, %v656_v16  ;;  %v697_v19 = vadd.f32 %v1319_v36, %v696_v17  ;;  %v578_v20 = vpop.f32.mrf.mxu0  ;;  %v618_v21 = vpop.f32.mrf.mxu1 }
 0x111   : > { %860 = vst.msk [vmem:[%s1328_s4 + $0x78] sm:$0xf] %vm829_vm1, %v795_v15  ;;  %v579_v22 = vadd.f32 %v1319_v36, %v578_v20  ;;  %v619_v23 = vadd.f32 %v1319_v36, %v618_v21 }
 0x112   : > { %v747_v24 = vmax.f32 %v657_v18, 0.0  ;;  %v763_v25 = vmax.f32 %v697_v19, 0.0 }
 0x113   : > { %v716_v26 = vmax.f32 %v579_v22, 0.0  ;;  %v732_v27 = vmax.f32 %v619_v23, 0.0 }
 0x114   : > { %v811_v28 = vpack.c.bf16 %v747_v24, %v747_v24  ;;  %v827_v29 = vpack.c.bf16 %v763_v25, %v763_v25 }
 0x115   : > { %v780_v30 = vpack.c.bf16 %v716_v26, %v716_v26  ;;  %v796_v31 = vpack.c.bf16 %v732_v27, %v732_v27 }
 0x116   : > { %876 = vst.msk [vmem:[%s1328_s4 + $0xb8] sm:$0xf] %vm829_vm1, %v811_v28 }
 0x117   : > { %892 = vst.msk [vmem:[%s1328_s4 + $0xf8] sm:$0xf] %vm829_vm1, %v827_v29  ;;  %v658_v32 = vpop.f32.mrf.mxu2  ;;  %v698_v33 = vpop.f32.mrf.mxu3 }
 0x118   : > { %845 = vst.msk [vmem:[%s1328_s4 + $0x3c] sm:$0xf] %vm829_vm1, %v780_v30  ;;  %v659_v34 = vadd.f32 %v1319_v36, %v658_v32  ;;  %v699_v35 = vadd.f32 %v1319_v36, %v698_v33 }
 0x119   : > { %861 = vst.msk [vmem:[%s1328_s4 + $0x7c] sm:$0xf] %vm829_vm1, %v796_v31 }
 0x11a   : > { %v748_v37 = vmax.f32 %v659_v34, 0.0  ;;  %v764_v38 = vmax.f32 %v699_v35, 0.0 }
 0x11c   : > { %v812_v39 = vpack.c.bf16 %v748_v37, %v748_v37  ;;  %v828_v40 = vpack.c.bf16 %v764_v38, %v764_v38 }
 0x11e   : > { %877 = vst.msk [vmem:[%s1328_s4 + $0xbc] sm:$0xf] %vm829_vm1, %v812_v39 }
 0x11f   : > { %893 = vst.msk [vmem:[%s1328_s4 + $0xfc] sm:$0xf] %vm829_vm1, %v828_v40 }
 0x120 PF: > { %s13_s12 = sadd.s32 1, %s1200_s12  }
 0x121   : > { %p10_p4 = scmp.ge.s32.totalorder %s13_s12, 6  }
 0x123   :  { %12 = sbr.rel (!%p10_p4) target bundleno = 1 (0x1), region = 62 }

// kernel: _lambda_.5
= control target key start
LH: loop header
LB: loop body
LE: loop exit
PB: predicated region body
PF: predicated region fallthrough
CT: control target
= control target key end

     0   :  { %s1545_s0 = inlined_call_operand.vmem [shape: bf16[512,64], index: 0, kind: input, shape index: {}]   ;;  %s1546_s1 = inlined_call_operand.vmem [shape: bf16[64,256], index: 1, kind: input, shape index: {}]   ;;  %s1547_s2 = inlined_call_operand.vmem [shape: f32[1,256], index: 2, kind: input, shape index: {}]   ;;  %s1548_s3 = inlined_call_operand.hbm [shape: f32[512,256], index: 3, kind: output, shape index: {}]  }
   0x1   :  { %v1029_v0 = vld [vmem:[%s1546_s1 + $0x30] sm:$0xf]  ;;  %v1138_v1 = vld [vmem:[%s1546_s1 + $0x34] sm:$0xf0]  ;;  %v1137_v2 = vld [vmem:[%s1546_s1 + $0x34] sm:$0xf] }
   0x2   :  { %v1030_v3 = vor.u32 %v1138_v1, %v1029_v0  ;;  %v1031_v4 = vld [vmem:[%s1546_s1 + $0x38] sm:$0xf0]  ;;  %v1021_v5 = vld [vmem:[%s1546_s1 + $0x20] sm:$0xf]  ;;  %v1136_v6 = vld [vmem:[%s1546_s1 + $0x24] sm:$0xf0] }
   0x3   :  { %v1034_v7 = vor.u32 %v1137_v2, %v1031_v4  ;;  %v1135_v8 = vld [vmem:[%s1546_s1 + $0x24] sm:$0xf]  ;;  %v1023_v9 = vld [vmem:[%s1546_s1 + $0x28] sm:$0xf0]  ;;  %v1022_v10 = vor.u32 %v1136_v6, %v1021_v5  ;;  %v1013_v12 = vld [vmem:[%s1546_s1 + $0x10] sm:$0xf] }
   0x4   :  { %395 = vmatpush.bf16.msra.mxu0 %v1030_v3  ;;  %1139 = vmatpush.bf16.msra.mxu2 %v1030_v3  ;;  %v1026_v11 = vor.u32 %v1135_v8, %v1023_v9  ;;  %v1134_v13 = vld [vmem:[%s1546_s1 + $0x14] sm:$0xf0]  ;;  %v1133_v14 = vld [vmem:[%s1546_s1 + $0x14] sm:$0xf]  ;;  %v1015_v15 = vld [vmem:[%s1546_s1 + $0x18] sm:$0xf0] }
   0x5   :  { %564 = vmatpush.bf16.msra.mxu1 %v1034_v7  ;;  %1143 = vmatpush.bf16.msra.mxu3 %v1034_v7  ;;  %v1014_v16 = vor.u32 %v1134_v13, %v1013_v12 }
   0x8   :  { %396 = vmatpush.bf16.msra.mxu0 %v1022_v10  ;;  %1140 = vmatpush.bf16.msra.mxu2 %v1022_v10 }
   0x9   :  { %8 = vsyncpa [#allocation3], 0  ;;  %565 = vmatpush.bf16.msra.mxu1 %v1026_v11  ;;  %1144 = vmatpush.bf16.msra.mxu3 %v1026_v11  ;;  %v1018_v17 = vor.u32 %v1133_v14, %v1015_v15  ;;  %v1005_v18 = vld [vmem:[%s1546_s1] sm:$0xf]  ;;  %v1132_v19 = vld [vmem:[%s1546_s1 + $0x4] sm:$0xf0] }
   0xa   :  { %v1131_v20 = vld [vmem:[%s1546_s1 + $0x4] sm:$0xf]  ;;  %v1007_v21 = vld [vmem:[%s1546_s1 + $0x8] sm:$0xf0]  ;;  %v1006_v22 = vor.u32 %v1132_v19, %v1005_v18  ;;  %vm294_vm0 = vcmask 523264   ;;  %v1101_v28 = vld [vmem:[%s1545_s0 + $0x10] sm:$0xff] }
   0xb   :  { %v1010_v23 = vor.u32 %v1131_v20, %v1007_v21  ;;  %v1099_v24 = vld [vmem:[%s1545_s0] sm:$0xff]  ;;  %v1100_v26 = vld [vmem:[%s1545_s0 + $0x8] sm:$0xff]  ;;  %v1117_v29 = vld [vmem:[%s1545_s0 + $0x90] sm:$0xff]  ;;  %s863_s27 = sshll.u32 %s1548_s3, 4  ;;  %s1177_s28 = smov 256   ;;  %s864_s27 = int_to_ptr.hbm [resolvable:$true] %s863_s27 }
   0xc   :  { %397 = vmatpush.bf16.msra.mxu0 %v1014_v16  ;;  %1141 = vmatpush.bf16.msra.mxu2 %v1014_v16  ;;  %v1115_v25 = vld [vmem:[%s1545_s0 + $0x80] sm:$0xff]  ;;  %v1116_v27 = vld [vmem:[%s1545_s0 + $0x88] sm:$0xff]  ;;  %v1102_v30 = vld [vmem:[%s1545_s0 + $0x18] sm:$0xff]  ;;  %s1178_s29 = smov 16  }
   0xd   :  { %566 = vmatpush.bf16.msra.mxu1 %v1018_v17  ;;  %1145 = vmatpush.bf16.msra.mxu3 %v1018_v17  ;;  %v1118_v31 = vld [vmem:[%s1545_s0 + $0x98] sm:$0xff]  ;;  %v1103_v32 = vld [vmem:[%s1545_s0 + $0x20] sm:$0xff]  ;;  %v1104_v34 = vld [vmem:[%s1545_s0 + $0x28] sm:$0xff] }
   0xe   :  { %v1119_v33 = vld [vmem:[%s1545_s0 + $0xa0] sm:$0xff]  ;;  %v1120_v35 = vld [vmem:[%s1545_s0 + $0xa8] sm:$0xff]  ;;  %v1105_v36 = vld [vmem:[%s1545_s0 + $0x30] sm:$0xff] }
   0xf   :  { %v1121_v37 = vld [vmem:[%s1545_s0 + $0xb0] sm:$0xff]  ;;  %v1106_v38 = vld [vmem:[%s1545_s0 + $0x38] sm:$0xff]  ;;  %v88_v40 = vld [vmem:[%s1547_s2] sm:$0x3] }
  0x10   :  { %398 = vmatpush.bf16.msra.mxu0 %v1006_v22  ;;  %1142 = vmatpush.bf16.msra.mxu2 %v1006_v22  ;;  %v1122_v39 = vld [vmem:[%s1545_s0 + $0xb8] sm:$0xff]  ;;  %v1330_v41 = vperm.slane %v88_v40, 0  ;;  %v1332_v42 = vperm.slane %v88_v40, 1  ;;  %v1107_v43 = vld [vmem:[%s1545_s0 + $0x40] sm:$0xff]  ;;  %v1108_v60 = vld [vmem:[%s1545_s0 + $0x48] sm:$0xff] }
  0x11   :  { %567 = vmatpush.bf16.msra.mxu1 %v1010_v23  ;;  %1146 = vmatpush.bf16.msra.mxu3 %v1010_v23  ;;  %v1123_v44 = vld [vmem:[%s1545_s0 + $0xc0] sm:$0xff]  ;;  %v1124_v61 = vld [vmem:[%s1545_s0 + $0xc8] sm:$0xff]  ;;  %v1109_v14 = vld [vmem:[%s1545_s0 + $0x50] sm:$0xff] }
  0x12   :  { %v1125_v15 = vld [vmem:[%s1545_s0 + $0xd0] sm:$0xff] }
  0x13   :  { %1035 = vmatmul.msk.bf16.vlgmr.msra.gmra.mxu0 %vm294_vm0, %v1099_v24  ;;  %1051 = vmatmul.msk.bf16.vlgmr.msra.gmra.mxu2 %vm294_vm0, %v1115_v25 }
  0x14   :  { %1067 = vmatmul.msk.bf16.vlgmr.msra.gmra.mxu1 %vm294_vm0, %v1099_v24  ;;  %1083 = vmatmul.msk.bf16.vlgmr.msra.gmra.mxu3 %vm294_vm0, %v1115_v25 }
  0x23   :  { %1036 = vmatmul.msk.bf16.gmra.mxu0 %vm294_vm0, %v1100_v26  ;;  %1052 = vmatmul.msk.bf16.gmra.mxu2 %vm294_vm0, %v1116_v27 }
  0x24   :  { %1068 = vmatmul.msk.bf16.gmra.mxu1 %vm294_vm0, %v1100_v26  ;;  %1084 = vmatmul.msk.bf16.gmra.mxu3 %vm294_vm0, %v1116_v27 }
  0x33   :  { %1037 = vmatmul.msk.bf16.gmra.mxu0 %vm294_vm0, %v1101_v28  ;;  %1053 = vmatmul.msk.bf16.gmra.mxu2 %vm294_vm0, %v1117_v29 }
  0x34   :  { %1069 = vmatmul.msk.bf16.gmra.mxu1 %vm294_vm0, %v1101_v28  ;;  %1085 = vmatmul.msk.bf16.gmra.mxu3 %vm294_vm0, %v1117_v29 }
  0x43   :  { %1038 = vmatmul.msk.bf16.gmra.mxu0 %vm294_vm0, %v1102_v30  ;;  %1054 = vmatmul.msk.bf16.gmra.mxu2 %vm294_vm0, %v1118_v31 }
  0x44   :  { %1070 = vmatmul.msk.bf16.gmra.mxu1 %vm294_vm0, %v1102_v30  ;;  %1086 = vmatmul.msk.bf16.gmra.mxu3 %vm294_vm0, %v1118_v31 }
  0x53   :  { %1039 = vmatmul.msk.bf16.gmra.mxu0 %vm294_vm0, %v1103_v32  ;;  %1055 = vmatmul.msk.bf16.gmra.mxu2 %vm294_vm0, %v1119_v33 }
  0x54   :  { %1071 = vmatmul.msk.bf16.gmra.mxu1 %vm294_vm0, %v1103_v32  ;;  %1087 = vmatmul.msk.bf16.gmra.mxu3 %vm294_vm0, %v1119_v33  ;;  %v1110_v32 = vld [vmem:[%s1545_s0 + $0x58] sm:$0xff] }
  0x55   :  { %v1126_v33 = vld [vmem:[%s1545_s0 + $0xd8] sm:$0xff] }
  0x63   :  { %1040 = vmatmul.msk.bf16.gmra.mxu0 %vm294_vm0, %v1104_v34  ;;  %1056 = vmatmul.msk.bf16.gmra.mxu2 %vm294_vm0, %v1120_v35 }
  0x64   :  { %1072 = vmatmul.msk.bf16.gmra.mxu1 %vm294_vm0, %v1104_v34  ;;  %1088 = vmatmul.msk.bf16.gmra.mxu3 %vm294_vm0, %v1120_v35 }
  0x73   :  { %1041 = vmatmul.msk.bf16.gmra.mxu0 %vm294_vm0, %v1105_v36  ;;  %1057 = vmatmul.msk.bf16.gmra.mxu2 %vm294_vm0, %v1121_v37 }
  0x74   :  { %1073 = vmatmul.msk.bf16.gmra.mxu1 %vm294_vm0, %v1105_v36  ;;  %1089 = vmatmul.msk.bf16.gmra.mxu3 %vm294_vm0, %v1121_v37 }
  0x83   :  { %1042 = vmatmul.msk.bf16.gmra.mxu0 %vm294_vm0, %v1106_v38  ;;  %1058 = vmatmul.msk.bf16.gmra.mxu2 %vm294_vm0, %v1122_v39 }
  0x84   :  { %1074 = vmatmul.msk.bf16.gmra.mxu1 %vm294_vm0, %v1106_v38  ;;  %1090 = vmatmul.msk.bf16.gmra.mxu3 %vm294_vm0, %v1122_v39 }
  0x90   :  { %v400_v45 = vpop.f32.mrf.mxu0 }
  0x91   :  { %v401_v46 = vadd.f32 %v400_v45, %v1330_v41  ;;  %v569_v47 = vpop.f32.mrf.mxu1 }
  0x92   :  { %v570_v48 = vadd.f32 %v569_v47, %v1332_v42 }
  0x93   :  { %729 = vst [vmem:[#allocation2] sm:$0xff] %v401_v46  ;;  %1043 = vmatmul.msk.bf16.gmra.mxu0 %vm294_vm0, %v1107_v43  ;;  %1059 = vmatmul.msk.bf16.gmra.mxu2 %vm294_vm0, %v1123_v44 }
  0x94   :  { %730 = vst [vmem:[#allocation2 + $0x8] sm:$0xff] %v570_v48  ;;  %1075 = vmatmul.msk.bf16.gmra.mxu1 %vm294_vm0, %v1107_v43  ;;  %1091 = vmatmul.msk.bf16.gmra.mxu3 %vm294_vm0, %v1123_v44 }
  0x96   :  { %v480_v49 = vpop.f32.mrf.mxu2 }
  0x97   :  { %v481_v50 = vadd.f32 %v480_v49, %v1330_v41  ;;  %v649_v51 = vpop.f32.mrf.mxu3 }
  0x98   :  { %v650_v52 = vadd.f32 %v649_v51, %v1332_v42  ;;  %v402_v53 = vpop.f32.mrf.mxu0 }
  0x99   :  { %793 = vst [vmem:[#allocation2 + $0x200] sm:$0xff] %v481_v50  ;;  %v403_v54 = vadd.f32 %v402_v53, %v1330_v41  ;;  %v571_v55 = vpop.f32.mrf.mxu1  ;;  %v1127_v53 = vld [vmem:[%s1545_s0 + $0xe0] sm:$0xff] }
  0x9a   :  { %794 = vst [vmem:[#allocation2 + $0x208] sm:$0xff] %v650_v52  ;;  %v572_v56 = vadd.f32 %v571_v55, %v1332_v42  ;;  %v1111_v52 = vld [vmem:[%s1545_s0 + $0x60] sm:$0xff] }
  0x9b   :  { %731 = vst [vmem:[#allocation2 + $0x10] sm:$0xff] %v403_v54 }
  0x9c   :  { %732 = vst [vmem:[#allocation2 + $0x18] sm:$0xff] %v572_v56 }
  0x9e   :  { %v482_v57 = vpop.f32.mrf.mxu2 }
  0x9f   :  { %v483_v58 = vadd.f32 %v482_v57, %v1330_v41  ;;  %v651_v59 = vpop.f32.mrf.mxu3 }
  0xa0   :  { %v652_v62 = vadd.f32 %v651_v59, %v1332_v42  ;;  %v405_v63 = vpop.f32.mrf.mxu0 }
  0xa1   :  { %795 = vst [vmem:[#allocation2 + $0x210] sm:$0xff] %v483_v58  ;;  %v406_v0 = vadd.f32 %v405_v63, %v1330_v41  ;;  %v574_v1 = vpop.f32.mrf.mxu1 }
  0xa2   :  { %796 = vst [vmem:[#allocation2 + $0x218] sm:$0xff] %v652_v62  ;;  %v575_v2 = vadd.f32 %v574_v1, %v1332_v42 }
  0xa3   :  { %733 = vst [vmem:[#allocation2 + $0x20] sm:$0xff] %v406_v0  ;;  %1044 = vmatmul.msk.bf16.gmra.mxu0 %vm294_vm0, %v1108_v60  ;;  %1060 = vmatmul.msk.bf16.gmra.mxu2 %vm294_vm0, %v1124_v61 }
  0xa4   :  { %734 = vst [vmem:[#allocation2 + $0x28] sm:$0xff] %v575_v2  ;;  %1076 = vmatmul.msk.bf16.gmra.mxu1 %vm294_vm0, %v1108_v60  ;;  %1092 = vmatmul.msk.bf16.gmra.mxu3 %vm294_vm0, %v1124_v61 }
  0xa6   :  { %v485_v3 = vpop.f32.mrf.mxu2 }
  0xa7   :  { %v486_v4 = vadd.f32 %v485_v3, %v1330_v41  ;;  %v654_v5 = vpop.f32.mrf.mxu3 }
  0xa8   :  { %v655_v6 = vadd.f32 %v654_v5, %v1332_v42  ;;  %v407_v7 = vpop.f32.mrf.mxu0 }
  0xa9   :  { %797 = vst [vmem:[#allocation2 + $0x220] sm:$0xff] %v486_v4  ;;  %v408_v8 = vadd.f32 %v407_v7, %v1330_v41  ;;  %v576_v9 = vpop.f32.mrf.mxu1  ;;  %v1128_v7 = vld [vmem:[%s1545_s0 + $0xe8] sm:$0xff] }
  0xaa   :  { %798 = vst [vmem:[#allocation2 + $0x228] sm:$0xff] %v655_v6  ;;  %v577_v10 = vadd.f32 %v576_v9, %v1332_v42  ;;  %v1112_v6 = vld [vmem:[%s1545_s0 + $0x68] sm:$0xff] }
  0xab   :  { %735 = vst [vmem:[#allocation2 + $0x30] sm:$0xff] %v408_v8 }
  0xac   :  { %736 = vst [vmem:[#allocation2 + $0x38] sm:$0xff] %v577_v10 }
  0xae   :  { %v487_v11 = vpop.f32.mrf.mxu2 }
  0xaf   :  { %v488_v12 = vadd.f32 %v487_v11, %v1330_v41  ;;  %v656_v13 = vpop.f32.mrf.mxu3 }
  0xb0   :  { %v657_v16 = vadd.f32 %v656_v13, %v1332_v42  ;;  %v410_v17 = vpop.f32.mrf.mxu0 }
  0xb1   :  { %799 = vst [vmem:[#allocation2 + $0x230] sm:$0xff] %v488_v12  ;;  %v411_v18 = vadd.f32 %v410_v17, %v1330_v41  ;;  %v579_v19 = vpop.f32.mrf.mxu1 }
  0xb2   :  { %800 = vst [vmem:[#allocation2 + $0x238] sm:$0xff] %v657_v16  ;;  %v580_v20 = vadd.f32 %v579_v19, %v1332_v42 }
  0xb3   :  { %737 = vst [vmem:[#allocation2 + $0x40] sm:$0xff] %v411_v18  ;;  %1045 = vmatmul.msk.bf16.gmra.mxu0 %vm294_vm0, %v1109_v14  ;;  %1061 = vmatmul.msk.bf16.gmra.mxu2 %vm294_vm0, %v1125_v15 }
  0xb4   :  { %738 = vst [vmem:[#allocation2 + $0x48] sm:$0xff] %v580_v20  ;;  %1077 = vmatmul.msk.bf16.gmra.mxu1 %vm294_vm0, %v1109_v14  ;;  %1093 = vmatmul.msk.bf16.gmra.mxu3 %vm294_vm0, %v1125_v15 }
  0xb6   :  { %v490_v21 = vpop.f32.mrf.mxu2 }
  0xb7   :  { %v491_v22 = vadd.f32 %v490_v21, %v1330_v41  ;;  %v659_v23 = vpop.f32.mrf.mxu3 }
  0xb8   :  { %v660_v24 = vadd.f32 %v659_v23, %v1332_v42  ;;  %v412_v25 = vpop.f32.mrf.mxu0 }
  0xb9   :  { %801 = vst [vmem:[#allocation2 + $0x240] sm:$0xff] %v491_v22  ;;  %v413_v26 = vadd.f32 %v412_v25, %v1330_v41  ;;  %v581_v27 = vpop.f32.mrf.mxu1  ;;  %v1129_v25 = vld [vmem:[%s1545_s0 + $0xf0] sm:$0xff] }
  0xba   :  { %802 = vst [vmem:[#allocation2 + $0x248] sm:$0xff] %v660_v24  ;;  %v582_v28 = vadd.f32 %v581_v27, %v1332_v42  ;;  %v1113_v24 = vld [vmem:[%s1545_s0 + $0x70] sm:$0xff] }
  0xbb   :  { %739 = vst [vmem:[#allocation2 + $0x50] sm:$0xff] %v413_v26 }
  0xbc   :  { %740 = vst [vmem:[#allocation2 + $0x58] sm:$0xff] %v582_v28 }
  0xbe   :  { %v492_v29 = vpop.f32.mrf.mxu2 }
  0xbf   :  { %v493_v30 = vadd.f32 %v492_v29, %v1330_v41  ;;  %v661_v31 = vpop.f32.mrf.mxu3 }
  0xc0   :  { %v662_v34 = vadd.f32 %v661_v31, %v1332_v42  ;;  %v415_v35 = vpop.f32.mrf.mxu0 }
  0xc1   :  { %803 = vst [vmem:[#allocation2 + $0x250] sm:$0xff] %v493_v30  ;;  %v416_v36 = vadd.f32 %v415_v35, %v1330_v41  ;;  %v584_v37 = vpop.f32.mrf.mxu1 }
  0xc2   :  { %804 = vst [vmem:[#allocation2 + $0x258] sm:$0xff] %v662_v34  ;;  %v585_v38 = vadd.f32 %v584_v37, %v1332_v42 }
  0xc3   :  { %741 = vst [vmem:[#allocation2 + $0x60] sm:$0xff] %v416_v36  ;;  %1046 = vmatmul.msk.bf16.gmra.mxu0 %vm294_vm0, %v1110_v32  ;;  %1062 = vmatmul.msk.bf16.gmra.mxu2 %vm294_vm0, %v1126_v33 }
  0xc4   :  { %742 = vst [vmem:[#allocation2 + $0x68] sm:$0xff] %v585_v38  ;;  %1078 = vmatmul.msk.bf16.gmra.mxu1 %vm294_vm0, %v1110_v32  ;;  %1094 = vmatmul.msk.bf16.gmra.mxu3 %vm294_vm0, %v1126_v33 }
  0xc6   :  { %v495_v39 = vpop.f32.mrf.mxu2 }
  0xc7   :  { %v496_v40 = vadd.f32 %v495_v39, %v1330_v41  ;;  %v664_v43 = vpop.f32.mrf.mxu3 }
  0xc8   :  { %v665_v44 = vadd.f32 %v664_v43, %v1332_v42  ;;  %v417_v45 = vpop.f32.mrf.mxu0 }
  0xc9   :  { %805 = vst [vmem:[#allocation2 + $0x260] sm:$0xff] %v496_v40  ;;  %v418_v46 = vadd.f32 %v417_v45, %v1330_v41  ;;  %v586_v47 = vpop.f32.mrf.mxu1  ;;  %v1130_v45 = vld [vmem:[%s1545_s0 + $0xf8] sm:$0xff] }
  0xca   :  { %806 = vst [vmem:[#allocation2 + $0x268] sm:$0xff] %v665_v44  ;;  %v587_v48 = vadd.f32 %v586_v47, %v1332_v42  ;;  %v1114_v44 = vld [vmem:[%s1545_s0 + $0x78] sm:$0xff]  ;;  %s1176_s0 = smov [#allocation2]  }
  0xcb   :  { %743 = vst [vmem:[#allocation2 + $0x70] sm:$0xff] %v418_v46  ;;  %s861_s25 = sshll.u32 %s1176_s0, 4  ;;  %s862_s25 = int_to_ptr.vmem [resolvable:$true] %s861_s25 }
  0xcc   :  { %744 = vst [vmem:[#allocation2 + $0x78] sm:$0xff] %v587_v48 }
  0xce   :  { %v497_v49 = vpop.f32.mrf.mxu2 }
  0xcf   :  { %v498_v50 = vadd.f32 %v497_v49, %v1330_v41  ;;  %v666_v51 = vpop.f32.mrf.mxu3 }
  0xd0   :  { %v667_v54 = vadd.f32 %v666_v51, %v1332_v42  ;;  %v420_v55 = vpop.f32.mrf.mxu0 }
  0xd1   :  { %807 = vst [vmem:[#allocation2 + $0x270] sm:$0xff] %v498_v50  ;;  %v421_v56 = vadd.f32 %v420_v55, %v1330_v41  ;;  %v589_v57 = vpop.f32.mrf.mxu1 }
  0xd2   :  { %808 = vst [vmem:[#allocation2 + $0x278] sm:$0xff] %v667_v54  ;;  %v590_v58 = vadd.f32 %v589_v57, %v1332_v42 }
  0xd3   :  { %745 = vst [vmem:[#allocation2 + $0x80] sm:$0xff] %v421_v56  ;;  %1047 = vmatmul.msk.bf16.gmra.mxu0 %vm294_vm0, %v1111_v52  ;;  %1063 = vmatmul.msk.bf16.gmra.mxu2 %vm294_vm0, %v1127_v53 }
  0xd4   :  { %746 = vst [vmem:[#allocation2 + $0x88] sm:$0xff] %v590_v58  ;;  %1079 = vmatmul.msk.bf16.gmra.mxu1 %vm294_vm0, %v1111_v52  ;;  %1095 = vmatmul.msk.bf16.gmra.mxu3 %vm294_vm0, %v1127_v53 }
  0xd6   :  { %v500_v59 = vpop.f32.mrf.mxu2 }
  0xd7   :  { %v501_v60 = vadd.f32 %v500_v59, %v1330_v41  ;;  %v669_v61 = vpop.f32.mrf.mxu3 }
  0xd8   :  { %v670_v62 = vadd.f32 %v669_v61, %v1332_v42  ;;  %v422_v63 = vpop.f32.mrf.mxu0 }
  0xd9   :  { %809 = vst [vmem:[#allocation2 + $0x280] sm:$0xff] %v501_v60  ;;  %v423_v0 = vadd.f32 %v422_v63, %v1330_v41  ;;  %v591_v1 = vpop.f32.mrf.mxu1 }
  0xda   :  { %810 = vst [vmem:[#allocation2 + $0x288] sm:$0xff] %v670_v62  ;;  %v592_v2 = vadd.f32 %v591_v1, %v1332_v42 }
  0xdb   :  { %747 = vst [vmem:[#allocation2 + $0x90] sm:$0xff] %v423_v0 }
  0xdc   :  { %748 = vst [vmem:[#allocation2 + $0x98] sm:$0xff] %v592_v2 }
  0xde   :  { %v502_v3 = vpop.f32.mrf.mxu2 }
  0xdf   :  { %v503_v4 = vadd.f32 %v502_v3, %v1330_v41  ;;  %v671_v5 = vpop.f32.mrf.mxu3 }
  0xe0   :  { %v672_v8 = vadd.f32 %v671_v5, %v1332_v42  ;;  %v425_v9 = vpop.f32.mrf.mxu0 }
  0xe1   :  { %811 = vst [vmem:[#allocation2 + $0x290] sm:$0xff] %v503_v4  ;;  %v426_v10 = vadd.f32 %v425_v9, %v1330_v41  ;;  %v594_v11 = vpop.f32.mrf.mxu1 }
  0xe2   :  { %812 = vst [vmem:[#allocation2 + $0x298] sm:$0xff] %v672_v8  ;;  %v595_v12 = vadd.f32 %v594_v11, %v1332_v42 }
  0xe3   :  { %749 = vst [vmem:[#allocation2 + $0xa0] sm:$0xff] %v426_v10  ;;  %1048 = vmatmul.msk.bf16.gmra.mxu0 %vm294_vm0, %v1112_v6  ;;  %1064 = vmatmul.msk.bf16.gmra.mxu2 %vm294_vm0, %v1128_v7 }
  0xe4   :  { %750 = vst [vmem:[#allocation2 + $0xa8] sm:$0xff] %v595_v12  ;;  %1080 = vmatmul.msk.bf16.gmra.mxu1 %vm294_vm0, %v1112_v6  ;;  %1096 = vmatmul.msk.bf16.gmra.mxu3 %vm294_vm0, %v1128_v7 }
  0xe6   :  { %v505_v13 = vpop.f32.mrf.mxu2 }
  0xe7   :  { %v506_v14 = vadd.f32 %v505_v13, %v1330_v41  ;;  %v674_v15 = vpop.f32.mrf.mxu3 }
  0xe8   :  { %v675_v16 = vadd.f32 %v674_v15, %v1332_v42  ;;  %v427_v17 = vpop.f32.mrf.mxu0 }
  0xe9   :  { %813 = vst [vmem:[#allocation2 + $0x2a0] sm:$0xff] %v506_v14  ;;  %v428_v18 = vadd.f32 %v427_v17, %v1330_v41  ;;  %v596_v19 = vpop.f32.mrf.mxu1 }
  0xea   :  { %814 = vst [vmem:[#allocation2 + $0x2a8] sm:$0xff] %v675_v16  ;;  %v597_v20 = vadd.f32 %v596_v19, %v1332_v42 }
  0xeb   :  { %751 = vst [vmem:[#allocation2 + $0xb0] sm:$0xff] %v428_v18 }
  0xec   :  { %752 = vst [vmem:[#allocation2 + $0xb8] sm:$0xff] %v597_v20 }
  0xee   :  { %v507_v21 = vpop.f32.mrf.mxu2 }
  0xef   :  { %v508_v22 = vadd.f32 %v507_v21, %v1330_v41  ;;  %v676_v23 = vpop.f32.mrf.mxu3 }
  0xf0   :  { %v677_v26 = vadd.f32 %v676_v23, %v1332_v42  ;;  %v430_v27 = vpop.f32.mrf.mxu0 }
  0xf1   :  { %815 = vst [vmem:[#allocation2 + $0x2b0] sm:$0xff] %v508_v22  ;;  %v431_v28 = vadd.f32 %v430_v27, %v1330_v41  ;;  %v599_v29 = vpop.f32.mrf.mxu1 }
  0xf2   :  { %816 = vst [vmem:[#allocation2 + $0x2b8] sm:$0xff] %v677_v26  ;;  %v600_v30 = vadd.f32 %v599_v29, %v1332_v42 }
  0xf3   :  { %753 = vst [vmem:[#allocation2 + $0xc0] sm:$0xff] %v431_v28  ;;  %1049 = vmatmul.msk.bf16.gmra.mxu0 %vm294_vm0, %v1113_v24  ;;  %1065 = vmatmul.msk.bf16.gmra.mxu2 %vm294_vm0, %v1129_v25 }
  0xf4   :  { %754 = vst [vmem:[#allocation2 + $0xc8] sm:$0xff] %v600_v30  ;;  %1081 = vmatmul.msk.bf16.gmra.mxu1 %vm294_vm0, %v1113_v24  ;;  %1097 = vmatmul.msk.bf16.gmra.mxu3 %vm294_vm0, %v1129_v25 }
  0xf6   :  { %v510_v31 = vpop.f32.mrf.mxu2 }
  0xf7   :  { %v511_v32 = vadd.f32 %v510_v31, %v1330_v41  ;;  %v679_v33 = vpop.f32.mrf.mxu3 }
  0xf8   :  { %v680_v34 = vadd.f32 %v679_v33, %v1332_v42  ;;  %v432_v35 = vpop.f32.mrf.mxu0 }
  0xf9   :  { %817 = vst [vmem:[#allocation2 + $0x2c0] sm:$0xff] %v511_v32  ;;  %v433_v36 = vadd.f32 %v432_v35, %v1330_v41  ;;  %v601_v37 = vpop.f32.mrf.mxu1 }
  0xfa   :  { %818 = vst [vmem:[#allocation2 + $0x2c8] sm:$0xff] %v680_v34  ;;  %v602_v38 = vadd.f32 %v601_v37, %v1332_v42 }
  0xfb   :  { %755 = vst [vmem:[#allocation2 + $0xd0] sm:$0xff] %v433_v36 }
  0xfc   :  { %756 = vst [vmem:[#allocation2 + $0xd8] sm:$0xff] %v602_v38 }
  0xfe   :  { %v512_v39 = vpop.f32.mrf.mxu2 }
  0xff   :  { %v513_v40 = vadd.f32 %v512_v39, %v1330_v41  ;;  %v681_v43 = vpop.f32.mrf.mxu3 }
 0x100   :  { %v682_v46 = vadd.f32 %v681_v43, %v1332_v42  ;;  %v435_v47 = vpop.f32.mrf.mxu0 }
 0x101   :  { %819 = vst [vmem:[#allocation2 + $0x2d0] sm:$0xff] %v513_v40  ;;  %v436_v48 = vadd.f32 %v435_v47, %v1330_v41  ;;  %v604_v49 = vpop.f32.mrf.mxu1 }
 0x102   :  { %820 = vst [vmem:[#allocation2 + $0x2d8] sm:$0xff] %v682_v46  ;;  %v605_v50 = vadd.f32 %v604_v49, %v1332_v42 }
 0x103   :  { %757 = vst [vmem:[#allocation2 + $0xe0] sm:$0xff] %v436_v48  ;;  %1050 = vmatmul.msk.bf16.gmra.mxu0 %vm294_vm0, %v1114_v44  ;;  %1066 = vmatmul.msk.bf16.gmra.mxu2 %vm294_vm0, %v1130_v45 }
 0x104   :  { %758 = vst [vmem:[#allocation2 + $0xe8] sm:$0xff] %v605_v50  ;;  %1082 = vmatmul.msk.bf16.gmra.mxu1 %vm294_vm0, %v1114_v44  ;;  %1098 = vmatmul.msk.bf16.gmra.mxu3 %vm294_vm0, %v1130_v45 }
 0x106   :  { %v515_v51 = vpop.f32.mrf.mxu2 }
 0x107   :  { %v516_v52 = vadd.f32 %v515_v51, %v1330_v41  ;;  %v684_v53 = vpop.f32.mrf.mxu3 }
 0x108   :  { %v685_v54 = vadd.f32 %v684_v53, %v1332_v42  ;;  %v437_v55 = vpop.f32.mrf.mxu0 }
 0x109   :  { %821 = vst [vmem:[#allocation2 + $0x2e0] sm:$0xff] %v516_v52  ;;  %v438_v56 = vadd.f32 %v437_v55, %v1330_v41  ;;  %v606_v57 = vpop.f32.mrf.mxu1 }
 0x10a   :  { %822 = vst [vmem:[#allocation2 + $0x2e8] sm:$0xff] %v685_v54  ;;  %v607_v58 = vadd.f32 %v606_v57, %v1332_v42 }
 0x10b   :  { %759 = vst [vmem:[#allocation2 + $0xf0] sm:$0xff] %v438_v56 }
 0x10c   :  { %760 = vst [vmem:[#allocation2 + $0xf8] sm:$0xff] %v607_v58 }
 0x10e   :  { %v517_v59 = vpop.f32.mrf.mxu2 }
 0x10f   :  { %v518_v60 = vadd.f32 %v517_v59, %v1330_v41  ;;  %v686_v61 = vpop.f32.mrf.mxu3 }
 0x110   :  { %v687_v62 = vadd.f32 %v686_v61, %v1332_v42  ;;  %v440_v63 = vpop.f32.mrf.mxu0 }
 0x111   :  { %823 = vst [vmem:[#allocation2 + $0x2f0] sm:$0xff] %v518_v60  ;;  %v441_v0 = vadd.f32 %v440_v63, %v1330_v41  ;;  %v609_v1 = vpop.f32.mrf.mxu1 }
 0x112   :  { %824 = vst [vmem:[#allocation2 + $0x2f8] sm:$0xff] %v687_v62  ;;  %v610_v2 = vadd.f32 %v609_v1, %v1332_v42 }
 0x113   :  { %761 = vst [vmem:[#allocation2 + $0x100] sm:$0xff] %v441_v0 }
 0x114   :  { %762 = vst [vmem:[#allocation2 + $0x108] sm:$0xff] %v610_v2 }
 0x116   :  { %v520_v3 = vpop.f32.mrf.mxu2 }
 0x117   :  { %v521_v4 = vadd.f32 %v520_v3, %v1330_v41  ;;  %v689_v5 = vpop.f32.mrf.mxu3 }
 0x118   :  { %v690_v6 = vadd.f32 %v689_v5, %v1332_v42  ;;  %v442_v7 = vpop.f32.mrf.mxu0 }
 0x119   :  { %825 = vst [vmem:[#allocation2 + $0x300] sm:$0xff] %v521_v4  ;;  %v443_v8 = vadd.f32 %v442_v7, %v1330_v41  ;;  %v611_v9 = vpop.f32.mrf.mxu1 }
 0x11a   :  { %826 = vst [vmem:[#allocation2 + $0x308] sm:$0xff] %v690_v6  ;;  %v612_v10 = vadd.f32 %v611_v9, %v1332_v42 }
 0x11b   :  { %763 = vst [vmem:[#allocation2 + $0x110] sm:$0xff] %v443_v8 }
 0x11c   :  { %764 = vst [vmem:[#allocation2 + $0x118] sm:$0xff] %v612_v10 }
 0x11e   :  { %v522_v11 = vpop.f32.mrf.mxu2 }
 0x11f   :  { %v523_v12 = vadd.f32 %v522_v11, %v1330_v41  ;;  %v691_v13 = vpop.f32.mrf.mxu3 }
 0x120   :  { %v692_v14 = vadd.f32 %v691_v13, %v1332_v42  ;;  %v445_v15 = vpop.f32.mrf.mxu0 }
 0x121   :  { %827 = vst [vmem:[#allocation2 + $0x310] sm:$0xff] %v523_v12  ;;  %v446_v16 = vadd.f32 %v445_v15, %v1330_v41  ;;  %v614_v17 = vpop.f32.mrf.mxu1 }
 0x122   :  { %828 = vst [vmem:[#allocation2 + $0x318] sm:$0xff] %v692_v14  ;;  %v615_v18 = vadd.f32 %v614_v17, %v1332_v42 }
 0x123   :  { %765 = vst [vmem:[#allocation2 + $0x120] sm:$0xff] %v446_v16 }
 0x124   :  { %766 = vst [vmem:[#allocation2 + $0x128] sm:$0xff] %v615_v18 }
 0x126   :  { %v525_v19 = vpop.f32.mrf.mxu2 }
 0x127   :  { %v526_v20 = vadd.f32 %v525_v19, %v1330_v41  ;;  %v694_v21 = vpop.f32.mrf.mxu3 }
 0x128   :  { %v695_v22 = vadd.f32 %v694_v21, %v1332_v42  ;;  %v447_v23 = vpop.f32.mrf.mxu0 }
 0x129   :  { %829 = vst [vmem:[#allocation2 + $0x320] sm:$0xff] %v526_v20  ;;  %v448_v24 = vadd.f32 %v447_v23, %v1330_v41  ;;  %v616_v25 = vpop.f32.mrf.mxu1 }
 0x12a   :  { %830 = vst [vmem:[#allocation2 + $0x328] sm:$0xff] %v695_v22  ;;  %v617_v26 = vadd.f32 %v616_v25, %v1332_v42 }
 0x12b   :  { %767 = vst [vmem:[#allocation2 + $0x130] sm:$0xff] %v448_v24 }
 0x12c   :  { %768 = vst [vmem:[#allocation2 + $0x138] sm:$0xff] %v617_v26 }
 0x12e   :  { %v527_v27 = vpop.f32.mrf.mxu2 }
 0x12f   :  { %v528_v28 = vadd.f32 %v527_v27, %v1330_v41  ;;  %v696_v29 = vpop.f32.mrf.mxu3 }
 0x130   :  { %v697_v30 = vadd.f32 %v696_v29, %v1332_v42  ;;  %v450_v31 = vpop.f32.mrf.mxu0 }
 0x131   :  { %831 = vst [vmem:[#allocation2 + $0x330] sm:$0xff] %v528_v28  ;;  %v451_v32 = vadd.f32 %v450_v31, %v1330_v41  ;;  %v619_v33 = vpop.f32.mrf.mxu1 }
 0x132   :  { %832 = vst [vmem:[#allocation2 + $0x338] sm:$0xff] %v697_v30  ;;  %v620_v34 = vadd.f32 %v619_v33, %v1332_v42 }
 0x133   :  { %769 = vst [vmem:[#allocation2 + $0x140] sm:$0xff] %v451_v32 }
 0x134   :  { %770 = vst [vmem:[#allocation2 + $0x148] sm:$0xff] %v620_v34 }
 0x136   :  { %v530_v35 = vpop.f32.mrf.mxu2 }
 0x137   :  { %v531_v36 = vadd.f32 %v530_v35, %v1330_v41  ;;  %v699_v37 = vpop.f32.mrf.mxu3 }
 0x138   :  { %v700_v38 = vadd.f32 %v699_v37, %v1332_v42  ;;  %v452_v39 = vpop.f32.mrf.mxu0 }
 0x139   :  { %833 = vst [vmem:[#allocation2 + $0x340] sm:$0xff] %v531_v36  ;;  %v453_v40 = vadd.f32 %v452_v39, %v1330_v41  ;;  %v621_v43 = vpop.f32.mrf.mxu1 }
 0x13a   :  { %834 = vst [vmem:[#allocation2 + $0x348] sm:$0xff] %v700_v38  ;;  %v622_v44 = vadd.f32 %v621_v43, %v1332_v42 }
 0x13b   :  { %771 = vst [vmem:[#allocation2 + $0x150] sm:$0xff] %v453_v40 }
 0x13c   :  { %772 = vst [vmem:[#allocation2 + $0x158] sm:$0xff] %v622_v44 }
 0x13e   :  { %v532_v45 = vpop.f32.mrf.mxu2 }
 0x13f   :  { %v533_v46 = vadd.f32 %v532_v45, %v1330_v41  ;;  %v701_v47 = vpop.f32.mrf.mxu3 }
 0x140   :  { %v702_v48 = vadd.f32 %v701_v47, %v1332_v42  ;;  %v455_v49 = vpop.f32.mrf.mxu0 }
 0x141   :  { %835 = vst [vmem:[#allocation2 + $0x350] sm:$0xff] %v533_v46  ;;  %v456_v50 = vadd.f32 %v455_v49, %v1330_v41  ;;  %v624_v51 = vpop.f32.mrf.mxu1 }
 0x142   :  { %836 = vst [vmem:[#allocation2 + $0x358] sm:$0xff] %v702_v48  ;;  %v625_v52 = vadd.f32 %v624_v51, %v1332_v42 }
 0x143   :  { %773 = vst [vmem:[#allocation2 + $0x160] sm:$0xff] %v456_v50 }
 0x144   :  { %774 = vst [vmem:[#allocation2 + $0x168] sm:$0xff] %v625_v52 }
 0x146   :  { %v535_v53 = vpop.f32.mrf.mxu2 }
 0x147   :  { %v536_v54 = vadd.f32 %v535_v53, %v1330_v41  ;;  %v704_v55 = vpop.f32.mrf.mxu3 }
 0x148   :  { %v705_v56 = vadd.f32 %v704_v55, %v1332_v42  ;;  %v457_v57 = vpop.f32.mrf.mxu0 }
 0x149   :  { %837 = vst [vmem:[#allocation2 + $0x360] sm:$0xff] %v536_v54  ;;  %v458_v58 = vadd.f32 %v457_v57, %v1330_v41  ;;  %v626_v59 = vpop.f32.mrf.mxu1 }
 0x14a   :  { %838 = vst [vmem:[#allocation2 + $0x368] sm:$0xff] %v705_v56  ;;  %v627_v60 = vadd.f32 %v626_v59, %v1332_v42 }
 0x14b   :  { %775 = vst [vmem:[#allocation2 + $0x170] sm:$0xff] %v458_v58 }
 0x14c   :  { %776 = vst [vmem:[#allocation2 + $0x178] sm:$0xff] %v627_v60 }
 0x14e   :  { %v537_v61 = vpop.f32.mrf.mxu2 }
 0x14f   :  { %v538_v62 = vadd.f32 %v537_v61, %v1330_v41  ;;  %v706_v63 = vpop.f32.mrf.mxu3 }
 0x150   :  { %v707_v0 = vadd.f32 %v706_v63, %v1332_v42  ;;  %v460_v1 = vpop.f32.mrf.mxu0 }
 0x151   :  { %839 = vst [vmem:[#allocation2 + $0x370] sm:$0xff] %v538_v62  ;;  %v461_v2 = vadd.f32 %v460_v1, %v1330_v41  ;;  %v629_v3 = vpop.f32.mrf.mxu1 }
 0x152   :  { %840 = vst [vmem:[#allocation2 + $0x378] sm:$0xff] %v707_v0  ;;  %v630_v4 = vadd.f32 %v629_v3, %v1332_v42 }
 0x153   :  { %777 = vst [vmem:[#allocation2 + $0x180] sm:$0xff] %v461_v2 }
 0x154   :  { %778 = vst [vmem:[#allocation2 + $0x188] sm:$0xff] %v630_v4 }
 0x156   :  { %v540_v5 = vpop.f32.mrf.mxu2 }
 0x157   :  { %v541_v6 = vadd.f32 %v540_v5, %v1330_v41  ;;  %v709_v7 = vpop.f32.mrf.mxu3 }
 0x158   :  { %v710_v8 = vadd.f32 %v709_v7, %v1332_v42  ;;  %v462_v9 = vpop.f32.mrf.mxu0 }
 0x159   :  { %841 = vst [vmem:[#allocation2 + $0x380] sm:$0xff] %v541_v6  ;;  %v463_v10 = vadd.f32 %v462_v9, %v1330_v41  ;;  %v631_v11 = vpop.f32.mrf.mxu1 }
 0x15a   :  { %842 = vst [vmem:[#allocation2 + $0x388] sm:$0xff] %v710_v8  ;;  %v632_v12 = vadd.f32 %v631_v11, %v1332_v42 }
 0x15b   :  { %779 = vst [vmem:[#allocation2 + $0x190] sm:$0xff] %v463_v10 }
 0x15c   :  { %780 = vst [vmem:[#allocation2 + $0x198] sm:$0xff] %v632_v12 }
 0x15e   :  { %v542_v13 = vpop.f32.mrf.mxu2 }
 0x15f   :  { %v543_v14 = vadd.f32 %v542_v13, %v1330_v41  ;;  %v711_v15 = vpop.f32.mrf.mxu3 }
 0x160   :  { %v712_v16 = vadd.f32 %v711_v15, %v1332_v42  ;;  %v465_v17 = vpop.f32.mrf.mxu0 }
 0x161   :  { %843 = vst [vmem:[#allocation2 + $0x390] sm:$0xff] %v543_v14  ;;  %v466_v18 = vadd.f32 %v465_v17, %v1330_v41  ;;  %v634_v19 = vpop.f32.mrf.mxu1 }
 0x162   :  { %844 = vst [vmem:[#allocation2 + $0x398] sm:$0xff] %v712_v16  ;;  %v635_v20 = vadd.f32 %v634_v19, %v1332_v42 }
 0x163   :  { %781 = vst [vmem:[#allocation2 + $0x1a0] sm:$0xff] %v466_v18 }
 0x164   :  { %782 = vst [vmem:[#allocation2 + $0x1a8] sm:$0xff] %v635_v20 }
 0x166   :  { %v545_v21 = vpop.f32.mrf.mxu2 }
 0x167   :  { %v546_v22 = vadd.f32 %v545_v21, %v1330_v41  ;;  %v714_v23 = vpop.f32.mrf.mxu3 }
 0x168   :  { %v715_v24 = vadd.f32 %v714_v23, %v1332_v42  ;;  %v467_v25 = vpop.f32.mrf.mxu0 }
 0x169   :  { %845 = vst [vmem:[#allocation2 + $0x3a0] sm:$0xff] %v546_v22  ;;  %v468_v26 = vadd.f32 %v467_v25, %v1330_v41  ;;  %v636_v27 = vpop.f32.mrf.mxu1 }
 0x16a   :  { %846 = vst [vmem:[#allocation2 + $0x3a8] sm:$0xff] %v715_v24  ;;  %v637_v28 = vadd.f32 %v636_v27, %v1332_v42 }
 0x16b   :  { %783 = vst [vmem:[#allocation2 + $0x1b0] sm:$0xff] %v468_v26 }
 0x16c   :  { %784 = vst [vmem:[#allocation2 + $0x1b8] sm:$0xff] %v637_v28 }
 0x16e   :  { %v547_v29 = vpop.f32.mrf.mxu2 }
 0x16f   :  { %v548_v30 = vadd.f32 %v547_v29, %v1330_v41  ;;  %v716_v31 = vpop.f32.mrf.mxu3 }
 0x170   :  { %v717_v32 = vadd.f32 %v716_v31, %v1332_v42  ;;  %v470_v33 = vpop.f32.mrf.mxu0 }
 0x171   :  { %847 = vst [vmem:[#allocation2 + $0x3b0] sm:$0xff] %v548_v30  ;;  %v471_v34 = vadd.f32 %v470_v33, %v1330_v41  ;;  %v639_v35 = vpop.f32.mrf.mxu1 }
 0x172   :  { %848 = vst [vmem:[#allocation2 + $0x3b8] sm:$0xff] %v717_v32  ;;  %v640_v36 = vadd.f32 %v639_v35, %v1332_v42 }
 0x173   :  { %785 = vst [vmem:[#allocation2 + $0x1c0] sm:$0xff] %v471_v34 }
 0x174   :  { %786 = vst [vmem:[#allocation2 + $0x1c8] sm:$0xff] %v640_v36 }
 0x176   :  { %v550_v37 = vpop.f32.mrf.mxu2 }
 0x177   :  { %v551_v38 = vadd.f32 %v550_v37, %v1330_v41  ;;  %v719_v39 = vpop.f32.mrf.mxu3 }
 0x178   :  { %v720_v40 = vadd.f32 %v719_v39, %v1332_v42  ;;  %v472_v43 = vpop.f32.mrf.mxu0 }
 0x179   :  { %849 = vst [vmem:[#allocation2 + $0x3c0] sm:$0xff] %v551_v38  ;;  %v473_v44 = vadd.f32 %v472_v43, %v1330_v41  ;;  %v641_v45 = vpop.f32.mrf.mxu1 }
 0x17a   :  { %850 = vst [vmem:[#allocation2 + $0x3c8] sm:$0xff] %v720_v40  ;;  %v642_v46 = vadd.f32 %v641_v45, %v1332_v42 }
 0x17b   :  { %787 = vst [vmem:[#allocation2 + $0x1d0] sm:$0xff] %v473_v44 }
 0x17c   :  { %788 = vst [vmem:[#allocation2 + $0x1d8] sm:$0xff] %v642_v46 }
 0x17e   :  { %v552_v47 = vpop.f32.mrf.mxu2 }
 0x17f   :  { %v553_v48 = vadd.f32 %v552_v47, %v1330_v41  ;;  %v721_v49 = vpop.f32.mrf.mxu3 }
 0x180   :  { %v722_v50 = vadd.f32 %v721_v49, %v1332_v42  ;;  %v475_v51 = vpop.f32.mrf.mxu0 }
 0x181   :  { %851 = vst [vmem:[#allocation2 + $0x3d0] sm:$0xff] %v553_v48  ;;  %v476_v52 = vadd.f32 %v475_v51, %v1330_v41  ;;  %v644_v53 = vpop.f32.mrf.mxu1 }
 0x182   :  { %852 = vst [vmem:[#allocation2 + $0x3d8] sm:$0xff] %v722_v50  ;;  %v645_v54 = vadd.f32 %v644_v53, %v1332_v42 }
 0x183   :  { %789 = vst [vmem:[#allocation2 + $0x1e0] sm:$0xff] %v476_v52 }
 0x184   :  { %790 = vst [vmem:[#allocation2 + $0x1e8] sm:$0xff] %v645_v54 }
 0x186   :  { %v555_v55 = vpop.f32.mrf.mxu2 }
 0x187   :  { %v556_v56 = vadd.f32 %v555_v55, %v1330_v41  ;;  %v724_v57 = vpop.f32.mrf.mxu3 }
 0x188   :  { %v725_v58 = vadd.f32 %v724_v57, %v1332_v42  ;;  %v477_v59 = vpop.f32.mrf.mxu0 }
 0x189   :  { %853 = vst [vmem:[#allocation2 + $0x3e0] sm:$0xff] %v556_v56  ;;  %v478_v60 = vadd.f32 %v477_v59, %v1330_v41  ;;  %v646_v61 = vpop.f32.mrf.mxu1 }
 0x18a   :  { %854 = vst [vmem:[#allocation2 + $0x3e8] sm:$0xff] %v725_v58  ;;  %v647_v62 = vadd.f32 %v646_v61, %v1332_v42 }
 0x18b   :  { %791 = vst [vmem:[#allocation2 + $0x1f0] sm:$0xff] %v478_v60 }
 0x18c   :  { %792 = vst [vmem:[#allocation2 + $0x1f8] sm:$0xff] %v647_v62 }
 0x18e   :  { %v557_v63 = vpop.f32.mrf.mxu2 }
 0x18f   :  { %v558_v0 = vadd.f32 %v557_v63, %v1330_v41  ;;  %v726_v1 = vpop.f32.mrf.mxu3 }
 0x190   :  { %v727_v2 = vadd.f32 %v726_v1, %v1332_v42 }
 0x191   :  { %855 = vst [vmem:[#allocation2 + $0x3f0] sm:$0xff] %v558_v0 }
 0x192   :  { %856 = vst [vmem:[#allocation2 + $0x3f8] sm:$0xff] %v727_v2 }
 0x193   :  { %869 = dma.vmem_to_hbm [thread:$0]  %s862_s25, 16384, %s864_s27, [#allocation3], %s1177_s28, %s1177_s28, %s1178_s29  }
 0x194   :  { %1174 = dma.done.wait [#allocation3], 16384  }
 0x195   :  { %1175 = vsyncadd [#allocation3], 4294950912 }
 0x196   :  { %874 = vsyncpa [#allocation3], 1 }

// kernel: _lambda_.4
= control target key start
LH: loop header
LB: loop body
LE: loop exit
PB: predicated region body
PF: predicated region fallthrough
CT: control target
= control target key end

     0   :  { %s5426_s12 = smov 0   ;;  %s6531_s0 = inlined_call_operand.vmem [shape: bf16[8,17,17,64], index: 0, kind: input, shape index: {}]   ;;  %s6532_s1 = inlined_call_operand.vmem [shape: bf16[9,64,64], index: 1, kind: input, shape index: {}]   ;;  %s6533_s2 = inlined_call_operand.vmem [shape: f32[1,64], index: 2, kind: input, shape index: {}]   ;;  %s6534_s3 = inlined_call_operand.vmem [shape: bf16[2,256,64], index: 3, kind: output, shape index: {}]  }
   0x1 LB: > { %s5432_s13 = sadd.s32 4294967295, %s5404_s12   ;;  %p4243_p0 = scmp.ge.s32.totalorder %s5404_s12, 1  ;;  %s5404_s12 = sphi %s5426_s12, %s13_s12  }
   0x2   : > { %p139_p1 = scmp.lt.s32.totalorder %s5404_s12, 3 }
   0x4   : > { %p140_p2 = pnand %p4243_p0, %p139_p1 }
   0x6   : > { %143 = sbr.rel (%p140_p2) target bundleno = 740 (0x2e4), region = 32 }
   0xb   : > { %v5282_v0 = vld [vmem:[%s6532_s1 + $0x38] sm:$0xff]  ;;  %s4244_s16 = sshll.u32 %s5432_s13, 2  ;;  %v5281_v1 = vld [vmem:[%s6532_s1 + $0x30] sm:$0xff]  ;;  %v5280_v2 = vld [vmem:[%s6532_s1 + $0x28] sm:$0xff]  ;;  %vm363_vm0 = vcmask 523264   ;;  %p171_p4 = scmp.lt.s32.totalorder %s5432_s13, 1 }
   0xc   : > { %p165_p3 = scmp.lt.s32.totalorder %s4244_s16, 7  ;;  %5375 = vmatpush.bf16.msra.mxu1 %v5282_v0  ;;  %5376 = vmatpush.bf16.msra.mxu2 %v5282_v0  ;;  %v5279_v3 = vld [vmem:[%s6532_s1 + $0x20] sm:$0xff]  ;;  %v5286_v4 = vld [vmem:[%s6532_s1 + $0x58] sm:$0xff]  ;;  %v5285_v12 = vld [vmem:[%s6532_s1 + $0x50] sm:$0xff]  ;;  %vm790_vm1 = vsmask.f32 3328 }
   0xd   : > { %5377 = vmatpush.bf16.msra.mxu3 %v5282_v0  ;;  %416 = vmatpush.bf16.msra.mxu0 %v5282_v0  ;;  %v5306_v5 = vld [vmem:[%s6532_s1 + $0x78] sm:$0xff]  ;;  %v5305_v13 = vld [vmem:[%s6532_s1 + $0x70] sm:$0xff]  ;;  %v5284_v16 = vld [vmem:[%s6532_s1 + $0x48] sm:$0xff]  ;;  %vm791_vm2 = vsmask.f32 7440  ;;  %s6544_s13 = smov (!%p171_p4, %s5432_s13), 1 }
   0xe   : > { %s6542_s16 = smov (!%p165_p3, %s4244_s16), 7  ;;  %v5262_v10 = vld [vmem:[%s6532_s1 + $0x18] sm:$0xff]  ;;  %v5261_v14 = vld [vmem:[%s6532_s1 + $0x10] sm:$0xff]  ;;  %v5304_v17 = vld [vmem:[%s6532_s1 + $0x68] sm:$0xff]  ;;  %s5242_s20 = sshll.u32 %s6544_s13, 7  ;;  %vm4151_vm4 = vcmask 519168  }
   0xf   : > { %s5387_s21 = smul.u32 204, %s6542_s16  ;;  %v5326_v11 = vld [vmem:[%s6532_s1 + $0x98] sm:$0xff]  ;;  %v5325_v15 = vld [vmem:[%s6532_s1 + $0x90] sm:$0xff]  ;;  %v5260_v18 = vld [vmem:[%s6532_s1 + $0x8] sm:$0xff]  ;;  %s6242_s22 = scalar_lea.vmem %s6534_s3, %s5242_s20 }
  0x10   : > { %5378 = vmatpush.bf16.msra.mxu1 %v5281_v1  ;;  %5379 = vmatpush.bf16.msra.mxu2 %v5281_v1  ;;  %v5324_v19 = vld [vmem:[%s6532_s1 + $0x88] sm:$0xff]  ;;  %v5283_v24 = vld [vmem:[%s6532_s1 + $0x40] sm:$0xff]  ;;  %v5350_v34 = vld [vmem:[%s6532_s1 + $0xd8] sm:$0xff] }
  0x11   : > { %5380 = vmatpush.bf16.msra.mxu3 %v5281_v1  ;;  %417 = vmatpush.bf16.msra.mxu0 %v5281_v1  ;;  %s5452_s26 = scalar_lea.vmem %s6531_s0, %s5387_s21  ;;  %v5303_v25 = vld [vmem:[%s6532_s1 + $0x60] sm:$0xff]  ;;  %v5370_v35 = vld [vmem:[%s6532_s1 + $0xf8] sm:$0xff]  ;;  %vm5547_vm3 = vmor %vm790_vm1, %vm791_vm2 }
  0x12   : > { %v5267_v6 = vld [vmem:[%s5452_s26 + $0xfc] sm:$0xff]  ;;  %v5271_v7 = vld [vmem:[%s5452_s26 + $0x12c] sm:$0xff]  ;;  %v5269_v28 = vld [vmem:[%s5452_s26 + $0x114] sm:$0xff] }
  0x13   : > { %v5275_v8 = vld [vmem:[%s5452_s26 + $0x15c] sm:$0xff]  ;;  %v5263_v9 = vld [vmem:[%s5452_s26 + $0xcc] sm:$0xff]  ;;  %v5273_v29 = vld [vmem:[%s5452_s26 + $0x144] sm:$0xff] }
  0x14   : > { %5381 = vmatpush.bf16.msra.mxu1 %v5280_v2  ;;  %5382 = vmatpush.bf16.msra.mxu2 %v5280_v2  ;;  %v5268_v20 = vld [vmem:[%s5452_s26 + $0x108] sm:$0xff]  ;;  %v5272_v21 = vld [vmem:[%s5452_s26 + $0x138] sm:$0xff]  ;;  %v5259_v26 = vld [vmem:[%s6532_s1] sm:$0xff] }
  0x15   : > { %5383 = vmatpush.bf16.msra.mxu3 %v5280_v2  ;;  %418 = vmatpush.bf16.msra.mxu0 %v5280_v2  ;;  %v5276_v22 = vld [vmem:[%s5452_s26 + $0x168] sm:$0xff]  ;;  %v5264_v23 = vld [vmem:[%s5452_s26 + $0xd8] sm:$0xff]  ;;  %v5323_v27 = vld [vmem:[%s6532_s1 + $0x80] sm:$0xff] }
  0x16   : > { %v5277_v30 = vld [vmem:[%s5452_s26 + $0x174] sm:$0xff]  ;;  %v5265_v31 = vld [vmem:[%s5452_s26 + $0xe4] sm:$0xff]  ;;  %v742_v32 = vld [vmem:[%s5452_s26] sm:$0xf] }
  0x17   : > { %v743_v33 = vld [vmem:[%s5452_s26 + $0x4] sm:$0xf]  ;;  %v5330_v36 = vld [vmem:[%s6532_s1 + $0xb8] sm:$0xff]  ;;  %v794_v38 = vshrl.u32 %v742_v32, 16  ;;  %v797_v39 = vshll.u32 %v742_v32, 16  ;;  %v5274_v51 = vld [vmem:[%s5452_s26 + $0x150] sm:$0xff] }
  0x18   : > { %5384 = vmatpush.bf16.msra.mxu1 %v5279_v3  ;;  %5385 = vmatpush.bf16.msra.mxu2 %v5279_v3  ;;  %v5374_v37 = vld [vmem:[%s6532_s1 + $0x118] sm:$0xff]  ;;  %v803_v40 = vshll.u32 %v743_v33, 16  ;;  %v807_v41 = vshrl.u32 %v743_v33, 16  ;;  %v744_v46 = vld [vmem:[%s5452_s26 + $0x8] sm:$0x1]  ;;  %v5270_v50 = vld [vmem:[%s5452_s26 + $0x120] sm:$0xff] }
  0x19   : > { %5386 = vmatpush.bf16.msra.mxu3 %v5279_v3  ;;  %419 = vmatpush.bf16.msra.mxu0 %v5279_v3  ;;  %v796_v42 = vrot.slane %v794_v38, 4  ;;  %v799_v43 = vrot.slane %v797_v39, 5  ;;  %v813_v49 = vshll.u32 %v744_v46, 16  ;;  %v5278_v52 = vld [vmem:[%s5452_s26 + $0x180] sm:$0xff]  ;;  %v5266_v53 = vld [vmem:[%s5452_s26 + $0xf0] sm:$0xff] }
  0x1a   : > { %v805_v44 = vrot.slane %v803_v40, 5  ;;  %v809_v45 = vrot.slane %v807_v41, 4  ;;  %v745_v58 = vld [vmem:[%s5452_s26 + $0xc] sm:$0xf]  ;;  %v746_v59 = vld [vmem:[%s5452_s26 + $0x10] sm:$0xf] }
  0x1b   : > { %4372 = vmatmul.msk.bf16.vlgmr.msra.gmra.mxu1 %vm363_vm0, %v5267_v6  ;;  %4376 = vmatmul.msk.bf16.vlgmr.msra.gmra.mxu2 %vm363_vm0, %v5271_v7  ;;  %v800_v47 = vor.u32 %v799_v43, %v796_v42  ;;  %v815_v56 = vrot.slane %v813_v49, 5  ;;  %v818_v62 = vshrl.u32 %v745_v58, 16  ;;  %v821_v63 = vshll.u32 %v745_v58, 16  ;;  %v750_v33 = vld [vmem:[%s5452_s26 + $0x20] sm:$0x1] }
  0x1c   : > { %1310 = vmatpush.bf16.msrb.mxu2 %v5286_v4  ;;  %4380 = vmatmul.msk.bf16.vlgmr.msra.gmra.mxu3 %vm363_vm0, %v5275_v8  ;;  %v810_v48 = vor.u32 %v809_v45, %v805_v44  ;;  %v827_v0 = vshll.u32 %v746_v59, 16  ;;  %v831_v1 = vshrl.u32 %v746_v59, 16  ;;  %v747_v8 = vld [vmem:[%s5452_s26 + $0x14] sm:$0x1]  ;;  %v861_v40 = vshll.u32 %v750_v33, 16  ;;  %v5346_v57 = vld [vmem:[%s5452_s26 + $0xc0] sm:$0xff] }
  0x1d   : > { %1625 = vmatpush.bf16.msrb.mxu3 %v5306_v5  ;;  %4368 = vmatmul.msk.bf16.vlgmr.msra.gmra.mxu0 %vm363_vm0, %v5263_v9  ;;  %v801_v54 = vrot.slane %v800_v47, 4  ;;  %v820_v4 = vrot.slane %v818_v62, 4  ;;  %v823_v5 = vrot.slane %v821_v63, 5  ;;  %v5243_v9 = vld [vmem:[%s5452_s26] sm:$0xff]  ;;  %v752_v42 = vld [vmem:[%s5452_s26 + $0x28] sm:$0xf] }
  0x1e   : > { %657 = vmatpush.bf16.msrb.mxu1 %v5262_v10  ;;  %1940 = vmatpush.bf16.msrb.mxu0 %v5326_v11  ;;  %v811_v55 = vrot.slane %v810_v48, 4  ;;  %v829_v6 = vrot.slane %v827_v0, 5  ;;  %v833_v7 = vrot.slane %v831_v1, 4  ;;  %v751_v41 = vld [vmem:[%s5452_s26 + $0x24] sm:$0xf]  ;;  %v863_v45 = vrot.slane %v861_v40, 5 }
  0x1f   : > { %v806_v60 = vsel %vm5547_vm3, %v801_v54, %v805_v44  ;;  %v824_v11 = vor.u32 %v823_v5, %v820_v4  ;;  %v866_v46 = vshrl.u32 %v751_v41, 16  ;;  %v869_v47 = vshll.u32 %v751_v41, 16  ;;  %v753_v59 = vld [vmem:[%s5452_s26 + $0x2c] sm:$0x1]  ;;  %v5245_v63 = vld [vmem:[%s5452_s26 + $0x18] sm:$0xff]  ;;  %v5289_v1 = vld [vmem:[%s5452_s26 + $0x1b0] sm:$0xff] }
  0x20   : > { %1311 = vmatpush.bf16.msrb.mxu2 %v5285_v12  ;;  %v816_v61 = vsel %vm5547_vm3, %v811_v55, %v815_v56  ;;  %v1186_v2 = vunpack.c.l.b16 %v806_v60  ;;  %v834_v12 = vor.u32 %v833_v7, %v829_v6  ;;  %v875_v48 = vshll.u32 %v752_v42, 16  ;;  %v755_v7 = vld [vmem:[%s5452_s26 + $0x34] sm:$0xf] }
  0x21   : > { %1626 = vmatpush.bf16.msrb.mxu3 %v5305_v13  ;;  %v1187_v3 = vunpack.c.l.b16 %v816_v61  ;;  %v837_v13 = vshll.u32 %v747_v8, 16  ;;  %v879_v49 = vshrl.u32 %v752_v42, 16  ;;  %v885_v62 = vshll.u32 %v753_v59, 16  ;;  %v5349_v8 = vld [vmem:[%s6532_s1 + $0xd0] sm:$0xff] }
  0x22   : > { %658 = vmatpush.bf16.msrb.mxu1 %v5261_v14  ;;  %1941 = vmatpush.bf16.msrb.mxu0 %v5325_v15  ;;  %v5287_v14 = vld [vmem:[%s5452_s26 + $0x198] sm:$0xff]  ;;  %v5307_v15 = vld [vmem:[%s5452_s26 + $0x264] sm:$0xff]  ;;  %v877_v54 = vrot.slane %v875_v48, 5 }
  0x23   : > { %v1218_v10 = vpack.c.b16 %v1187_v3, %v1186_v2  ;;  %v881_v55 = vrot.slane %v879_v49, 4  ;;  %v5309_v2 = vld [vmem:[%s5452_s26 + $0x27c] sm:$0xff]  ;;  %v887_v5 = vrot.slane %v885_v62, 5  ;;  %v759_v49 = vld [vmem:[%s5452_s26 + $0x44] sm:$0x1] }
  0x24   : > { %1312 = vmatpush.bf16.msrb.mxu2 %v5284_v16  ;;  %v825_v16 = vrot.slane %v824_v11, 4 }
  0x25   : > { %1627 = vmatpush.bf16.msrb.mxu3 %v5304_v17  ;;  %v835_v17 = vrot.slane %v834_v12, 4  ;;  %v882_v61 = vor.u32 %v881_v55, %v877_v54 }
  0x26   : > { %659 = vmatpush.bf16.msrb.mxu1 %v5260_v18  ;;  %1942 = vmatpush.bf16.msrb.mxu0 %v5324_v19  ;;  %v839_v18 = vrot.slane %v837_v13, 5  ;;  %v748_v19 = vld [vmem:[%s5452_s26 + $0x18] sm:$0xf] }
  0x27   : > { %v883_v4 = vrot.slane %v882_v61, 4  ;;  %v761_v61 = vld [vmem:[%s5452_s26 + $0x4c] sm:$0xf] }
  0x28   : > { %1313 = vmatpush.bf16.msrb.mxu2 %v5283_v24  ;;  %v845_v24 = vshll.u32 %v748_v19, 16 }
  0x29   : > { %1628 = vmatpush.bf16.msrb.mxu3 %v5303_v25  ;;  %v888_v11 = vsel %vm5547_vm3, %v883_v4, %v887_v5  ;;  %v947_v4 = vshll.u32 %v761_v61, 16  ;;  %v951_v5 = vshrl.u32 %v761_v61, 16 }
  0x2a   : > { %660 = vmatpush.bf16.msrb.mxu1 %v5259_v26  ;;  %1943 = vmatpush.bf16.msrb.mxu0 %v5323_v27 }
  0x2b   : > { %4373 = vmatmul.msk.bf16.gmra.mxu1 %vm363_vm0, %v5268_v20  ;;  %4377 = vmatmul.msk.bf16.gmra.mxu2 %vm363_vm0, %v5272_v21  ;;  %v749_v20 = vld [vmem:[%s5452_s26 + $0x1c] sm:$0xf]  ;;  %v830_v21 = vsel %vm5547_vm3, %v825_v16, %v829_v6  ;;  %v754_v6 = vld [vmem:[%s5452_s26 + $0x30] sm:$0xf] }
  0x2c   : > { %4381 = vmatmul.msk.bf16.gmra.mxu3 %vm363_vm0, %v5276_v22  ;;  %2937 = vmatpush.bf16.msra.mxu2 %v5350_v34  ;;  %v840_v22 = vsel %vm5547_vm3, %v835_v17, %v839_v18  ;;  %v851_v25 = vshll.u32 %v749_v20, 16  ;;  %v855_v26 = vshrl.u32 %v749_v20, 16  ;;  %v1188_v27 = vunpack.c.l.b16 %v830_v21  ;;  %v5244_v34 = vld [vmem:[%s5452_s26 + $0xc] sm:$0xff] }
  0x2d   : > { %4369 = vmatmul.msk.bf16.gmra.mxu0 %vm363_vm0, %v5264_v23  ;;  %3252 = vmatpush.bf16.msra.mxu3 %v5370_v35  ;;  %v842_v23 = vshrl.u32 %v748_v19, 16  ;;  %v890_v12 = vshrl.u32 %v754_v6, 16  ;;  %v893_v13 = vshll.u32 %v754_v6, 16  ;;  %v5329_v16 = vld [vmem:[%s6532_s1 + $0xb0] sm:$0xff]  ;;  %v1193_v19 = vunpack.c.l.b16 %v888_v11 }
  0x2e   : > { %2622 = vmatpush.bf16.msra.mxu1 %v5330_v36  ;;  %3934 = vmatpush.bf16.msra.mxu0 %v5374_v37  ;;  %v857_v32 = vrot.slane %v855_v26, 4  ;;  %v5288_v36 = vld [vmem:[%s5452_s26 + $0x1a4] sm:$0xff]  ;;  %v5308_v37 = vld [vmem:[%s5452_s26 + $0x270] sm:$0xff] }
  0x2f   : > { %v5373_v17 = vld [vmem:[%s6532_s1 + $0x110] sm:$0xff]  ;;  %v892_v20 = vrot.slane %v890_v12, 4  ;;  %v895_v21 = vrot.slane %v893_v13, 5  ;;  %v949_v13 = vrot.slane %v947_v4, 5 }
  0x30   : > { %2938 = vmatpush.bf16.msra.mxu2 %v5349_v8 }
  0x32   : > { %2623 = vmatpush.bf16.msra.mxu1 %v5329_v16  ;;  %3935 = vmatpush.bf16.msra.mxu0 %v5373_v17  ;;  %v762_v17 = vld [vmem:[%s5452_s26 + $0x50] sm:$0x1] }
  0x3b   : > { %4374 = vmatmul.msk.bf16.gmra.mxu1 %vm363_vm0, %v5269_v28  ;;  %4378 = vmatmul.msk.bf16.gmra.mxu2 %vm363_vm0, %v5273_v29  ;;  %v1189_v28 = vunpack.c.l.b16 %v840_v22  ;;  %v844_v29 = vrot.slane %v842_v23, 4 }
  0x3c   : > { %4382 = vmatmul.msk.bf16.gmra.mxu3 %vm363_vm0, %v5277_v30  ;;  %v847_v30 = vrot.slane %v845_v24, 5  ;;  %v756_v24 = vld [vmem:[%s5452_s26 + $0x38] sm:$0x1] }
  0x3d   : > { %4370 = vmatmul.msk.bf16.gmra.mxu0 %vm363_vm0, %v5265_v31  ;;  %v853_v31 = vrot.slane %v851_v25, 5  ;;  %v1219_v35 = vpack.c.b16 %v1189_v28, %v1188_v27  ;;  %v5246_v25 = vld [vmem:[%s5452_s26 + $0x24] sm:$0xff]  ;;  %v896_v27 = vor.u32 %v895_v21, %v892_v20  ;;  %v957_v21 = vshll.u32 %v762_v17, 16 }
  0x3e   : > { %v848_v38 = vor.u32 %v847_v30, %v844_v29  ;;  %v909_v29 = vshll.u32 %v756_v24, 16  ;;  %v5290_v30 = vld [vmem:[%s5452_s26 + $0x1bc] sm:$0xff] }
  0x3f   : > { %v858_v39 = vor.u32 %v857_v32, %v853_v31  ;;  %v897_v32 = vrot.slane %v896_v27, 4  ;;  %v5312_v27 = vld [vmem:[%s5452_s26 + $0x2a0] sm:$0xff] }
  0x40   : > { %v849_v43 = vrot.slane %v848_v38, 4 }
  0x41   : > { %v859_v44 = vrot.slane %v858_v39, 4 }
  0x4b   : > { %4375 = vmatmul.msk.bf16.gmra.mxu1 %vm363_vm0, %v5270_v50  ;;  %4379 = vmatmul.msk.bf16.gmra.mxu2 %vm363_vm0, %v5274_v51  ;;  %v854_v50 = vsel %vm5547_vm3, %v849_v43, %v853_v31  ;;  %v864_v51 = vsel %vm5547_vm3, %v859_v44, %v863_v45  ;;  %v5310_v31 = vld [vmem:[%s5452_s26 + $0x288] sm:$0xff] }
  0x4c   : > { %4383 = vmatmul.msk.bf16.gmra.mxu3 %vm363_vm0, %v5278_v52  ;;  %v868_v52 = vrot.slane %v866_v46, 4  ;;  %v1190_v56 = vunpack.c.l.b16 %v854_v50  ;;  %v1191_v58 = vunpack.c.l.b16 %v864_v51  ;;  %v5247_v50 = vld [vmem:[%s5452_s26 + $0x30] sm:$0xff] }
  0x4d   : > { %4371 = vmatmul.msk.bf16.gmra.mxu0 %vm363_vm0, %v5266_v53  ;;  %v871_v53 = vrot.slane %v869_v47, 5 }
  0x4e   : > { %v1220_v0 = vpack.c.b16 %v1191_v58, %v1190_v56  ;;  %v933_v58 = vshll.u32 %v759_v49, 16 }
  0x4f   : > { %v872_v60 = vor.u32 %v871_v53, %v868_v52  ;;  %v5291_v53 = vld [vmem:[%s5452_s26 + $0x1c8] sm:$0xff] }
  0x51   : > { %v873_v3 = vrot.slane %v872_v60, 4  ;;  %v760_v60 = vld [vmem:[%s5452_s26 + $0x48] sm:$0xf] }
  0x5b   : > { %4464 = vmatmul.msk.bf16.vlgmr.msrb.gmra.mxu1 %vm363_vm0, %v5243_v9  ;;  %4504 = vmatmul.msk.bf16.vlgmr.msrb.gmra.mxu2 %vm363_vm0, %v1218_v10  ;;  %v5369_v9 = vld [vmem:[%s6532_s1 + $0xf0] sm:$0xff]  ;;  %v878_v10 = vsel %vm5547_vm3, %v873_v3, %v877_v54  ;;  %v941_v3 = vshll.u32 %v760_v60, 16 }
  0x5c   : > { %4640 = vmatmul.msk.bf16.vlgmr.msrb.gmra.mxu3 %vm363_vm0, %v5287_v14  ;;  %v899_v14 = vshll.u32 %v755_v7, 16  ;;  %v1192_v18 = vunpack.c.l.b16 %v878_v10  ;;  %v5311_v54 = vld [vmem:[%s5452_s26 + $0x294] sm:$0xff] }
  0x5d   : > { %4776 = vmatmul.msk.bf16.vlgmr.msrb.gmra.mxu0 %vm363_vm0, %v5307_v15  ;;  %3253 = vmatpush.bf16.msra.mxu3 %v5369_v9  ;;  %v903_v15 = vshrl.u32 %v755_v7, 16  ;;  %v943_v12 = vrot.slane %v941_v3, 5 }
  0x5e   : > { %v901_v22 = vrot.slane %v899_v14, 5  ;;  %v1221_v26 = vpack.c.b16 %v1193_v19, %v1192_v18  ;;  %v953_v14 = vrot.slane %v951_v5, 4  ;;  %v5348_v5 = vld [vmem:[%s6532_s1 + $0xc8] sm:$0xff] }
  0x5f   : > { %v905_v23 = vrot.slane %v903_v15, 4  ;;  %2939 = vmatpush.bf16.msra.mxu2 %v5348_v5 }
  0x60   : > { %v954_v20 = vor.u32 %v953_v14, %v949_v13 }
  0x61   : > { %v906_v28 = vor.u32 %v905_v23, %v901_v22  ;;  %v5248_v23 = vld [vmem:[%s5452_s26 + $0x3c] sm:$0xff] }
  0x63   : > { %v907_v33 = vrot.slane %v906_v28, 4 }
  0x6b   : > { %4465 = vmatmul.msk.bf16.gmra.mxu1 %vm363_vm0, %v5244_v34  ;;  %4505 = vmatmul.msk.bf16.gmra.mxu2 %vm363_vm0, %v1219_v35  ;;  %v911_v34 = vrot.slane %v909_v29, 5  ;;  %v757_v35 = vld [vmem:[%s5452_s26 + $0x3c] sm:$0xf] }
  0x6c   : > { %4641 = vmatmul.msk.bf16.gmra.mxu3 %vm363_vm0, %v5288_v36  ;;  %v758_v36 = vld [vmem:[%s5452_s26 + $0x40] sm:$0xf]  ;;  %v914_v39 = vshrl.u32 %v757_v35, 16  ;;  %v917_v40 = vshll.u32 %v757_v35, 16 }
  0x6d   : > { %4777 = vmatmul.msk.bf16.gmra.mxu0 %vm363_vm0, %v5308_v37  ;;  %v902_v37 = vsel %vm5547_vm3, %v897_v32, %v901_v22  ;;  %v912_v38 = vsel %vm5547_vm3, %v907_v33, %v911_v34  ;;  %v923_v41 = vshll.u32 %v758_v36, 16  ;;  %v927_v42 = vshrl.u32 %v758_v36, 16  ;;  %v763_v32 = vld [vmem:[%s5452_s26 + $0x54] sm:$0xf]  ;;  %v764_v33 = vld [vmem:[%s5452_s26 + $0x58] sm:$0xf] }
  0x6e   : > { %v1194_v43 = vunpack.c.l.b16 %v902_v37  ;;  %v1195_v44 = vunpack.c.l.b16 %v912_v38  ;;  %v916_v45 = vrot.slane %v914_v39, 4  ;;  %v919_v46 = vrot.slane %v917_v40, 5 }
  0x6f   : > { %v925_v47 = vrot.slane %v923_v41, 5  ;;  %v929_v48 = vrot.slane %v927_v42, 4  ;;  %v962_v38 = vshrl.u32 %v763_v32, 16  ;;  %v965_v39 = vshll.u32 %v763_v32, 16 }
  0x70   : > { %v1222_v51 = vpack.c.b16 %v1195_v44, %v1194_v43  ;;  %v920_v55 = vor.u32 %v919_v46, %v916_v45  ;;  %v971_v40 = vshll.u32 %v764_v33, 16  ;;  %v975_v41 = vshrl.u32 %v764_v33, 16 }
  0x71   : > { %v930_v56 = vor.u32 %v929_v48, %v925_v47  ;;  %v964_v46 = vrot.slane %v962_v38, 4 }
  0x72   : > { %v921_v62 = vrot.slane %v920_v55, 4  ;;  %v973_v48 = vrot.slane %v971_v40, 5  ;;  %v977_v49 = vrot.slane %v975_v41, 4 }
  0x74   : > { %v926_v8 = vsel %vm5547_vm3, %v921_v62, %v925_v47  ;;  %v967_v47 = vrot.slane %v965_v39, 5  ;;  %v5293_v62 = vld [vmem:[%s5452_s26 + $0x1e0] sm:$0xff]  ;;  %v5250_v39 = vld [vmem:[%s5452_s26 + $0x54] sm:$0xff] }
  0x75   : > { %v1196_v15 = vunpack.c.l.b16 %v926_v8  ;;  %v5368_v8 = vld [vmem:[%s6532_s1 + $0xe8] sm:$0xff] }
  0x76   : > { %3254 = vmatpush.bf16.msra.mxu3 %v5368_v8 }
  0x7b   : > { %4466 = vmatmul.msk.bf16.gmra.mxu1 %vm363_vm0, %v5245_v63  ;;  %4506 = vmatmul.msk.bf16.gmra.mxu2 %vm363_vm0, %v1220_v0  ;;  %v931_v63 = vrot.slane %v930_v56, 4  ;;  %v935_v0 = vrot.slane %v933_v58, 5  ;;  %v968_v56 = vor.u32 %v967_v47, %v964_v46  ;;  %v978_v58 = vor.u32 %v977_v49, %v973_v48 }
  0x7c   : > { %4642 = vmatmul.msk.bf16.gmra.mxu3 %vm363_vm0, %v5289_v1 }
  0x7d   : > { %4778 = vmatmul.msk.bf16.gmra.mxu0 %vm363_vm0, %v5309_v2  ;;  %v938_v2 = vshrl.u32 %v760_v60, 16  ;;  %v936_v9 = vsel %vm5547_vm3, %v931_v63, %v935_v0  ;;  %v5313_v63 = vld [vmem:[%s5452_s26 + $0x2ac] sm:$0xff]  ;;  %v979_v3 = vrot.slane %v978_v58, 4 }
  0x7e   : > { %v1197_v16 = vunpack.c.l.b16 %v936_v9  ;;  %v766_v9 = vld [vmem:[%s5452_s26 + $0x60] sm:$0xf] }
  0x7f   : > { %v940_v11 = vrot.slane %v938_v2, 4  ;;  %v969_v2 = vrot.slane %v968_v56, 4  ;;  %v986_v17 = vshrl.u32 %v766_v9, 16 }
  0x80   : > { %v1223_v24 = vpack.c.b16 %v1197_v16, %v1196_v15 }
  0x81   : > { %v944_v19 = vor.u32 %v943_v12, %v940_v11  ;;  %v767_v11 = vld [vmem:[%s5452_s26 + $0x64] sm:$0xf]  ;;  %v974_v14 = vsel %vm5547_vm3, %v969_v2, %v973_v48 }
  0x83   : > { %v945_v29 = vrot.slane %v944_v19, 4  ;;  %v989_v19 = vshll.u32 %v766_v9, 16 }
  0x85   : > { %v950_v35 = vsel %vm5547_vm3, %v945_v29, %v949_v13 }
  0x86   : > { %v1198_v44 = vunpack.c.l.b16 %v950_v35  ;;  %v768_v35 = vld [vmem:[%s5452_s26 + $0x68] sm:$0x1] }
  0x87   : > { %v1005_v48 = vshll.u32 %v768_v35, 16 }
  0x89   : > { %v1007_v58 = vrot.slane %v1005_v48, 5 }
  0x8b   : > { %4467 = vmatmul.msk.bf16.gmra.mxu1 %vm363_vm0, %v5246_v25  ;;  %4507 = vmatmul.msk.bf16.gmra.mxu2 %vm363_vm0, %v1221_v26  ;;  %v5292_v26 = vld [vmem:[%s5452_s26 + $0x1d4] sm:$0xff] }
  0x8c   : > { %4643 = vmatmul.msk.bf16.gmra.mxu3 %vm363_vm0, %v5290_v30  ;;  %v955_v30 = vrot.slane %v954_v20, 4  ;;  %v995_v20 = vshll.u32 %v767_v11, 16 }
  0x8d   : > { %4779 = vmatmul.msk.bf16.gmra.mxu0 %vm363_vm0, %v5310_v31  ;;  %v959_v31 = vrot.slane %v957_v21, 5  ;;  %v999_v21 = vshrl.u32 %v767_v11, 16 }
  0x8e   : > { %v997_v32 = vrot.slane %v995_v20, 5 }
  0x8f   : > { %v960_v36 = vsel %vm5547_vm3, %v955_v30, %v959_v31  ;;  %v988_v30 = vrot.slane %v986_v17, 4  ;;  %v991_v31 = vrot.slane %v989_v19, 5  ;;  %v1001_v33 = vrot.slane %v999_v21, 4 }
  0x90   : > { %v1199_v45 = vunpack.c.l.b16 %v960_v36 }
  0x91   : > { %v992_v46 = vor.u32 %v991_v31, %v988_v30  ;;  %v1002_v47 = vor.u32 %v1001_v33, %v997_v32 }
  0x92   : > { %v1224_v55 = vpack.c.b16 %v1199_v45, %v1198_v44  ;;  %v5294_v44 = vld [vmem:[%s5452_s26 + $0x1ec] sm:$0xff]  ;;  %v5314_v45 = vld [vmem:[%s5452_s26 + $0x2b8] sm:$0xff] }
  0x93   : > { %v1003_v56 = vrot.slane %v1002_v47, 4 }
  0x95   : > { %v1008_v9 = vsel %vm5547_vm3, %v1003_v56, %v1007_v58 }
  0x96   : > { %v1203_v21 = vunpack.c.l.b16 %v1008_v9 }
  0x98   : > { %v5629_v52 = vpop.f32.mrf.mxu1 }
  0x9a   : > { %v5633_v59 = vpop.f32.mrf.mxu0 }
  0x9b   : > { %4468 = vmatmul.msk.bf16.gmra.mxu1 %vm363_vm0, %v5247_v50  ;;  %4508 = vmatmul.msk.bf16.gmra.mxu2 %vm363_vm0, %v1222_v51  ;;  %v765_v50 = vld [vmem:[%s5452_s26 + $0x5c] sm:$0x1] }
  0x9c   : > { %4644 = vmatmul.msk.bf16.gmra.mxu3 %vm363_vm0, %v5291_v53  ;;  %v981_v60 = vshll.u32 %v765_v50, 16  ;;  %v769_v50 = vld [vmem:[%s5452_s26 + $0x6c] sm:$0xf] }
  0x9d   : > { %4780 = vmatmul.msk.bf16.gmra.mxu0 %vm363_vm0, %v5311_v54  ;;  %v5249_v54 = vld [vmem:[%s5452_s26 + $0x48] sm:$0xff] }
  0x9e   : > { %v5641_v1 = vpop.f32.mrf.mxu2  ;;  %v983_v4 = vrot.slane %v981_v60, 5 }
  0x9f   : > { %v5643_v6 = vpop.f32.mrf.mxu3 }
  0xa0   : > { %v5645_v7 = vpop.f32.mrf.mxu1  ;;  %v984_v15 = vsel %vm5547_vm3, %v979_v3, %v983_v4 }
  0xa1   : > { %v1201_v29 = vunpack.c.l.b16 %v984_v15 }
  0xa2   : > { %v5651_v10 = vpop.f32.mrf.mxu0 }
  0xa6   : > { %v5654_v18 = vpop.f32.mrf.mxu2 }
  0xa7   : > { %v5656_v22 = vpop.f32.mrf.mxu3 }
  0xa8   : > { %v5659_v25 = vpop.f32.mrf.mxu1 }
  0xaa   : > { %v5663_v28 = vpop.f32.mrf.mxu0 }
  0xab   : > { %4469 = vmatmul.msk.bf16.gmra.mxu1 %vm363_vm0, %v5248_v23  ;;  %4509 = vmatmul.msk.bf16.gmra.mxu2 %vm363_vm0, %v1223_v24  ;;  %v5328_v24 = vld [vmem:[%s6532_s1 + $0xa8] sm:$0xff] }
  0xac   : > { %4645 = vmatmul.msk.bf16.gmra.mxu3 %vm363_vm0, %v5292_v26  ;;  %v5372_v26 = vld [vmem:[%s6532_s1 + $0x108] sm:$0xff]  ;;  %2624 = vmatpush.bf16.msra.mxu1 %v5328_v24  ;;  %v771_v24 = vld [vmem:[%s5452_s26 + $0x74] sm:$0x1] }
  0xad   : > { %4781 = vmatmul.msk.bf16.gmra.mxu0 %vm363_vm0, %v5312_v27  ;;  %v1200_v27 = vunpack.c.l.b16 %v974_v14  ;;  %v1029_v30 = vshll.u32 %v771_v24, 16 }
  0xae   : > { %v5671_v34 = vpop.f32.mrf.mxu2  ;;  %3936 = vmatpush.bf16.msra.mxu0 %v5372_v26 }
  0xaf   : > { %v5677_v37 = vpop.f32.mrf.mxu3  ;;  %v1225_v40 = vpack.c.b16 %v1201_v29, %v1200_v27  ;;  %v1031_v48 = vrot.slane %v1029_v30, 5 }
  0xb0   : > { %v5679_v42 = vpop.f32.mrf.mxu1 }
  0xb2   : > { %v5681_v43 = vpop.f32.mrf.mxu0 }
  0xb6   : > { %v5684_v51 = vpop.f32.mrf.mxu2 }
  0xb7   : > { %v5686_v53 = vpop.f32.mrf.mxu3 }
  0xb8   : > { %v5689_v61 = vpop.f32.mrf.mxu1 }
  0xba   : > { %v5693_v0 = vpop.f32.mrf.mxu0 }
  0xbb   : > { %4470 = vmatmul.msk.bf16.gmra.mxu1 %vm363_vm0, %v5249_v54  ;;  %4510 = vmatmul.msk.bf16.gmra.mxu2 %vm363_vm0, %v1224_v55  ;;  %v770_v54 = vld [vmem:[%s5452_s26 + $0x70] sm:$0xf]  ;;  %v993_v55 = vrot.slane %v992_v46, 4 }
  0xbc   : > { %4646 = vmatmul.msk.bf16.gmra.mxu3 %vm363_vm0, %v5293_v62  ;;  %v1010_v62 = vshrl.u32 %v769_v50, 16  ;;  %v1019_v2 = vshll.u32 %v770_v54, 16  ;;  %v1023_v3 = vshrl.u32 %v770_v54, 16  ;;  %v773_v54 = vld [vmem:[%s5452_s26 + $0x7c] sm:$0xf] }
  0xbd   : > { %4782 = vmatmul.msk.bf16.gmra.mxu0 %vm363_vm0, %v5313_v63  ;;  %v1013_v63 = vshll.u32 %v769_v50, 16  ;;  %v998_v8 = vsel %vm5547_vm3, %v993_v55, %v997_v32  ;;  %v5251_v32 = vld [vmem:[%s5452_s26 + $0x60] sm:$0xff]  ;;  %v772_v50 = vld [vmem:[%s5452_s26 + $0x78] sm:$0xf] }
  0xbe   : > { %v5707_v12 = vpop.f32.mrf.mxu2  ;;  %v1012_v14 = vrot.slane %v1010_v62, 4  ;;  %v1021_v17 = vrot.slane %v1019_v2, 5  ;;  %v1025_v19 = vrot.slane %v1023_v3, 4  ;;  %v1202_v20 = vunpack.c.l.b16 %v998_v8 }
  0xbf   : > { %v5709_v13 = vpop.f32.mrf.mxu3  ;;  %v1015_v15 = vrot.slane %v1013_v63, 5  ;;  %v1034_v58 = vshrl.u32 %v772_v50, 16  ;;  %v1037_v2 = vshll.u32 %v772_v50, 16  ;;  %v1043_v3 = vshll.u32 %v773_v54, 16  ;;  %v5296_v50 = vld [vmem:[%s5452_s26 + $0x204] sm:$0xff] }
  0xc0   : > { %v5715_v16 = vpop.f32.mrf.mxu1  ;;  %v1026_v29 = vor.u32 %v1025_v19, %v1021_v17  ;;  %v1226_v33 = vpack.c.b16 %v1203_v21, %v1202_v20  ;;  %v1047_v8 = vshrl.u32 %v773_v54, 16  ;;  %v5316_v54 = vld [vmem:[%s5452_s26 + $0x2d0] sm:$0xff] }
  0xc1   : > { %v1016_v27 = vor.u32 %v1015_v15, %v1012_v14  ;;  %v1039_v24 = vrot.slane %v1037_v2, 5  ;;  %v775_v2 = vld [vmem:[%s5452_s26 + $0x84] sm:$0xf] }
  0xc2   : > { %v5717_v23 = vpop.f32.mrf.mxu0  ;;  %v1027_v47 = vrot.slane %v1026_v29, 4  ;;  %v1049_v29 = vrot.slane %v1047_v8, 4 }
  0xc3   : > { %v1017_v46 = vrot.slane %v1016_v27, 4  ;;  %v1045_v27 = vrot.slane %v1043_v3, 5  ;;  %v776_v3 = vld [vmem:[%s5452_s26 + $0x88] sm:$0xf] }
  0xc5   : > { %v1022_v56 = vsel %vm5547_vm3, %v1017_v46, %v1021_v17  ;;  %v1036_v17 = vrot.slane %v1034_v58, 4 }
  0xc6   : > { %v5726_v36 = vpop.f32.mrf.mxu2  ;;  %v1204_v20 = vunpack.c.l.b16 %v1022_v56 }
  0xc7   : > { %v5728_v38 = vpop.f32.mrf.mxu3  ;;  %v1040_v46 = vor.u32 %v1039_v24, %v1036_v17  ;;  %v1067_v17 = vshll.u32 %v776_v3, 16  ;;  %v1071_v24 = vshrl.u32 %v776_v3, 16 }
  0xc8   : > { %v5731_v41 = vpop.f32.mrf.mxu1 }
  0xca   : > { %v5735_v49 = vpop.f32.mrf.mxu0 }
  0xcb   : > { %4471 = vmatmul.msk.bf16.gmra.mxu1 %vm363_vm0, %v5250_v39  ;;  %4511 = vmatmul.msk.bf16.gmra.mxu2 %vm363_vm0, %v1225_v40  ;;  %v5295_v39 = vld [vmem:[%s5452_s26 + $0x1f8] sm:$0xff]  ;;  %v5315_v40 = vld [vmem:[%s5452_s26 + $0x2c4] sm:$0xff] }
  0xcc   : > { %4647 = vmatmul.msk.bf16.gmra.mxu3 %vm363_vm0, %v5294_v44 }
  0xcd   : > { %4783 = vmatmul.msk.bf16.gmra.mxu0 %vm363_vm0, %v5314_v45 }
  0xce   : > { %v5743_v60 = vpop.f32.mrf.mxu2 }
  0xcf   : > { %v5745_v4 = vpop.f32.mrf.mxu3 }
  0xd0   : > { %v5747_v5 = vpop.f32.mrf.mxu1 }
  0xd2   : > { %v5753_v11 = vpop.f32.mrf.mxu0 }
  0xd6   : > { %v5756_v26 = vpop.f32.mrf.mxu2 }
  0xd7   : > { %v5758_v31 = vpop.f32.mrf.mxu3 }
  0xd8   : > { %v662_v35 = vpop.f32.mrf.mxu1 }
  0xd9   : > { %v663_v44 = vadd.f32 %v662_v35, %v5633_v59  ;;  %v1032_v59 = vsel %vm5547_vm3, %v1027_v47, %v1031_v48  ;;  %v1050_v47 = vor.u32 %v1049_v29, %v1045_v27 }
  0xda   : > { %v1945_v45 = vpop.f32.mrf.mxu0  ;;  %v1205_v21 = vunpack.c.l.b16 %v1032_v59 }
  0xdb   : > { %4472 = vmatmul.msk.bf16.gmra.mxu1 %vm363_vm0, %v5251_v32  ;;  %4512 = vmatmul.msk.bf16.gmra.mxu2 %vm363_vm0, %v1226_v33  ;;  %v774_v32 = vld [vmem:[%s5452_s26 + $0x80] sm:$0x1]  ;;  %v1051_v58 = vrot.slane %v1050_v47, 4  ;;  %v1073_v47 = vrot.slane %v1071_v24, 4 }
  0xdc   : > { %4648 = vmatmul.msk.bf16.gmra.mxu3 %vm363_vm0, %v5295_v39  ;;  %v1227_v35 = vpack.c.b16 %v1205_v21, %v1204_v20  ;;  %v1058_v21 = vshrl.u32 %v775_v2, 16 }
  0xdd   : > { %4784 = vmatmul.msk.bf16.gmra.mxu0 %vm363_vm0, %v5315_v40 }
  0xde   : > { %v1315_v55 = vpop.f32.mrf.mxu2 }
  0xdf   : > { %v1395_v62 = vadd.f32 %v1315_v55, %v663_v44  ;;  %v1630_v63 = vpop.f32.mrf.mxu3  ;;  %v5252_v44 = vld [vmem:[%s5452_s26 + $0x6c] sm:$0xff] }
  0xe0   : > { %v664_v9 = vpop.f32.mrf.mxu1 }
  0xe1   : > { %v1710_v14 = vadd.f32 %v1630_v63, %v1395_v62  ;;  %v665_v15 = vadd.f32 %v664_v9, %v5651_v10  ;;  %v1053_v10 = vshll.u32 %v774_v32, 16 }
  0xe2   : > { %v1947_v19 = vpop.f32.mrf.mxu0 }
  0xe3   : > { %v5775_v30 = vadd.f32 %v1945_v45, %v1710_v14  ;;  %v1041_v45 = vrot.slane %v1040_v46, 4  ;;  %v1055_v62 = vrot.slane %v1053_v10, 5  ;;  %v1069_v46 = vrot.slane %v1067_v17, 5  ;;  %v777_v10 = vld [vmem:[%s5452_s26 + $0x8c] sm:$0x1]  ;;  %v5367_v17 = vld [vmem:[%s6532_s1 + $0xe0] sm:$0xff] }
  0xe4   : > { %v1077_v3 = vshll.u32 %v777_v10, 16  ;;  %3255 = vmatpush.bf16.msra.mxu3 %v5367_v17 }
  0xe6   : > { %v1317_v33 = vpop.f32.mrf.mxu2 }
  0xe7   : > { %v1396_v39 = vadd.f32 %v1317_v33, %v665_v15  ;;  %v1632_v40 = vpop.f32.mrf.mxu3  ;;  %v1056_v15 = vsel %vm5547_vm3, %v1051_v58, %v1055_v62  ;;  %v5317_v58 = vld [vmem:[%s5452_s26 + $0x2dc] sm:$0xff] }
  0xe8   : > { %v667_v48 = vpop.f32.mrf.mxu1 }
  0xe9   : > { %v1711_v55 = vadd.f32 %v1632_v40, %v1396_v39  ;;  %v668_v56 = vadd.f32 %v667_v48, %v5663_v28  ;;  %v1046_v28 = vsel %vm5547_vm3, %v1041_v45, %v1045_v27  ;;  %v1207_v39 = vunpack.c.l.b16 %v1056_v15  ;;  %v5297_v45 = vld [vmem:[%s5452_s26 + $0x210] sm:$0xff] }
  0xea   : > { %v1950_v59 = vpop.f32.mrf.mxu0  ;;  %v1060_v27 = vrot.slane %v1058_v21, 4 }
  0xeb   : > { %4473 = vmatmul.msk.bf16.gmra.mxu1 %vm363_vm0, %v5252_v44  ;;  %4513 = vmatmul.msk.bf16.gmra.mxu2 %vm363_vm0, %v1227_v35  ;;  %v5784_v63 = vadd.f32 %v1947_v19, %v1711_v55  ;;  %v1061_v19 = vshll.u32 %v775_v2, 16  ;;  %v1206_v35 = vunpack.c.l.b16 %v1046_v28  ;;  %v5253_v55 = vld [vmem:[%s5452_s26 + $0x78] sm:$0xff]  ;;  %v1074_v2 = vor.u32 %v1073_v47, %v1069_v46  ;;  %v779_v28 = vld [vmem:[%s5452_s26 + $0x94] sm:$0xf] }
  0xec   : > { %4649 = vmatmul.msk.bf16.gmra.mxu3 %vm363_vm0, %v5296_v50 }
  0xed   : > { %4785 = vmatmul.msk.bf16.gmra.mxu0 %vm363_vm0, %v5316_v54  ;;  %v1063_v44 = vrot.slane %v1061_v19, 5  ;;  %v1075_v21 = vrot.slane %v1074_v2, 4  ;;  %v1079_v19 = vrot.slane %v1077_v3, 5  ;;  %v780_v3 = vld [vmem:[%s5452_s26 + $0x98] sm:$0x1] }
  0xee   : > { %v1320_v8 = vpop.f32.mrf.mxu2 }
  0xef   : > { %v1397_v9 = vadd.f32 %v1320_v8, %v668_v56  ;;  %v1635_v14 = vpop.f32.mrf.mxu3  ;;  %v1228_v56 = vpack.c.b16 %v1207_v39, %v1206_v35  ;;  %v1064_v62 = vor.u32 %v1063_v44, %v1060_v27  ;;  %v1095_v35 = vshrl.u32 %v779_v28, 16 }
  0xf0   : > { %v669_v20 = vpop.f32.mrf.mxu1  ;;  %v1080_v10 = vsel %vm5547_vm3, %v1075_v21, %v1079_v19  ;;  %v5254_v19 = vld [vmem:[%s5452_s26 + $0x84] sm:$0xff] }
  0xf1   : > { %v1712_v29 = vadd.f32 %v1635_v14, %v1397_v9  ;;  %v670_v32 = vadd.f32 %v669_v20, %v5681_v43  ;;  %v778_v14 = vld [vmem:[%s5452_s26 + $0x90] sm:$0xf]  ;;  %v1065_v20 = vrot.slane %v1064_v62, 4  ;;  %v1209_v2 = vunpack.c.l.b16 %v1080_v10  ;;  %v782_v10 = vld [vmem:[%s5452_s26 + $0xa0] sm:$0xf] }
  0xf2   : > { %v1952_v33 = vpop.f32.mrf.mxu0 }
  0xf3   : > { %v5795_v40 = vadd.f32 %v1950_v59, %v1712_v29  ;;  %v1082_v29 = vshrl.u32 %v778_v14, 16  ;;  %v1070_v47 = vsel %vm5547_vm3, %v1065_v20, %v1069_v46  ;;  %v1097_v46 = vrot.slane %v1095_v35, 4 }
  0xf4   : > { %v1208_v62 = vunpack.c.l.b16 %v1070_v47 }
  0xf6   : > { %v1322_v48 = vpop.f32.mrf.mxu2 }
  0xf7   : > { %v1398_v50 = vadd.f32 %v1322_v48, %v670_v32  ;;  %v1637_v54 = vpop.f32.mrf.mxu3  ;;  %v1085_v32 = vshll.u32 %v778_v14, 16 }
  0xf8   : > { %v672_v43 = vpop.f32.mrf.mxu1 }
  0xf9   : > { %v1713_v59 = vadd.f32 %v1637_v54, %v1398_v50  ;;  %v673_v8 = vadd.f32 %v672_v43, %v5693_v0  ;;  %v5347_v0 = vld [vmem:[%s6532_s1 + $0xc0] sm:$0xff]  ;;  %v1084_v43 = vrot.slane %v1082_v29, 4  ;;  %v5318_v29 = vld [vmem:[%s5452_s26 + $0x2e8] sm:$0xff] }
  0xfa   : > { %v1955_v9 = vpop.f32.mrf.mxu0  ;;  %2940 = vmatpush.bf16.msra.mxu2 %v5347_v0  ;;  %v1229_v0 = vpack.c.b16 %v1209_v2, %v1208_v62 }
  0xfb   : > { %4474 = vmatmul.msk.bf16.gmra.mxu1 %vm363_vm0, %v5253_v55  ;;  %4514 = vmatmul.msk.bf16.gmra.mxu2 %vm363_vm0, %v1228_v56  ;;  %v5806_v15 = vadd.f32 %v1952_v33, %v1713_v59  ;;  %v1091_v33 = vshll.u32 %v779_v28, 16  ;;  %v5327_v55 = vld [vmem:[%s6532_s1 + $0xa0] sm:$0xff]  ;;  %v1101_v28 = vshll.u32 %v780_v3, 16 }
  0xfc   : > { %4650 = vmatmul.msk.bf16.gmra.mxu3 %vm363_vm0, %v5297_v45  ;;  %v5371_v56 = vld [vmem:[%s6532_s1 + $0x100] sm:$0xff]  ;;  %v1087_v45 = vrot.slane %v1085_v32, 5  ;;  %2625 = vmatpush.bf16.msra.mxu1 %v5327_v55 }
  0xfd   : > { %4786 = vmatmul.msk.bf16.gmra.mxu0 %vm363_vm0, %v5317_v58  ;;  %v1093_v58 = vrot.slane %v1091_v33, 5 }
  0xfe   : > { %v1325_v24 = vpop.f32.mrf.mxu2  ;;  %3937 = vmatpush.bf16.msra.mxu0 %v5371_v56 }
  0xff   : > { %v1399_v39 = vadd.f32 %v1325_v24, %v673_v8  ;;  %v1640_v27 = vpop.f32.mrf.mxu3  ;;  %v1088_v8 = vor.u32 %v1087_v45, %v1084_v43  ;;  %v1098_v14 = vor.u32 %v1097_v46, %v1093_v58  ;;  %v5298_v24 = vld [vmem:[%s5452_s26 + $0x21c] sm:$0xff]  ;;  %v1115_v46 = vshll.u32 %v782_v10, 16 }
 0x100   : > { %v674_v44 = vpop.f32.mrf.mxu1 }
 0x101   : > { %v1714_v48 = vadd.f32 %v1640_v27, %v1399_v39  ;;  %v675_v50 = vadd.f32 %v674_v44, %v5717_v23  ;;  %v1089_v39 = vrot.slane %v1088_v8, 4  ;;  %v1103_v27 = vrot.slane %v1101_v28, 5  ;;  %v781_v44 = vld [vmem:[%s5452_s26 + $0x9c] sm:$0xf] }
 0x102   : > { %v1957_v54 = vpop.f32.mrf.mxu0  ;;  %v1106_v55 = vshrl.u32 %v781_v44, 16  ;;  %v1109_v45 = vshll.u32 %v781_v44, 16  ;;  %v5299_v44 = vld [vmem:[%s5452_s26 + $0x228] sm:$0xff] }
 0x103   : > { %v5828_v23 = vadd.f32 %v1955_v9, %v1714_v48  ;;  %v1099_v9 = vrot.slane %v1098_v14, 4 }
 0x104   : > { %v1111_v28 = vrot.slane %v1109_v45, 5  ;;  %v784_v45 = vld [vmem:[%s5452_s26 + $0xa8] sm:$0xf] }
 0x106   : > { %v1327_v59 = vpop.f32.mrf.mxu2 }
 0x107   : > { %v1400_v20 = vadd.f32 %v1327_v59, %v675_v50  ;;  %v1642_v21 = vpop.f32.mrf.mxu3  ;;  %v1104_v50 = vsel %vm5547_vm3, %v1099_v9, %v1103_v27 }
 0x108   : > { %v677_v17 = vpop.f32.mrf.mxu1  ;;  %v1211_v14 = vunpack.c.l.b16 %v1104_v50 }
 0x109   : > { %v1715_v32 = vadd.f32 %v1642_v21, %v1400_v20  ;;  %v678_v33 = vadd.f32 %v677_v17, %v5735_v49  ;;  %v1094_v49 = vsel %vm5547_vm3, %v1089_v39, %v1093_v58  ;;  %v1108_v58 = vrot.slane %v1106_v55, 4 }
 0x10a   : > { %v1960_v35 = vpop.f32.mrf.mxu0  ;;  %v1210_v8 = vunpack.c.l.b16 %v1094_v49  ;;  %v1117_v20 = vrot.slane %v1115_v46, 5  ;;  %v785_v46 = vld [vmem:[%s5452_s26 + $0xac] sm:$0xf] }
 0x10b   : > { %4475 = vmatmul.msk.bf16.gmra.mxu1 %vm363_vm0, %v5254_v19  ;;  %4515 = vmatmul.msk.bf16.gmra.mxu2 %vm363_vm0, %v1229_v0  ;;  %v5837_v47 = vadd.f32 %v1957_v54, %v1715_v32  ;;  %v1119_v54 = vshrl.u32 %v782_v10, 16  ;;  %v783_v0 = vld [vmem:[%s5452_s26 + $0xa4] sm:$0x1]  ;;  %v1112_v39 = vor.u32 %v1111_v28, %v1108_v58  ;;  %v5319_v10 = vld [vmem:[%s5452_s26 + $0x2f4] sm:$0xff]  ;;  %v1133_v58 = vshll.u32 %v784_v45, 16 }
 0x10c   : > { %4651 = vmatmul.msk.bf16.gmra.mxu3 %vm363_vm0, %v5298_v24  ;;  %v1230_v24 = vpack.c.b16 %v1211_v14, %v1210_v8  ;;  %v1130_v14 = vshrl.u32 %v784_v45, 16  ;;  %v1139_v28 = vshll.u32 %v785_v46, 16 }
 0x10d   : > { %4787 = vmatmul.msk.bf16.gmra.mxu0 %vm363_vm0, %v5318_v29  ;;  %v1121_v21 = vrot.slane %v1119_v54, 4 }
 0x10e   : > { %v1330_v48 = vpop.f32.mrf.mxu2 }
 0x10f   : > { %v1401_v56 = vadd.f32 %v1330_v48, %v678_v33  ;;  %v1645_v43 = vpop.f32.mrf.mxu3  ;;  %v5255_v33 = vld [vmem:[%s5452_s26 + $0x90] sm:$0xff]  ;;  %v1122_v9 = vor.u32 %v1121_v21, %v1117_v20  ;;  %v1143_v21 = vshrl.u32 %v785_v46, 16 }
 0x110   : > { %v679_v62 = vpop.f32.mrf.mxu1 }
 0x111   : > { %v1716_v2 = vadd.f32 %v1645_v43, %v1401_v56  ;;  %v680_v3 = vadd.f32 %v679_v62, %v5753_v11  ;;  %v1125_v11 = vshll.u32 %v783_v0, 16  ;;  %v1123_v50 = vrot.slane %v1122_v9, 4 }
 0x112   : > { %v1962_v59 = vpop.f32.mrf.mxu0 }
 0x113   : > { %v5847_v19 = vadd.f32 %v1960_v35, %v1716_v2  ;;  %v1113_v35 = vrot.slane %v1112_v39, 4  ;;  %v1127_v55 = vrot.slane %v1125_v11, 5  ;;  %v1145_v39 = vrot.slane %v1143_v21, 4  ;;  %v786_v11 = vld [vmem:[%s5452_s26 + $0xb0] sm:$0x1] }
 0x114   : > { %v1149_v46 = vshll.u32 %v786_v11, 16 }
 0x115   : > { %v1128_v8 = vsel %vm5547_vm3, %v1123_v50, %v1127_v55  ;;  %v5300_v55 = vld [vmem:[%s5452_s26 + $0x234] sm:$0xff] }
 0x116   : > { %v1332_v17 = vpop.f32.mrf.mxu2 }
 0x117   : > { %v1402_v29 = vadd.f32 %v1332_v17, %v680_v3  ;;  %v1647_v32 = vpop.f32.mrf.mxu3  ;;  %v1118_v3 = vsel %vm5547_vm3, %v1113_v35, %v1117_v20  ;;  %v1135_v20 = vrot.slane %v1133_v58, 5  ;;  %v788_v58 = vld [vmem:[%s5452_s26 + $0xb8] sm:$0xf] }
 0x118   : > { %v682_v27 = vpop.f32.mrf.mxu1  ;;  %v1212_v17 = vunpack.c.l.b16 %v1118_v3 }
 0x119   : > { %v1717_v48 = vadd.f32 %v1647_v32, %v1402_v29  ;;  %v683_v43 = vadd.f32 %v682_v27, %v5629_v52  ;;  %v1132_v32 = vrot.slane %v1130_v14, 4 }
 0x11a   : > { %v1965_v49 = vpop.f32.mrf.mxu0 }
 0x11b   : > { %4476 = vmatmul.msk.bf16.gmra.mxu1 %vm363_vm0, %v5255_v33  ;;  %4516 = vmatmul.msk.bf16.gmra.mxu2 %vm363_vm0, %v1230_v24  ;;  %v5855_v56 = vadd.f32 %v1962_v59, %v1717_v48  ;;  %v1213_v24 = vunpack.c.l.b16 %v1128_v8  ;;  %v1141_v33 = vrot.slane %v1139_v28, 5  ;;  %v5256_v48 = vld [vmem:[%s5452_s26 + $0x9c] sm:$0xff]  ;;  %v1136_v45 = vor.u32 %v1135_v20, %v1132_v32 }
 0x11c   : > { %4652 = vmatmul.msk.bf16.gmra.mxu3 %vm363_vm0, %v5299_v44 }
 0x11d   : > { %4788 = vmatmul.msk.bf16.gmra.mxu0 %vm363_vm0, %v5319_v10  ;;  %v1231_v35 = vpack.c.b16 %v1213_v24, %v1212_v17  ;;  %v1137_v3 = vrot.slane %v1136_v45, 4 }
 0x11e   : > { %v1335_v54 = vpop.f32.mrf.mxu2 }
 0x11f   : > { %v1403_v62 = vadd.f32 %v1335_v54, %v683_v43  ;;  %v1650_v2 = vpop.f32.mrf.mxu3  ;;  %v5320_v43 = vld [vmem:[%s5452_s26 + $0x300] sm:$0xff] }
 0x120   : > { %v684_v59 = vpop.f32.mrf.mxu1 }
 0x121   : > { %v1718_v0 = vadd.f32 %v1650_v2, %v1403_v62  ;;  %v685_v9 = vadd.f32 %v684_v59, %v5645_v7  ;;  %v787_v7 = vld [vmem:[%s5452_s26 + $0xb4] sm:$0xf]  ;;  %v1151_v59 = vrot.slane %v1149_v46, 5 }
 0x122   : > { %v1967_v52 = vpop.f32.mrf.mxu0  ;;  %v1154_v21 = vshrl.u32 %v787_v7, 16 }
 0x123   : > { %v5866_v29 = vadd.f32 %v1965_v49, %v1718_v0  ;;  %v1146_v49 = vor.u32 %v1145_v39, %v1141_v33  ;;  %v1157_v0 = vshll.u32 %v787_v7, 16  ;;  %v1163_v39 = vshll.u32 %v788_v58, 16  ;;  %v5257_v7 = vld [vmem:[%s5452_s26 + $0xa8] sm:$0xff] }
 0x125   : > { %v1147_v8 = vrot.slane %v1146_v49, 4 }
 0x126   : > { %v1337_v27 = vpop.f32.mrf.mxu2 }
 0x127   : > { %v1404_v44 = vadd.f32 %v1337_v27, %v685_v9  ;;  %v1652_v10 = vpop.f32.mrf.mxu3  ;;  %v1152_v20 = vsel %vm5547_vm3, %v1147_v8, %v1151_v59  ;;  %v1167_v9 = vshrl.u32 %v788_v58, 16  ;;  %v5301_v59 = vld [vmem:[%s5452_s26 + $0x240] sm:$0xff] }
 0x128   : > { %v687_v50 = vpop.f32.mrf.mxu1 }
 0x129   : > { %v1719_v54 = vadd.f32 %v1652_v10, %v1404_v44  ;;  %v688_v14 = vadd.f32 %v687_v50, %v5659_v25  ;;  %v1156_v25 = vrot.slane %v1154_v21, 4  ;;  %v1159_v44 = vrot.slane %v1157_v0, 5 }
 0x12a   : > { %v1970_v62 = vpop.f32.mrf.mxu0  ;;  %v1169_v50 = vrot.slane %v1167_v9, 4 }
 0x12b   : > { %4477 = vmatmul.msk.bf16.gmra.mxu1 %vm363_vm0, %v5256_v48  ;;  %4517 = vmatmul.msk.bf16.gmra.mxu2 %vm363_vm0, %v1231_v35  ;;  %v5876_v2 = vadd.f32 %v1967_v52, %v1719_v54  ;;  %v1142_v52 = vsel %vm5547_vm3, %v1137_v3, %v1141_v33  ;;  %v1215_v48 = vunpack.c.l.b16 %v1152_v20  ;;  %v1165_v35 = vrot.slane %v1163_v39, 5  ;;  %v5152_v39 = vld [vmem:[%s5452_s26 + $0xc] sm:$0xf] }
 0x12c   : > { %4653 = vmatmul.msk.bf16.gmra.mxu3 %vm363_vm0, %v5300_v55  ;;  %v1214_v10 = vunpack.c.l.b16 %v1142_v52  ;;  %v1160_v49 = vor.u32 %v1159_v44, %v1156_v25  ;;  %v4793_v52 = vld [vmem:[%s5452_s26 + $0x19c] sm:$0xf]  ;;  %v5153_v25 = vld [vmem:[%s5452_s26 + $0x10] sm:$0xf] }
 0x12d   : > { %4789 = vmatmul.msk.bf16.gmra.mxu0 %vm363_vm0, %v5320_v43  ;;  %v789_v43 = vld [vmem:[%s5452_s26 + $0xbc] sm:$0x1]  ;;  %v1170_v58 = vor.u32 %v1169_v50, %v1165_v35  ;;  %v2115_v50 = vshll.u32 %v4793_v52, 16 }
 0x12e   : > { %v1340_v28 = vpop.f32.mrf.mxu2  ;;  %v1232_v3 = vpack.c.b16 %v1215_v48, %v1214_v10  ;;  %v1161_v0 = vrot.slane %v1160_v49, 4  ;;  %v3418_v49 = vshrl.u32 %v5152_v39, 16 }
 0x12f   : > { %v1405_v17 = vadd.f32 %v1340_v28, %v688_v14  ;;  %v1655_v24 = vpop.f32.mrf.mxu3  ;;  %v5321_v14 = vld [vmem:[%s5452_s26 + $0x30c] sm:$0xff]  ;;  %v1173_v28 = vshll.u32 %v789_v43, 16 }
 0x130   : > { %v689_v32 = vpop.f32.mrf.mxu1 }
 0x131   : > { %v1720_v11 = vadd.f32 %v1655_v24, %v1405_v17  ;;  %v690_v33 = vadd.f32 %v689_v32, %v5679_v42  ;;  %v1171_v17 = vrot.slane %v1170_v58, 4  ;;  %v1175_v24 = vrot.slane %v1173_v28, 5  ;;  %v4792_v32 = vld [vmem:[%s5452_s26 + $0x198] sm:$0xf] }
 0x132   : > { %v1972_v27 = vpop.f32.mrf.mxu0  ;;  %v2109_v48 = vshll.u32 %v4792_v32, 16  ;;  %v5908_v58 = vrot.slane %v2115_v50, 5  ;;  %v5302_v50 = vld [vmem:[%s5452_s26 + $0x24c] sm:$0xff] }
 0x133   : > { %v5886_v55 = vadd.f32 %v1970_v62, %v1720_v11  ;;  %v1166_v11 = vsel %vm5547_vm3, %v1161_v0, %v1165_v35  ;;  %v1176_v43 = vsel %vm5547_vm3, %v1171_v17, %v1175_v24 }
 0x134   : > { %v1216_v35 = vunpack.c.l.b16 %v1166_v11 }
 0x136   : > { %v1342_v45 = vpop.f32.mrf.mxu2 }
 0x137   : > { %v1406_v46 = vadd.f32 %v1342_v45, %v690_v33  ;;  %v1657_v54 = vpop.f32.mrf.mxu3  ;;  %v2119_v45 = vshrl.u32 %v4793_v52, 16  ;;  %v5154_v52 = vld [vmem:[%s5452_s26 + $0x14] sm:$0x1] }
 0x138   : > { %v692_v8 = vpop.f32.mrf.mxu1 }
 0x139   : > { %v1721_v21 = vadd.f32 %v1657_v54, %v1406_v46  ;;  %v693_v20 = vadd.f32 %v692_v8, %v5689_v61  ;;  %v3421_v46 = vshll.u32 %v5152_v39, 16  ;;  %v1217_v8 = vunpack.c.l.b16 %v1176_v43  ;;  %v5322_v43 = vld [vmem:[%s5452_s26 + $0x318] sm:$0xff] }
 0x13a   : > { %v1975_v62 = vpop.f32.mrf.mxu0  ;;  %v2121_v28 = vrot.slane %v2119_v45, 4 }
 0x13b   : > { %4478 = vmatmul.msk.bf16.gmra.mxu1 %vm363_vm0, %v5257_v7  ;;  %4518 = vmatmul.msk.bf16.gmra.mxu2 %vm363_vm0, %v1232_v3  ;;  %v5895_v42 = vadd.f32 %v1972_v27, %v1721_v21  ;;  %v2106_v27 = vshrl.u32 %v4792_v32, 16  ;;  %v3427_v7 = vshll.u32 %v5153_v25, 16  ;;  %v3431_v3 = vshrl.u32 %v5153_v25, 16  ;;  %v4794_v32 = vld [vmem:[%s5452_s26 + $0x1a0] sm:$0x1] }
 0x13c   : > { %4654 = vmatmul.msk.bf16.gmra.mxu3 %vm363_vm0, %v5301_v59  ;;  %v3420_v21 = vrot.slane %v3418_v49, 4  ;;  %v3423_v0 = vrot.slane %v3421_v46, 5  ;;  %v2125_v45 = vshll.u32 %v4794_v32, 16 }
 0x13d   : > { %4790 = vmatmul.msk.bf16.gmra.mxu0 %vm363_vm0, %v5321_v14  ;;  %v2108_v59 = vrot.slane %v2106_v27, 4  ;;  %v2111_v14 = vrot.slane %v2109_v48, 5  ;;  %v3433_v39 = vrot.slane %v3431_v3, 4 }
 0x13e   : > { %v1345_v9 = vpop.f32.mrf.mxu2 }
 0x13f   : > { %v1407_v44 = vadd.f32 %v1345_v9, %v693_v20  ;;  %v1660_v10 = vpop.f32.mrf.mxu3  ;;  %v3429_v20 = vrot.slane %v3427_v7, 5  ;;  %v2112_v27 = vor.u32 %v2111_v14, %v2108_v59  ;;  %v4795_v7 = vld [vmem:[%s5452_s26 + $0x1a4] sm:$0xf] }
 0x140   : > { %v694_v33 = vpop.f32.mrf.mxu1 }
 0x141   : > { %v1722_v61 = vadd.f32 %v1660_v10, %v1407_v44  ;;  %v695_v24 = vadd.f32 %v694_v33, %v5715_v16  ;;  %v5258_v44 = vld [vmem:[%s5452_s26 + $0xb4] sm:$0xff]  ;;  %v1233_v10 = vpack.c.b16 %v1217_v8, %v1216_v35  ;;  %v3424_v16 = vor.u32 %v3423_v0, %v3420_v21  ;;  %v4796_v35 = vld [vmem:[%s5452_s26 + $0x1a8] sm:$0xf] }
 0x142   : > { %v1977_v54 = vpop.f32.mrf.mxu0  ;;  %v3437_v33 = vshll.u32 %v5154_v52, 16  ;;  %v2113_v3 = vrot.slane %v2112_v27, 4  ;;  %v5155_v8 = vld [vmem:[%s5452_s26 + $0x18] sm:$0xf]  ;;  %v2130_v52 = vshrl.u32 %v4795_v7, 16 }
 0x143   : > { %v5910_v17 = vadd.f32 %v1975_v62, %v1722_v61  ;;  %v2122_v62 = vor.u32 %v2121_v28, %v5908_v58  ;;  %v3434_v61 = vor.u32 %v3433_v39, %v3429_v20  ;;  %v2127_v28 = vrot.slane %v2125_v45, 5 }
 0x144   : > { %v3425_v21 = vrot.slane %v3424_v16, 4  ;;  %v3439_v0 = vrot.slane %v3437_v33, 5  ;;  %v2133_v39 = vshll.u32 %v4795_v7, 16  ;;  %v2132_v7 = vrot.slane %v2130_v52, 4 }
 0x145   : > { %6537 = vst [vmem:[#allocation2_spill] sm:$0xff] %v5910_v17  ;;  %v2123_v14 = vrot.slane %v2122_v62, 4  ;;  %v3435_v32 = vrot.slane %v3434_v61, 4 }
 0x146   : > { %v1347_v9 = vpop.f32.mrf.mxu2 }
 0x147   : > { %v1408_v11 = vadd.f32 %v1347_v9, %v695_v24  ;;  %v1662_v25 = vpop.f32.mrf.mxu3  ;;  %v5156_v9 = vld [vmem:[%s5452_s26 + $0x1c] sm:$0xf]  ;;  %v2128_v62 = vsel %vm5547_vm3, %v2123_v14, %v2127_v28  ;;  %v3440_v61 = vsel %vm5547_vm3, %v3435_v32, %v3439_v0  ;;  %v5157_v32 = vld [vmem:[%s5452_s26 + $0x20] sm:$0x1] }
 0x148   : > { %v697_v48 = vpop.f32.mrf.mxu1  ;;  %v3455_v45 = vshrl.u32 %v5156_v9, 16  ;;  %v2499_v28 = vunpack.c.l.b16 %v2128_v62 }
 0x149   : > { %v1723_v49 = vadd.f32 %v1662_v25, %v1408_v11  ;;  %v698_v24 = vadd.f32 %v697_v48, %v5731_v41  ;;  %v2139_v25 = vshll.u32 %v4796_v35, 16  ;;  %v3430_v41 = vsel %vm5547_vm3, %v3425_v21, %v3429_v20  ;;  %v4797_v20 = vld [vmem:[%s5452_s26 + $0x1ac] sm:$0x1] }
 0x14a   : > { %v1980_v46 = vpop.f32.mrf.mxu0  ;;  %v3451_v48 = vshll.u32 %v5156_v9, 16  ;;  %v3811_v21 = vunpack.c.l.b16 %v3440_v61  ;;  %v5351_v61 = vld [vmem:[%s5452_s26 + $0xd8] sm:$0xff] }
 0x14b   : > { %4479 = vmatmul.msk.bf16.gmra.mxu1 %vm363_vm0, %v5258_v44  ;;  %4519 = vmatmul.msk.bf16.gmra.mxu2 %vm363_vm0, %v1233_v10  ;;  %v5924_v59 = vadd.f32 %v1977_v54, %v1723_v49  ;;  %v2143_v44 = vshrl.u32 %v4796_v35, 16  ;;  %v3442_v10 = vshrl.u32 %v5155_v8, 16  ;;  %v3445_v54 = vshll.u32 %v5155_v8, 16 }
 0x14c   : > { %4655 = vmatmul.msk.bf16.gmra.mxu3 %vm363_vm0, %v5302_v50  ;;  %v2118_v50 = vsel %vm5547_vm3, %v2113_v3, %v5908_v58  ;;  %v2135_v35 = vrot.slane %v2133_v39, 5  ;;  %v5939_v8 = vrot.slane %v2139_v25, 5  ;;  %v3453_v9 = vrot.slane %v3451_v48, 5 }
 0x14d   : > { %6538 = vst [vmem:[#allocation3_spill] sm:$0xff] %v5924_v59  ;;  %4791 = vmatmul.msk.bf16.gmra.mxu0 %vm363_vm0, %v5322_v43  ;;  %v2145_v58 = vrot.slane %v2143_v44, 4  ;;  %v3444_v3 = vrot.slane %v3442_v10, 4  ;;  %v2498_v14 = vunpack.c.l.b16 %v2118_v50  ;;  %v2149_v44 = vshll.u32 %v4797_v20, 16  ;;  %v5158_v20 = vld [vmem:[%s5452_s26 + $0x24] sm:$0xf] }
 0x14e   : > { %v1350_v11 = vpop.f32.mrf.mxu2  ;;  %v2136_v39 = vor.u32 %v2135_v35, %v2132_v7 }
 0x14f   : > { %v1409_v27 = vadd.f32 %v1350_v11, %v698_v24  ;;  %v1665_v49 = vpop.f32.mrf.mxu3  ;;  %v3447_v24 = vrot.slane %v3445_v54, 5  ;;  %v3810_v11 = vunpack.c.l.b16 %v3430_v41  ;;  %v2146_v25 = vor.u32 %v2145_v58, %v5939_v8  ;;  %v5331_v41 = vld [vmem:[%s5452_s26 + $0xc] sm:$0xff] }
 0x150   : > { %v699_v43 = vpop.f32.mrf.mxu1  ;;  %v2530_v62 = vpack.c.b16 %v2499_v28, %v2498_v14  ;;  %v2151_v7 = vrot.slane %v2149_v44, 5  ;;  %v4798_v14 = vld [vmem:[%s5452_s26 + $0x1b0] sm:$0xf]  ;;  %v4799_v28 = vld [vmem:[%s5452_s26 + $0x1b4] sm:$0xf] }
 0x151   : > { %v1724_v16 = vadd.f32 %v1665_v49, %v1409_v27  ;;  %v3457_v27 = vrot.slane %v3455_v45, 4  ;;  %v700_v0 = vadd.f32 %v699_v43, %v5747_v5  ;;  %v3448_v10 = vor.u32 %v3447_v24, %v3444_v3 }
 0x152   : > { %v1982_v33 = vpop.f32.mrf.mxu0  ;;  %v3842_v17 = vpack.c.b16 %v3811_v21, %v3810_v11  ;;  %v2137_v43 = vrot.slane %v2136_v39, 4  ;;  %v2154_v39 = vshrl.u32 %v4798_v14, 16  ;;  %v2163_v44 = vshll.u32 %v4799_v28, 16 }
 0x153   : > { %v5942_v49 = vadd.f32 %v1980_v46, %v1724_v16  ;;  %v3458_v48 = vor.u32 %v3457_v27, %v3453_v9  ;;  %v3461_v46 = vshll.u32 %v5157_v32, 16  ;;  %v2147_v16 = vrot.slane %v2146_v25, 4  ;;  %v5159_v32 = vld [vmem:[%s5452_s26 + $0x28] sm:$0xf] }
 0x154   : > { %v3449_v35 = vrot.slane %v3448_v10, 4  ;;  %v2142_v27 = vsel %vm5547_vm3, %v2137_v43, %v5939_v8  ;;  %v2157_v25 = vshll.u32 %v4798_v14, 16  ;;  %v2156_v43 = vrot.slane %v2154_v39, 4 }
 0x155   : > { %v3459_v3 = vrot.slane %v3458_v48, 4  ;;  %v3463_v24 = vrot.slane %v3461_v46, 5 }
 0x156   : > { %v1352_v52 = vpop.f32.mrf.mxu2 }
 0x157   : > { %v1410_v54 = vadd.f32 %v1352_v52, %v700_v0  ;;  %v1667_v50 = vpop.f32.mrf.mxu3  ;;  %v3454_v0 = vsel %vm5547_vm3, %v3449_v35, %v3453_v9  ;;  %v2500_v9 = vunpack.c.l.b16 %v2142_v27 }
 0x158   : > { %v702_v59 = vpop.f32.mrf.mxu1  ;;  %v3812_v46 = vunpack.c.l.b16 %v3454_v0 }
 0x159   : > { %v1725_v45 = vadd.f32 %v1667_v50, %v1410_v54  ;;  %v703_v11 = vadd.f32 %v702_v59, %v5641_v1  ;;  %v3464_v1 = vsel %vm5547_vm3, %v3459_v3, %v3463_v24  ;;  %v2167_v59 = vshrl.u32 %v4799_v28, 16 }
 0x15a   : > { %v1985_v5 = vpop.f32.mrf.mxu0  ;;  %v3466_v54 = vshrl.u32 %v5158_v20, 16  ;;  %v3469_v50 = vshll.u32 %v5158_v20, 16  ;;  %v5160_v20 = vld [vmem:[%s5452_s26 + $0x2c] sm:$0x1] }
 0x15b   : > { %4864 = vmatmul.msk.bf16.vlgmr.msra.gmra.mxu1 %vm363_vm0, %v2530_v62  ;;  %5000 = vmatmul.msk.bf16.vlgmr.msra.gmra.mxu2 %vm363_vm0, %v5331_v41  ;;  %v5951_v58 = vadd.f32 %v1982_v33, %v1725_v45  ;;  %v2152_v33 = vsel %vm5547_vm3, %v2147_v16, %v2151_v7  ;;  %v3475_v41 = vshll.u32 %v5159_v32, 16  ;;  %v3813_v45 = vunpack.c.l.b16 %v3464_v1  ;;  %v5352_v1 = vld [vmem:[%s5452_s26 + $0xe4] sm:$0xff] }
 0x15c   : > { %5136 = vmatmul.msk.bf16.vlgmr.msra.gmra.mxu3 %vm363_vm0, %v5351_v61  ;;  %v3479_v61 = vshrl.u32 %v5159_v32, 16  ;;  %v2501_v48 = vunpack.c.l.b16 %v2152_v33  ;;  %v2159_v16 = vrot.slane %v2157_v25, 5  ;;  %v5969_v7 = vrot.slane %v2163_v44, 5 }
 0x15d   : > { %5224 = vmatmul.msk.bf16.vlgmr.msra.gmra.mxu0 %vm363_vm0, %v3842_v17  ;;  %v2169_v35 = vrot.slane %v2167_v59, 4  ;;  %v3468_v3 = vrot.slane %v3466_v54, 4  ;;  %v3471_v24 = vrot.slane %v3469_v50, 5  ;;  %v3843_v39 = vpack.c.b16 %v3813_v45, %v3812_v46 }
 0x15e   : > { %v1355_v21 = vpop.f32.mrf.mxu2  ;;  %v3481_v27 = vrot.slane %v3479_v61, 4  ;;  %v2160_v25 = vor.u32 %v2159_v16, %v2156_v43 }
 0x15f   : > { %v1411_v17 = vadd.f32 %v1355_v21, %v703_v11  ;;  %v1670_v52 = vpop.f32.mrf.mxu3  ;;  %v4800_v11 = vld [vmem:[%s5452_s26 + $0x1b8] sm:$0x1]  ;;  %v3477_v21 = vrot.slane %v3475_v41, 5  ;;  %v4801_v41 = vld [vmem:[%s5452_s26 + $0x1bc] sm:$0xf] }
 0x160   : > { %v704_v10 = vpop.f32.mrf.mxu1  ;;  %v2173_v59 = vshll.u32 %v4800_v11, 16  ;;  %v2161_v61 = vrot.slane %v2160_v25, 4  ;;  %v2181_v11 = vshll.u32 %v4801_v41, 16 }
 0x161   : > { %v1726_v8 = vadd.f32 %v1670_v52, %v1411_v17  ;;  %v705_v28 = vadd.f32 %v704_v10, %v5654_v18  ;;  %v2531_v17 = vpack.c.b16 %v2501_v48, %v2500_v9  ;;  %v5332_v52 = vld [vmem:[%s5452_s26 + $0x18] sm:$0xff]  ;;  %v3472_v18 = vor.u32 %v3471_v24, %v3468_v3  ;;  %v4802_v9 = vld [vmem:[%s5452_s26 + $0x1c0] sm:$0xf]  ;;  %v5161_v48 = vld [vmem:[%s5452_s26 + $0x30] sm:$0xf] }
 0x162   : > { %v1987_v62 = vpop.f32.mrf.mxu0  ;;  %v3485_v10 = vshll.u32 %v5160_v20, 16  ;;  %v2175_v43 = vrot.slane %v2173_v59, 5  ;;  %v5162_v20 = vld [vmem:[%s5452_s26 + $0x34] sm:$0xf] }
 0x163   : > { %v5971_v14 = vadd.f32 %v1985_v5, %v1726_v8  ;;  %v2170_v5 = vor.u32 %v2169_v35, %v5969_v7  ;;  %v3482_v8 = vor.u32 %v3481_v27, %v3477_v21  ;;  %v3473_v16 = vrot.slane %v3472_v18, 4 }
 0x164   : > { %v3487_v35 = vrot.slane %v3485_v10, 5 }
 0x165   : > { %v2171_v45 = vrot.slane %v2170_v5, 4  ;;  %v3483_v24 = vrot.slane %v3482_v8, 4  ;;  %v3503_v5 = vshrl.u32 %v5162_v20, 16  ;;  %v2183_v8 = vrot.slane %v2181_v11, 5 }
 0x166   : > { %v1357_v33 = vpop.f32.mrf.mxu2 }
 0x167   : > { %v1412_v0 = vadd.f32 %v1357_v33, %v705_v28  ;;  %v1672_v32 = vpop.f32.mrf.mxu3  ;;  %v2178_v28 = vshrl.u32 %v4801_v41, 16  ;;  %v2187_v33 = vshll.u32 %v4802_v9, 16  ;;  %v3488_v10 = vsel %vm5547_vm3, %v3483_v24, %v3487_v35  ;;  %v5163_v24 = vld [vmem:[%s5452_s26 + $0x38] sm:$0x1] }
 0x168   : > { %v707_v44 = vpop.f32.mrf.mxu1 }
 0x169   : > { %v1727_v54 = vadd.f32 %v1672_v32, %v1412_v0  ;;  %v708_v3 = vadd.f32 %v707_v44, %v5671_v34  ;;  %v2191_v0 = vshrl.u32 %v4802_v9, 16  ;;  %v3490_v32 = vshrl.u32 %v5161_v48, 16 }
 0x16a   : > { %v1990_v50 = vpop.f32.mrf.mxu0  ;;  %v3478_v34 = vsel %vm5547_vm3, %v3473_v16, %v3477_v21  ;;  %v3499_v44 = vshll.u32 %v5162_v20, 16  ;;  %v5999_v41 = vrot.slane %v2187_v33, 5  ;;  %v4803_v21 = vld [vmem:[%s5452_s26 + $0x1c4] sm:$0x1]  ;;  %v3815_v16 = vunpack.c.l.b16 %v3488_v10 }
 0x16b   : > { %4865 = vmatmul.msk.bf16.gmra.mxu1 %vm363_vm0, %v2531_v17  ;;  %5001 = vmatmul.msk.bf16.gmra.mxu2 %vm363_vm0, %v5332_v52  ;;  %v5984_v46 = vadd.f32 %v1987_v62, %v1727_v54  ;;  %v3493_v62 = vshll.u32 %v5161_v48, 16  ;;  %v2180_v54 = vrot.slane %v2178_v28, 4  ;;  %v3505_v20 = vrot.slane %v3503_v5, 4 }
 0x16c   : > { %5137 = vmatmul.msk.bf16.gmra.mxu3 %vm363_vm0, %v5352_v1  ;;  %v2176_v1 = vsel %vm5547_vm3, %v2171_v45, %v2175_v43  ;;  %v3814_v43 = vunpack.c.l.b16 %v3478_v34  ;;  %v5353_v34 = vld [vmem:[%s5452_s26 + $0xf0] sm:$0xff] }
 0x16d   : > { %5225 = vmatmul.msk.bf16.gmra.mxu0 %vm363_vm0, %v3843_v39  ;;  %v2166_v39 = vsel %vm5547_vm3, %v2161_v61, %v5969_v7  ;;  %v2193_v7 = vrot.slane %v2191_v0, 4  ;;  %v3492_v61 = vrot.slane %v3490_v32, 4  ;;  %v3495_v9 = vrot.slane %v3493_v62, 5 }
 0x16e   : > { %v1360_v27 = vpop.f32.mrf.mxu2  ;;  %v2502_v48 = vunpack.c.l.b16 %v2166_v39  ;;  %v2503_v45 = vunpack.c.l.b16 %v2176_v1  ;;  %v2184_v11 = vor.u32 %v2183_v8, %v2180_v54  ;;  %v2197_v0 = vshll.u32 %v4803_v21, 16  ;;  %v5333_v39 = vld [vmem:[%s5452_s26 + $0x24] sm:$0xff]  ;;  %v5164_v21 = vld [vmem:[%s5452_s26 + $0x3c] sm:$0xf] }
 0x16f   : > { %v1413_v17 = vadd.f32 %v1360_v27, %v708_v3  ;;  %v1675_v52 = vpop.f32.mrf.mxu3  ;;  %v3501_v3 = vrot.slane %v3499_v44, 5  ;;  %v2194_v33 = vor.u32 %v2193_v7, %v5999_v41  ;;  %v3496_v32 = vor.u32 %v3495_v9, %v3492_v61 }
 0x170   : > { %v709_v25 = vpop.f32.mrf.mxu1  ;;  %v3844_v10 = vpack.c.b16 %v3815_v16, %v3814_v43  ;;  %v2199_v54 = vrot.slane %v2197_v0, 5 }
 0x171   : > { %v1728_v59 = vadd.f32 %v1675_v52, %v1413_v17  ;;  %v710_v35 = vadd.f32 %v709_v25, %v5684_v51  ;;  %v2532_v52 = vpack.c.b16 %v2503_v45, %v2502_v48  ;;  %v3506_v44 = vor.u32 %v3505_v20, %v3501_v3  ;;  %v4804_v48 = vld [vmem:[%s5452_s26 + $0x1c8] sm:$0xf]  ;;  %v4805_v45 = vld [vmem:[%s5452_s26 + $0x1cc] sm:$0xf] }
 0x172   : > { %v1992_v18 = vpop.f32.mrf.mxu0  ;;  %v2185_v25 = vrot.slane %v2184_v11, 4  ;;  %v3497_v8 = vrot.slane %v3496_v32, 4  ;;  %v2205_v0 = vshll.u32 %v4804_v48, 16  ;;  %v2211_v32 = vshll.u32 %v4805_v45, 16 }
 0x173   : > { %v6002_v27 = vadd.f32 %v1990_v50, %v1728_v59  ;;  %v3509_v50 = vshll.u32 %v5163_v24, 16  ;;  %v2195_v59 = vrot.slane %v2194_v33, 4  ;;  %v3507_v61 = vrot.slane %v3506_v44, 4  ;;  %v5165_v24 = vld [vmem:[%s5452_s26 + $0x40] sm:$0xf] }
 0x174   : > { %v2190_v20 = vsel %vm5547_vm3, %v2185_v25, %v5999_v41  ;;  %v2202_v33 = vshrl.u32 %v4804_v48, 16 }
 0x175   : > { %v3511_v9 = vrot.slane %v3509_v50, 5 }
 0x176   : > { %v1362_v28 = vpop.f32.mrf.mxu2  ;;  %v2204_v25 = vrot.slane %v2202_v33, 4 }
 0x177   : > { %v1414_v62 = vadd.f32 %v1362_v28, %v710_v35  ;;  %v1677_v17 = vpop.f32.mrf.mxu3  ;;  %v3502_v35 = vsel %vm5547_vm3, %v3497_v8, %v3501_v3  ;;  %v2504_v3 = vunpack.c.l.b16 %v2190_v20 }
 0x178   : > { %v712_v1 = vpop.f32.mrf.mxu1  ;;  %v3816_v50 = vunpack.c.l.b16 %v3502_v35 }
 0x179   : > { %v1729_v5 = vadd.f32 %v1677_v17, %v1414_v62  ;;  %v713_v43 = vadd.f32 %v712_v1, %v5707_v12  ;;  %v3512_v12 = vsel %vm5547_vm3, %v3507_v61, %v3511_v9  ;;  %v2215_v17 = vshrl.u32 %v4805_v45, 16 }
 0x17a   : > { %v1995_v51 = vpop.f32.mrf.mxu0 }
 0x17b   : > { %4866 = vmatmul.msk.bf16.gmra.mxu1 %vm363_vm0, %v2532_v52  ;;  %5002 = vmatmul.msk.bf16.gmra.mxu2 %vm363_vm0, %v5333_v39  ;;  %v6011_v7 = vadd.f32 %v1992_v18, %v1729_v5  ;;  %v2200_v18 = vsel %vm5547_vm3, %v2195_v59, %v2199_v54  ;;  %v3514_v52 = vshrl.u32 %v5164_v21, 16  ;;  %v3517_v39 = vshll.u32 %v5164_v21, 16  ;;  %v5166_v21 = vld [vmem:[%s5452_s26 + $0x44] sm:$0x1] }
 0x17c   : > { %5138 = vmatmul.msk.bf16.gmra.mxu3 %vm363_vm0, %v5353_v34  ;;  %v3523_v34 = vshll.u32 %v5165_v24, 16  ;;  %v2505_v44 = vunpack.c.l.b16 %v2200_v18  ;;  %v3817_v5 = vunpack.c.l.b16 %v3512_v12  ;;  %v2207_v59 = vrot.slane %v2205_v0, 5  ;;  %v5354_v12 = vld [vmem:[%s5452_s26 + $0xfc] sm:$0xff] }
 0x17d   : > { %5226 = vmatmul.msk.bf16.gmra.mxu0 %vm363_vm0, %v3844_v10  ;;  %v3527_v10 = vshrl.u32 %v5165_v24, 16  ;;  %v6029_v54 = vrot.slane %v2211_v32, 5  ;;  %v2217_v8 = vrot.slane %v2215_v17, 4  ;;  %v3516_v61 = vrot.slane %v3514_v52, 4 }
 0x17e   : > { %v1365_v16 = vpop.f32.mrf.mxu2  ;;  %v3519_v9 = vrot.slane %v3517_v39, 5  ;;  %v3845_v33 = vpack.c.b16 %v3817_v5, %v3816_v50  ;;  %v2208_v0 = vor.u32 %v2207_v59, %v2204_v25 }
 0x17f   : > { %v1415_v28 = vadd.f32 %v1365_v16, %v713_v43  ;;  %v1680_v11 = vpop.f32.mrf.mxu3  ;;  %v4806_v43 = vld [vmem:[%s5452_s26 + $0x1d0] sm:$0x1]  ;;  %v3525_v16 = vrot.slane %v3523_v34, 5  ;;  %v3529_v20 = vrot.slane %v3527_v10, 4  ;;  %v4807_v34 = vld [vmem:[%s5452_s26 + $0x1d4] sm:$0xf] }
 0x180   : > { %v714_v62 = vpop.f32.mrf.mxu1  ;;  %v2221_v17 = vshll.u32 %v4806_v43, 16  ;;  %v2209_v10 = vrot.slane %v2208_v0, 4  ;;  %v2229_v43 = vshll.u32 %v4807_v34, 16 }
 0x181   : > { %v1730_v41 = vadd.f32 %v1680_v11, %v1415_v28  ;;  %v715_v45 = vadd.f32 %v714_v62, %v5726_v36  ;;  %v2533_v28 = vpack.c.b16 %v2505_v44, %v2504_v3  ;;  %v5334_v11 = vld [vmem:[%s5452_s26 + $0x30] sm:$0xff]  ;;  %v3520_v36 = vor.u32 %v3519_v9, %v3516_v61  ;;  %v4808_v3 = vld [vmem:[%s5452_s26 + $0x1d8] sm:$0xf]  ;;  %v5167_v44 = vld [vmem:[%s5452_s26 + $0x48] sm:$0xf] }
 0x182   : > { %v1997_v1 = vpop.f32.mrf.mxu0  ;;  %v3533_v62 = vshll.u32 %v5166_v21, 16  ;;  %v2223_v25 = vrot.slane %v2221_v17, 5  ;;  %v5168_v21 = vld [vmem:[%s5452_s26 + $0x4c] sm:$0xf] }
 0x183   : > { %v6031_v48 = vadd.f32 %v1995_v51, %v1730_v41  ;;  %v2218_v51 = vor.u32 %v2217_v8, %v6029_v54  ;;  %v3530_v41 = vor.u32 %v3529_v20, %v3525_v16  ;;  %v3521_v59 = vrot.slane %v3520_v36, 4 }
 0x184   : > { %v3535_v8 = vrot.slane %v3533_v62, 5 }
 0x185   : > { %v2219_v5 = vrot.slane %v2218_v51, 4  ;;  %v3531_v9 = vrot.slane %v3530_v41, 4  ;;  %v3551_v51 = vshrl.u32 %v5168_v21, 16  ;;  %v2231_v41 = vrot.slane %v2229_v43, 5 }
 0x186   : > { %v1367_v18 = vpop.f32.mrf.mxu2 }
 0x187   : > { %v1416_v35 = vadd.f32 %v1367_v18, %v715_v45  ;;  %v1682_v24 = vpop.f32.mrf.mxu3  ;;  %v2226_v45 = vshrl.u32 %v4807_v34, 16  ;;  %v2235_v18 = vshll.u32 %v4808_v3, 16  ;;  %v3536_v62 = vsel %vm5547_vm3, %v3531_v9, %v3535_v8  ;;  %v5169_v9 = vld [vmem:[%s5452_s26 + $0x50] sm:$0x1] }
 0x188   : > { %v717_v32 = vpop.f32.mrf.mxu1 }
 0x189   : > { %v1731_v52 = vadd.f32 %v1682_v24, %v1416_v35  ;;  %v718_v61 = vadd.f32 %v717_v32, %v5743_v60  ;;  %v2239_v35 = vshrl.u32 %v4808_v3, 16  ;;  %v3538_v24 = vshrl.u32 %v5167_v44, 16 }
 0x18a   : > { %v2000_v39 = vpop.f32.mrf.mxu0  ;;  %v3526_v60 = vsel %vm5547_vm3, %v3521_v59, %v3525_v16  ;;  %v3547_v32 = vshll.u32 %v5168_v21, 16  ;;  %v6059_v34 = vrot.slane %v2235_v18, 5  ;;  %v4809_v16 = vld [vmem:[%s5452_s26 + $0x1dc] sm:$0x1]  ;;  %v3819_v59 = vunpack.c.l.b16 %v3536_v62 }
 0x18b   : > { %4867 = vmatmul.msk.bf16.gmra.mxu1 %vm363_vm0, %v2533_v28  ;;  %5003 = vmatmul.msk.bf16.gmra.mxu2 %vm363_vm0, %v5334_v11  ;;  %v6044_v50 = vadd.f32 %v1997_v1, %v1731_v52  ;;  %v3541_v1 = vshll.u32 %v5167_v44, 16  ;;  %v2228_v52 = vrot.slane %v2226_v45, 4  ;;  %v3553_v21 = vrot.slane %v3551_v51, 4 }
 0x18c   : > { %5139 = vmatmul.msk.bf16.gmra.mxu3 %vm363_vm0, %v5354_v12  ;;  %v2224_v12 = vsel %vm5547_vm3, %v2219_v5, %v2223_v25  ;;  %v3818_v25 = vunpack.c.l.b16 %v3526_v60  ;;  %v5355_v60 = vld [vmem:[%s5452_s26 + $0x108] sm:$0xff] }
 0x18d   : > { %5227 = vmatmul.msk.bf16.gmra.mxu0 %vm363_vm0, %v3845_v33  ;;  %v2214_v33 = vsel %vm5547_vm3, %v2209_v10, %v6029_v54  ;;  %v2241_v54 = vrot.slane %v2239_v35, 4  ;;  %v3540_v10 = vrot.slane %v3538_v24, 4  ;;  %v3543_v3 = vrot.slane %v3541_v1, 5 }
 0x18e   : > { %v1370_v20 = vpop.f32.mrf.mxu2  ;;  %v2506_v44 = vunpack.c.l.b16 %v2214_v33  ;;  %v2507_v5 = vunpack.c.l.b16 %v2224_v12  ;;  %v2232_v43 = vor.u32 %v2231_v41, %v2228_v52  ;;  %v2245_v35 = vshll.u32 %v4809_v16, 16  ;;  %v5335_v33 = vld [vmem:[%s5452_s26 + $0x3c] sm:$0xff]  ;;  %v5170_v16 = vld [vmem:[%s5452_s26 + $0x54] sm:$0xf] }
 0x18f   : > { %v1417_v28 = vadd.f32 %v1370_v20, %v718_v61  ;;  %v1685_v11 = vpop.f32.mrf.mxu3  ;;  %v3549_v61 = vrot.slane %v3547_v32, 5  ;;  %v2242_v18 = vor.u32 %v2241_v54, %v6059_v34  ;;  %v3544_v24 = vor.u32 %v3543_v3, %v3540_v10 }
 0x190   : > { %v719_v0 = vpop.f32.mrf.mxu1  ;;  %v3846_v62 = vpack.c.b16 %v3819_v59, %v3818_v25  ;;  %v2247_v52 = vrot.slane %v2245_v35, 5 }
 0x191   : > { %v1732_v17 = vadd.f32 %v1685_v11, %v1417_v28  ;;  %v720_v8 = vadd.f32 %v719_v0, %v5756_v26  ;;  %v2534_v11 = vpack.c.b16 %v2507_v5, %v2506_v44  ;;  %v3554_v32 = vor.u32 %v3553_v21, %v3549_v61  ;;  %v4810_v44 = vld [vmem:[%s5452_s26 + $0x1e0] sm:$0xf]  ;;  %v4811_v5 = vld [vmem:[%s5452_s26 + $0x1e4] sm:$0xf] }
 0x192   : > { %v2002_v36 = vpop.f32.mrf.mxu0  ;;  %v2233_v0 = vrot.slane %v2232_v43, 4  ;;  %v3545_v41 = vrot.slane %v3544_v24, 4  ;;  %v2253_v35 = vshll.u32 %v4810_v44, 16  ;;  %v2259_v24 = vshll.u32 %v4811_v5, 16 }
 0x193   : > { %v6062_v20 = vadd.f32 %v2000_v39, %v1732_v17  ;;  %v3557_v39 = vshll.u32 %v5169_v9, 16  ;;  %v2243_v17 = vrot.slane %v2242_v18, 4  ;;  %v3555_v10 = vrot.slane %v3554_v32, 4  ;;  %v5171_v9 = vld [vmem:[%s5452_s26 + $0x58] sm:$0xf] }
 0x194   : > { %v2238_v21 = vsel %vm5547_vm3, %v2233_v0, %v6059_v34  ;;  %v2250_v18 = vshrl.u32 %v4810_v44, 16 }
 0x195   : > { %v3559_v3 = vrot.slane %v3557_v39, 5 }
 0x196   : > { %v1372_v45 = vpop.f32.mrf.mxu2  ;;  %v2252_v0 = vrot.slane %v2250_v18, 4 }
 0x197   : > { %v1418_v1 = vadd.f32 %v1372_v45, %v720_v8  ;;  %v1687_v28 = vpop.f32.mrf.mxu3  ;;  %v3550_v8 = vsel %vm5547_vm3, %v3545_v41, %v3549_v61  ;;  %v2508_v61 = vunpack.c.l.b16 %v2238_v21 }
 0x198   : > { %v722_v12 = vpop.f32.mrf.mxu1  ;;  %v3820_v39 = vunpack.c.l.b16 %v3550_v8 }
 0x199   : > { %v1733_v51 = vadd.f32 %v1687_v28, %v1418_v1  ;;  %v723_v25 = vadd.f32 %v722_v12, %v5643_v6  ;;  %v3560_v6 = vsel %vm5547_vm3, %v3555_v10, %v3559_v3  ;;  %v2263_v28 = vshrl.u32 %v4811_v5, 16 }
 0x19a   : > { %v2005_v26 = vpop.f32.mrf.mxu0 }
 0x19b   : > { %4868 = vmatmul.msk.bf16.gmra.mxu1 %vm363_vm0, %v2534_v11  ;;  %5004 = vmatmul.msk.bf16.gmra.mxu2 %vm363_vm0, %v5335_v33  ;;  %v6071_v54 = vadd.f32 %v2002_v36, %v1733_v51  ;;  %v2248_v36 = vsel %vm5547_vm3, %v2243_v17, %v2247_v52  ;;  %v3562_v11 = vshrl.u32 %v5170_v16, 16  ;;  %v3565_v33 = vshll.u32 %v5170_v16, 16  ;;  %v5172_v16 = vld [vmem:[%s5452_s26 + $0x5c] sm:$0x1] }
 0x19c   : > { %5140 = vmatmul.msk.bf16.gmra.mxu3 %vm363_vm0, %v5355_v60  ;;  %v3571_v60 = vshll.u32 %v5171_v9, 16  ;;  %v2509_v32 = vunpack.c.l.b16 %v2248_v36  ;;  %v3821_v51 = vunpack.c.l.b16 %v3560_v6  ;;  %v2255_v17 = vrot.slane %v2253_v35, 5  ;;  %v5356_v6 = vld [vmem:[%s5452_s26 + $0x114] sm:$0xff] }
 0x19d   : > { %5228 = vmatmul.msk.bf16.gmra.mxu0 %vm363_vm0, %v3846_v62  ;;  %v3575_v62 = vshrl.u32 %v5171_v9, 16  ;;  %v6089_v52 = vrot.slane %v2259_v24, 5  ;;  %v2265_v41 = vrot.slane %v2263_v28, 4  ;;  %v3564_v10 = vrot.slane %v3562_v11, 4 }
 0x19e   : > { %v1375_v59 = vpop.f32.mrf.mxu2  ;;  %v3567_v3 = vrot.slane %v3565_v33, 5  ;;  %v3847_v18 = vpack.c.b16 %v3821_v51, %v3820_v39  ;;  %v2256_v35 = vor.u32 %v2255_v17, %v2252_v0 }
 0x19f   : > { %v1419_v45 = vadd.f32 %v1375_v59, %v723_v25  ;;  %v1690_v43 = vpop.f32.mrf.mxu3  ;;  %v4812_v25 = vld [vmem:[%s5452_s26 + $0x1e8] sm:$0x1]  ;;  %v3573_v59 = vrot.slane %v3571_v60, 5  ;;  %v3577_v21 = vrot.slane %v3575_v62, 4  ;;  %v4813_v60 = vld [vmem:[%s5452_s26 + $0x1ec] sm:$0xf] }
 0x1a0   : > { %v724_v1 = vpop.f32.mrf.mxu1  ;;  %v2269_v28 = vshll.u32 %v4812_v25, 16  ;;  %v2257_v62 = vrot.slane %v2256_v35, 4  ;;  %v2277_v25 = vshll.u32 %v4813_v60, 16 }
 0x1a1   : > { %v1734_v34 = vadd.f32 %v1690_v43, %v1419_v45  ;;  %v725_v5 = vadd.f32 %v724_v1, %v5656_v22  ;;  %v2535_v45 = vpack.c.b16 %v2509_v32, %v2508_v61  ;;  %v5336_v43 = vld [vmem:[%s5452_s26 + $0x48] sm:$0xff]  ;;  %v3568_v22 = vor.u32 %v3567_v3, %v3564_v10  ;;  %v4814_v61 = vld [vmem:[%s5452_s26 + $0x1f0] sm:$0xf]  ;;  %v5173_v32 = vld [vmem:[%s5452_s26 + $0x60] sm:$0xf] }
 0x1a2   : > { %v2007_v12 = vpop.f32.mrf.mxu0  ;;  %v3581_v1 = vshll.u32 %v5172_v16, 16  ;;  %v2271_v0 = vrot.slane %v2269_v28, 5  ;;  %v5174_v16 = vld [vmem:[%s5452_s26 + $0x64] sm:$0xf] }
 0x1a3   : > { %v6091_v44 = vadd.f32 %v2005_v26, %v1734_v34  ;;  %v2266_v26 = vor.u32 %v2265_v41, %v6089_v52  ;;  %v3578_v34 = vor.u32 %v3577_v21, %v3573_v59  ;;  %v3569_v17 = vrot.slane %v3568_v22, 4 }
 0x1a4   : > { %v3583_v41 = vrot.slane %v3581_v1, 5 }
 0x1a5   : > { %v2267_v51 = vrot.slane %v2266_v26, 4  ;;  %v3579_v3 = vrot.slane %v3578_v34, 4  ;;  %v3599_v26 = vshrl.u32 %v5174_v16, 16  ;;  %v2279_v34 = vrot.slane %v2277_v25, 5 }
 0x1a6   : > { %v1377_v36 = vpop.f32.mrf.mxu2 }
 0x1a7   : > { %v1420_v8 = vadd.f32 %v1377_v36, %v725_v5  ;;  %v1692_v9 = vpop.f32.mrf.mxu3  ;;  %v2274_v5 = vshrl.u32 %v4813_v60, 16  ;;  %v2283_v36 = vshll.u32 %v4814_v61, 16  ;;  %v3584_v1 = vsel %vm5547_vm3, %v3579_v3, %v3583_v41  ;;  %v5175_v3 = vld [vmem:[%s5452_s26 + $0x68] sm:$0x1] }
 0x1a8   : > { %v727_v24 = vpop.f32.mrf.mxu1 }
 0x1a9   : > { %v1735_v11 = vadd.f32 %v1692_v9, %v1420_v8  ;;  %v728_v10 = vadd.f32 %v727_v24, %v5677_v37  ;;  %v2287_v8 = vshrl.u32 %v4814_v61, 16  ;;  %v3586_v9 = vshrl.u32 %v5173_v32, 16 }
 0x1aa   : > { %v2010_v33 = vpop.f32.mrf.mxu0  ;;  %v3574_v37 = vsel %vm5547_vm3, %v3569_v17, %v3573_v59  ;;  %v3595_v24 = vshll.u32 %v5174_v16, 16  ;;  %v6119_v60 = vrot.slane %v2283_v36, 5  ;;  %v4815_v59 = vld [vmem:[%s5452_s26 + $0x1f4] sm:$0x1]  ;;  %v3823_v17 = vunpack.c.l.b16 %v3584_v1 }
 0x1ab   : > { %4869 = vmatmul.msk.bf16.gmra.mxu1 %vm363_vm0, %v2535_v45  ;;  %5005 = vmatmul.msk.bf16.gmra.mxu2 %vm363_vm0, %v5336_v43  ;;  %v6104_v39 = vadd.f32 %v2007_v12, %v1735_v11  ;;  %v3589_v12 = vshll.u32 %v5173_v32, 16  ;;  %v2276_v11 = vrot.slane %v2274_v5, 4  ;;  %v3601_v16 = vrot.slane %v3599_v26, 4 }
 0x1ac   : > { %5141 = vmatmul.msk.bf16.gmra.mxu3 %vm363_vm0, %v5356_v6  ;;  %v2272_v6 = vsel %vm5547_vm3, %v2267_v51, %v2271_v0  ;;  %v3822_v0 = vunpack.c.l.b16 %v3574_v37  ;;  %v5357_v37 = vld [vmem:[%s5452_s26 + $0x120] sm:$0xff] }
 0x1ad   : > { %5229 = vmatmul.msk.bf16.gmra.mxu0 %vm363_vm0, %v3847_v18  ;;  %v2262_v18 = vsel %vm5547_vm3, %v2257_v62, %v6089_v52  ;;  %v2289_v52 = vrot.slane %v2287_v8, 4  ;;  %v3588_v62 = vrot.slane %v3586_v9, 4  ;;  %v3591_v61 = vrot.slane %v3589_v12, 5 }
 0x1ae   : > { %v1380_v21 = vpop.f32.mrf.mxu2  ;;  %v2510_v32 = vunpack.c.l.b16 %v2262_v18  ;;  %v2511_v51 = vunpack.c.l.b16 %v2272_v6  ;;  %v2280_v25 = vor.u32 %v2279_v34, %v2276_v11  ;;  %v2293_v8 = vshll.u32 %v4815_v59, 16  ;;  %v5337_v18 = vld [vmem:[%s5452_s26 + $0x54] sm:$0xff]  ;;  %v5176_v59 = vld [vmem:[%s5452_s26 + $0x6c] sm:$0xf] }
 0x1af   : > { %v1421_v45 = vadd.f32 %v1380_v21, %v728_v10  ;;  %v1695_v43 = vpop.f32.mrf.mxu3  ;;  %v3597_v10 = vrot.slane %v3595_v24, 5  ;;  %v2290_v36 = vor.u32 %v2289_v52, %v6119_v60  ;;  %v3592_v9 = vor.u32 %v3591_v61, %v3588_v62 }
 0x1b0   : > { %v729_v35 = vpop.f32.mrf.mxu1  ;;  %v3848_v1 = vpack.c.b16 %v3823_v17, %v3822_v0  ;;  %v2295_v11 = vrot.slane %v2293_v8, 5 }
 0x1b1   : > { %v1736_v28 = vadd.f32 %v1695_v43, %v1421_v45  ;;  %v730_v41 = vadd.f32 %v729_v35, %v5686_v53  ;;  %v2536_v43 = vpack.c.b16 %v2511_v51, %v2510_v32  ;;  %v3602_v24 = vor.u32 %v3601_v16, %v3597_v10  ;;  %v4816_v32 = vld [vmem:[%s5452_s26 + $0x1f8] sm:$0xf]  ;;  %v4817_v51 = vld [vmem:[%s5452_s26 + $0x1fc] sm:$0xf] }
 0x1b2   : > { %v2012_v22 = vpop.f32.mrf.mxu0  ;;  %v2281_v35 = vrot.slane %v2280_v25, 4  ;;  %v3593_v34 = vrot.slane %v3592_v9, 4  ;;  %v2301_v8 = vshll.u32 %v4816_v32, 16  ;;  %v2307_v9 = vshll.u32 %v4817_v51, 16 }
 0x1b3   : > { %v6122_v21 = vadd.f32 %v2010_v33, %v1736_v28  ;;  %v3605_v33 = vshll.u32 %v5175_v3, 16  ;;  %v2291_v28 = vrot.slane %v2290_v36, 4  ;;  %v3603_v62 = vrot.slane %v3602_v24, 4  ;;  %v5177_v3 = vld [vmem:[%s5452_s26 + $0x70] sm:$0xf] }
 0x1b4   : > { %v2286_v16 = vsel %vm5547_vm3, %v2281_v35, %v6119_v60  ;;  %v2298_v36 = vshrl.u32 %v4816_v32, 16 }
 0x1b5   : > { %v3607_v61 = vrot.slane %v3605_v33, 5 }
 0x1b6   : > { %v1382_v5 = vpop.f32.mrf.mxu2  ;;  %v2300_v35 = vrot.slane %v2298_v36, 4 }
 0x1b7   : > { %v1422_v12 = vadd.f32 %v1382_v5, %v730_v41  ;;  %v1697_v45 = vpop.f32.mrf.mxu3  ;;  %v3598_v41 = vsel %vm5547_vm3, %v3593_v34, %v3597_v10  ;;  %v2512_v10 = vunpack.c.l.b16 %v2286_v16 }
 0x1b8   : > { %v732_v6 = vpop.f32.mrf.mxu1  ;;  %v3824_v33 = vunpack.c.l.b16 %v3598_v41 }
 0x1b9   : > { %v1737_v26 = vadd.f32 %v1697_v45, %v1422_v12  ;;  %v733_v0 = vadd.f32 %v732_v6, %v5709_v13  ;;  %v3608_v13 = vsel %vm5547_vm3, %v3603_v62, %v3607_v61  ;;  %v2311_v45 = vshrl.u32 %v4817_v51, 16 }
 0x1ba   : > { %v2015_v53 = vpop.f32.mrf.mxu0 }
 0x1bb   : > { %4870 = vmatmul.msk.bf16.gmra.mxu1 %vm363_vm0, %v2536_v43  ;;  %5006 = vmatmul.msk.bf16.gmra.mxu2 %vm363_vm0, %v5337_v18  ;;  %v6131_v52 = vadd.f32 %v2012_v22, %v1737_v26  ;;  %v2296_v22 = vsel %vm5547_vm3, %v2291_v28, %v2295_v11  ;;  %v3610_v43 = vshrl.u32 %v5176_v59, 16  ;;  %v3613_v18 = vshll.u32 %v5176_v59, 16  ;;  %v5178_v59 = vld [vmem:[%s5452_s26 + $0x74] sm:$0x1] }
 0x1bc   : > { %5142 = vmatmul.msk.bf16.gmra.mxu3 %vm363_vm0, %v5357_v37  ;;  %v3619_v37 = vshll.u32 %v5177_v3, 16  ;;  %v2513_v24 = vunpack.c.l.b16 %v2296_v22  ;;  %v3825_v26 = vunpack.c.l.b16 %v3608_v13  ;;  %v2303_v28 = vrot.slane %v2301_v8, 5 }
 0x1bd   : > { %5230 = vmatmul.msk.bf16.gmra.mxu0 %vm363_vm0, %v3848_v1  ;;  %v3623_v1 = vshrl.u32 %v5177_v3, 16  ;;  %v6149_v11 = vrot.slane %v2307_v9, 5  ;;  %v2313_v34 = vrot.slane %v2311_v45, 4  ;;  %v3612_v62 = vrot.slane %v3610_v43, 4 }
 0x1be   : > { %v1385_v17 = vpop.f32.mrf.mxu2  ;;  %v3615_v61 = vrot.slane %v3613_v18, 5  ;;  %v3849_v36 = vpack.c.b16 %v3825_v26, %v3824_v33  ;;  %v2304_v8 = vor.u32 %v2303_v28, %v2300_v35  ;;  %v3629_v45 = vshll.u32 %v5178_v59, 16 }
 0x1bf   : > { %v1423_v5 = vadd.f32 %v1385_v17, %v733_v0  ;;  %v1700_v25 = vpop.f32.mrf.mxu3  ;;  %v4818_v0 = vld [vmem:[%s5452_s26 + $0x200] sm:$0x1]  ;;  %v6156_v17 = vrot.slane %v3619_v37, 5  ;;  %v3625_v16 = vrot.slane %v3623_v1, 4  ;;  %v2314_v13 = vor.u32 %v2313_v34, %v6149_v11  ;;  %v4819_v37 = vld [vmem:[%s5452_s26 + $0x204] sm:$0xf] }
 0x1c0   : > { %v734_v12 = vpop.f32.mrf.mxu1  ;;  %v2305_v1 = vrot.slane %v2304_v8, 4  ;;  %v3631_v34 = vrot.slane %v3629_v45, 5  ;;  %v2325_v59 = vshll.u32 %v4819_v37, 16 }
 0x1c1   : > { %v1738_v60 = vadd.f32 %v1700_v25, %v1423_v5  ;;  %v735_v51 = vadd.f32 %v734_v12, %v5728_v38  ;;  %v2537_v5 = vpack.c.b16 %v2513_v24, %v2512_v10  ;;  %v5338_v25 = vld [vmem:[%s5452_s26 + $0x60] sm:$0xff]  ;;  %v2317_v38 = vshll.u32 %v4818_v0, 16  ;;  %v4820_v10 = vld [vmem:[%s5452_s26 + $0x208] sm:$0xf]  ;;  %v5179_v24 = vld [vmem:[%s5452_s26 + $0x78] sm:$0xf] }
 0x1c2   : > { %v2017_v6 = vpop.f32.mrf.mxu0  ;;  %v3616_v12 = vor.u32 %v3615_v61, %v3612_v62  ;;  %v2315_v26 = vrot.slane %v2314_v13, 4  ;;  %v5180_v62 = vld [vmem:[%s5452_s26 + $0x7c] sm:$0xf]  ;;  %v2322_v0 = vshrl.u32 %v4819_v37, 16  ;;  %v2310_v13 = vsel %vm5547_vm3, %v2305_v1, %v6149_v11 }
 0x1c3   : > { %v6151_v32 = vadd.f32 %v2015_v53, %v1738_v60  ;;  %v5358_v53 = vld [vmem:[%s5452_s26 + $0x12c] sm:$0xff]  ;;  %v3626_v60 = vor.u32 %v3625_v16, %v6156_v17  ;;  %v2319_v35 = vrot.slane %v2317_v38, 5  ;;  %v3643_v8 = vshll.u32 %v5180_v62, 16 }
 0x1c4   : > { %v3617_v28 = vrot.slane %v3616_v12, 4  ;;  %v2514_v1 = vunpack.c.l.b16 %v2310_v13 }
 0x1c6   : > { %v1387_v22 = vpop.f32.mrf.mxu2 }
 0x1c7   : > { %v1424_v41 = vadd.f32 %v1387_v22, %v735_v51  ;;  %v1702_v3 = vpop.f32.mrf.mxu3  ;;  %v3627_v51 = vrot.slane %v3626_v60, 4  ;;  %v2331_v22 = vshll.u32 %v4820_v10, 16  ;;  %v2327_v60 = vrot.slane %v2325_v59, 5 }
 0x1c8   : > { %v737_v9 = vpop.f32.mrf.mxu1 }
 0x1c9   : > { %v1739_v43 = vadd.f32 %v1702_v3, %v1424_v41  ;;  %v738_v61 = vadd.f32 %v737_v9, %v5745_v4  ;;  %v2335_v41 = vshrl.u32 %v4820_v10, 16  ;;  %v3634_v3 = vshrl.u32 %v5179_v24, 16 }
 0x1ca   : > { %v2020_v18 = vpop.f32.mrf.mxu0  ;;  %v2320_v4 = vsel %vm5547_vm3, %v2315_v26, %v2319_v35  ;;  %v3622_v9 = vsel %vm5547_vm3, %v3617_v28, %v6156_v17  ;;  %v3632_v45 = vsel %vm5547_vm3, %v3627_v51, %v3631_v34  ;;  %v6183_v37 = vrot.slane %v2331_v22, 5  ;;  %v4821_v26 = vld [vmem:[%s5452_s26 + $0x20c] sm:$0x1] }
 0x1cb   : > { %4871 = vmatmul.msk.bf16.gmra.mxu1 %vm363_vm0, %v2537_v5  ;;  %5007 = vmatmul.msk.bf16.gmra.mxu2 %vm363_vm0, %v5338_v25  ;;  %v6167_v33 = vadd.f32 %v2017_v6, %v1739_v43  ;;  %v3637_v6 = vshll.u32 %v5179_v24, 16  ;;  %v2324_v43 = vrot.slane %v2322_v0, 4  ;;  %v2337_v10 = vrot.slane %v2335_v41, 4 }
 0x1cc   : > { %5143 = vmatmul.msk.bf16.gmra.mxu3 %vm363_vm0, %v5358_v53  ;;  %v3647_v53 = vshrl.u32 %v5180_v62, 16  ;;  %v3636_v24 = vrot.slane %v3634_v3, 4  ;;  %v2515_v62 = vunpack.c.l.b16 %v2320_v4  ;;  %v6186_v35 = vrot.slane %v3643_v8, 5  ;;  %v5339_v8 = vld [vmem:[%s5452_s26 + $0x6c] sm:$0xff] }
 0x1cd   : > { %5231 = vmatmul.msk.bf16.gmra.mxu0 %vm363_vm0, %v3849_v36  ;;  %v3639_v11 = vrot.slane %v3637_v6, 5  ;;  %v3826_v28 = vunpack.c.l.b16 %v3622_v9  ;;  %v2328_v51 = vor.u32 %v2327_v60, %v2324_v43  ;;  %v2338_v59 = vor.u32 %v2337_v10, %v6183_v37 }
 0x1ce   : > { %v1390_v16 = vpop.f32.mrf.mxu2  ;;  %v3649_v17 = vrot.slane %v3647_v53, 4  ;;  %v2341_v22 = vshll.u32 %v4821_v26, 16 }
 0x1cf   : > { %v1425_v5 = vadd.f32 %v1390_v16, %v738_v61  ;;  %v1705_v25 = vpop.f32.mrf.mxu3  ;;  %v3827_v61 = vunpack.c.l.b16 %v3632_v45  ;;  %v5181_v16 = vld [vmem:[%s5452_s26 + $0x80] sm:$0x1]  ;;  %v3640_v41 = vor.u32 %v3639_v11, %v3636_v24  ;;  %v2339_v45 = vrot.slane %v2338_v59, 4  ;;  %v4822_v11 = vld [vmem:[%s5452_s26 + $0x210] sm:$0xf] }
 0x1d0   : > { %v739_v36 = vpop.f32.mrf.mxu1  ;;  %v3650_v53 = vor.u32 %v3649_v17, %v6186_v35  ;;  %v3653_v13 = vshll.u32 %v5181_v16, 16  ;;  %v2343_v43 = vrot.slane %v2341_v22, 5 }
 0x1d1   : > { %v1740_v38 = vadd.f32 %v1705_v25, %v1425_v5  ;;  %v740_v34 = vadd.f32 %v739_v36, %v5758_v31  ;;  %v2538_v25 = vpack.c.b16 %v2515_v62, %v2514_v1  ;;  %v3850_v9 = vpack.c.b16 %v3827_v61, %v3826_v28  ;;  %v4823_v1 = vld [vmem:[%s5452_s26 + $0x214] sm:$0xf]  ;;  %v5182_v28 = vld [vmem:[%s5452_s26 + $0x84] sm:$0xf]  ;;  %v5183_v61 = vld [vmem:[%s5452_s26 + $0x88] sm:$0xf] }
 0x1d2   : > { %v2022_v12 = vpop.f32.mrf.mxu0  ;;  %v2329_v36 = vrot.slane %v2328_v51, 4  ;;  %v3641_v60 = vrot.slane %v3640_v41, 4  ;;  %v3651_v10 = vrot.slane %v3650_v53, 4  ;;  %v3655_v24 = vrot.slane %v3653_v13, 5 }
 0x1d3   : > { %v6189_v5 = vadd.f32 %v2020_v18, %v1740_v38  ;;  %v5359_v18 = vld [vmem:[%s5452_s26 + $0x138] sm:$0xff]  ;;  %v2349_v51 = vshll.u32 %v4822_v11, 16  ;;  %v2344_v41 = vsel %vm5547_vm3, %v2339_v45, %v2343_v43  ;;  %v3671_v53 = vshrl.u32 %v5183_v61, 16 }
 0x1d4   : > { %v2334_v17 = vsel %vm5547_vm3, %v2329_v36, %v6183_v37  ;;  %v3656_v37 = vsel %vm5547_vm3, %v3651_v10, %v3655_v24 }
 0x1d5   : > { %v3829_v24 = vunpack.c.l.b16 %v3656_v37  ;;  %v5340_v37 = vld [vmem:[%s5452_s26 + $0x78] sm:$0xff] }
 0x1d6   : > { %v1392_v0 = vpop.f32.mrf.mxu2 }
 0x1d7   : > { %v1426_v3 = vadd.f32 %v1392_v0, %v740_v34  ;;  %v1707_v6 = vpop.f32.mrf.mxu3  ;;  %v2346_v34 = vshrl.u32 %v4822_v11, 16  ;;  %v2359_v0 = vshrl.u32 %v4823_v1, 16  ;;  %v4824_v11 = vld [vmem:[%s5452_s26 + $0x218] sm:$0x1] }
 0x1d8   : > { %v2627_v4 = vpop.f32.mrf.mxu1 }
 0x1d9   : > { %v1741_v38 = vadd.f32 %v1707_v6, %v1426_v3  ;;  %v2707_v26 = vadd.f32 %v2627_v4, %v5775_v30  ;;  %v3646_v30 = vsel %vm5547_vm3, %v3641_v60, %v6186_v35  ;;  %v3658_v6 = vshrl.u32 %v5182_v28, 16  ;;  %v6226_v4 = vld [vmem:[%s6533_s2] ss:$0 sm:$0xff] }
 0x1da   : > { %v3939_v31 = vpop.f32.mrf.mxu0  ;;  %v2361_v45 = vrot.slane %v2359_v0, 4  ;;  %v2517_v60 = vunpack.c.l.b16 %v2344_v41  ;;  %v3828_v10 = vunpack.c.l.b16 %v3646_v30  ;;  %v2365_v0 = vshll.u32 %v4824_v11, 16 }
 0x1db   : > { %4872 = vmatmul.msk.bf16.gmra.mxu1 %vm363_vm0, %v2538_v25  ;;  %5008 = vmatmul.msk.bf16.gmra.mxu2 %vm363_vm0, %v5339_v8  ;;  %v6200_v62 = vadd.f32 %v2022_v12, %v1741_v38  ;;  %v2355_v12 = vshll.u32 %v4823_v1, 16  ;;  %v3661_v25 = vshll.u32 %v5182_v28, 16  ;;  %v3667_v8 = vshll.u32 %v5183_v61, 16 }
 0x1dc   : > { %5144 = vmatmul.msk.bf16.gmra.mxu3 %vm363_vm0, %v5359_v18  ;;  %v2516_v18 = vunpack.c.l.b16 %v2334_v17  ;;  %v2351_v38 = vrot.slane %v2349_v51, 5  ;;  %v3660_v1 = vrot.slane %v3658_v6, 4  ;;  %v3673_v61 = vrot.slane %v3671_v53, 4 }
 0x1dd   : > { %5232 = vmatmul.msk.bf16.gmra.mxu0 %vm363_vm0, %v3850_v9  ;;  %v2348_v9 = vrot.slane %v2346_v34, 4  ;;  %v6228_v36 = vrot.slane %v2355_v12, 5  ;;  %v6231_v28 = vrot.slane %v3667_v8, 5  ;;  %v5184_v34 = vld [vmem:[%s5452_s26 + $0x8c] sm:$0x1]  ;;  %v3851_v6 = vpack.c.b16 %v3829_v24, %v3828_v10 }
 0x1de   : > { %v2942_v16 = vpop.f32.mrf.mxu2  ;;  %v2539_v30 = vpack.c.b16 %v2517_v60, %v2516_v18  ;;  %v3677_v53 = vshll.u32 %v5184_v34, 16  ;;  %v4825_v60 = vld [vmem:[%s5452_s26 + $0x21c] sm:$0xf]  ;;  %v4826_v10 = vld [vmem:[%s5452_s26 + $0x220] sm:$0xf] }
 0x1df   : > { %v3022_v59 = vadd.f32 %v2942_v16, %v2707_v26  ;;  %v3257_v22 = vpop.f32.mrf.mxu3  ;;  %v3663_v26 = vrot.slane %v3661_v25, 5  ;;  %v2352_v12 = vor.u32 %v2351_v38, %v2348_v9  ;;  %v3674_v8 = vor.u32 %v3673_v61, %v6231_v28  ;;  %v5185_v24 = vld [vmem:[%s5452_s26 + $0x90] sm:$0xf] }
 0x1e0   : > { %v2629_v3 = vpop.f32.mrf.mxu1  ;;  %v3679_v61 = vrot.slane %v3677_v53, 5  ;;  %v2370_v34 = vshrl.u32 %v4825_v60, 16 }
 0x1e1   : > { %v3337_v13 = vadd.f32 %v3257_v22, %v3022_v59  ;;  %v2708_v16 = vadd.f32 %v2629_v3, %v5784_v63  ;;  %v5360_v3 = vld [vmem:[%s5452_s26 + $0x144] sm:$0xff]  ;;  %v3664_v25 = vor.u32 %v3663_v26, %v3660_v1  ;;  %v2353_v18 = vrot.slane %v2352_v12, 4 }
 0x1e2   : > { %v3941_v35 = vpop.f32.mrf.mxu0  ;;  %v3675_v26 = vrot.slane %v3674_v8, 4 }
 0x1e3   : > { %v4019_v43 = vadd.f32 %v3939_v31, %v3337_v13  ;;  %v2362_v31 = vor.u32 %v2361_v45, %v6228_v36  ;;  %v3665_v1 = vrot.slane %v3664_v25, 4 }
 0x1e4   : > { %v3680_v25 = vsel %vm5547_vm3, %v3675_v26, %v3679_v61  ;;  %v4827_v26 = vld [vmem:[%s5452_s26 + $0x224] sm:$0x1] }
 0x1e5   : > { %v4055_v17 = vadd.f32 %v6226_v4, %v4019_v43  ;;  %v2363_v45 = vrot.slane %v2362_v31, 4  ;;  %v2367_v43 = vrot.slane %v2365_v0, 5  ;;  %v2379_v31 = vshll.u32 %v4826_v10, 16 }
 0x1e6   : > { %v2944_v51 = vpop.f32.mrf.mxu2  ;;  %v2383_v0 = vshrl.u32 %v4826_v10, 16 }
 0x1e7   : > { %v4087_v59 = vmax.f32 %v4055_v17, 0.0  ;;  %v3023_v22 = vadd.f32 %v2944_v51, %v2708_v16  ;;  %v3259_v41 = vpop.f32.mrf.mxu3  ;;  %v2373_v51 = vshll.u32 %v4825_v60, 16 }
 0x1e8   : > { %v2632_v63 = vpop.f32.mrf.mxu1 }
 0x1e9   : > { %v4119_v13 = vpack.c.bf16 %v4087_v59, %v4087_v59  ;;  %v3338_v9 = vadd.f32 %v3259_v41, %v3023_v22  ;;  %v2709_v16 = vadd.f32 %v2632_v63, %v5795_v40  ;;  %v3682_v59 = vshrl.u32 %v5185_v24, 16 }
 0x1ea   : > { %v3944_v38 = vpop.f32.mrf.mxu0  ;;  %v3685_v22 = vshll.u32 %v5185_v24, 16  ;;  %v3670_v63 = vsel %vm5547_vm3, %v3665_v1, %v6231_v28 }
 0x1eb   : > { %4152 = vst.msk [vmem:[%s6242_s22] sm:$0xf] %vm4151_vm4, %v4119_v13  ;;  %v4020_v11 = vadd.f32 %v3941_v35, %v3338_v9  ;;  %4873 = vmatmul.msk.bf16.gmra.mxu1 %vm363_vm0, %v2539_v30  ;;  %5009 = vmatmul.msk.bf16.gmra.mxu2 %vm363_vm0, %v5340_v37  ;;  %v5186_v35 = vld [vmem:[%s5452_s26 + $0x94] sm:$0xf]  ;;  %v3830_v61 = vunpack.c.l.b16 %v3670_v63 }
 0x1ec   : > { %5145 = vmatmul.msk.bf16.gmra.mxu3 %vm363_vm0, %v5360_v3  ;;  %v2358_v3 = vsel %vm5547_vm3, %v2353_v18, %v6228_v36  ;;  %v3691_v8 = vshll.u32 %v5186_v35, 16  ;;  %v3695_v53 = vshrl.u32 %v5186_v35, 16  ;;  %v2375_v36 = vrot.slane %v2373_v51, 5 }
 0x1ed   : > { %5233 = vmatmul.msk.bf16.gmra.mxu0 %vm363_vm0, %v3851_v6  ;;  %v4056_v17 = vadd.f32 %v6226_v4, %v4020_v11  ;;  %v2368_v6 = vsel %vm5547_vm3, %v2363_v45, %v2367_v43  ;;  %v2372_v11 = vrot.slane %v2370_v34, 4  ;;  %v6268_v18 = vrot.slane %v2379_v31, 5 }
 0x1ee   : > { %v2947_v12 = vpop.f32.mrf.mxu2  ;;  %v2385_v45 = vrot.slane %v2383_v0, 4  ;;  %v3684_v43 = vrot.slane %v3682_v59, 4  ;;  %v3687_v10 = vrot.slane %v3685_v22, 5  ;;  %v2518_v24 = vunpack.c.l.b16 %v2358_v3 }
 0x1ef   : > { %v4088_v41 = vmax.f32 %v4056_v17, 0.0  ;;  %v3024_v30 = vadd.f32 %v2947_v12, %v2709_v16  ;;  %v3262_v37 = vpop.f32.mrf.mxu3  ;;  %v2519_v1 = vunpack.c.l.b16 %v2368_v6  ;;  %v3831_v17 = vunpack.c.l.b16 %v3680_v25  ;;  %v5187_v12 = vld [vmem:[%s5452_s26 + $0x98] sm:$0x1]  ;;  %v5341_v6 = vld [vmem:[%s5452_s26 + $0x84] sm:$0xff]  ;;  %v5361_v25 = vld [vmem:[%s5452_s26 + $0x150] sm:$0xff] }
 0x1f0   : > { %v2634_v40 = vpop.f32.mrf.mxu1  ;;  %v6273_v16 = vrot.slane %v3691_v8, 5  ;;  %v3697_v34 = vrot.slane %v3695_v53, 4  ;;  %v2376_v0 = vor.u32 %v2375_v36, %v2372_v11  ;;  %v2386_v59 = vor.u32 %v2385_v45, %v6268_v18  ;;  %v4828_v11 = vld [vmem:[%s5452_s26 + $0x228] sm:$0xf] }
 0x1f1   : > { %v4120_v13 = vpack.c.bf16 %v4088_v41, %v4088_v41  ;;  %v3339_v9 = vadd.f32 %v3262_v37, %v3024_v30  ;;  %v2710_v35 = vadd.f32 %v2634_v40, %v5806_v15  ;;  %v3688_v22 = vor.u32 %v3687_v10, %v3684_v43 }
 0x1f2   : > { %v3946_v60 = vpop.f32.mrf.mxu0  ;;  %v2540_v3 = vpack.c.b16 %v2519_v1, %v2518_v24  ;;  %v3852_v8 = vpack.c.b16 %v3831_v17, %v3830_v61  ;;  %v3698_v15 = vor.u32 %v3697_v34, %v6273_v16  ;;  %v3701_v40 = vshll.u32 %v5187_v12, 16  ;;  %v5188_v1 = vld [vmem:[%s5452_s26 + $0x9c] sm:$0xf] }
 0x1f3   : > { %4153 = vst.msk [vmem:[%s6242_s22 + $0x4] sm:$0xf] %vm4151_vm4, %v4120_v13  ;;  %v4021_v28 = vadd.f32 %v3944_v38, %v3339_v9  ;;  %v2389_v38 = vshll.u32 %v4827_v26, 16  ;;  %v2377_v36 = vrot.slane %v2376_v0, 4  ;;  %v2387_v45 = vrot.slane %v2386_v59, 4 }
 0x1f4   : > { %v3689_v10 = vrot.slane %v3688_v22, 4  ;;  %v5189_v26 = vld [vmem:[%s5452_s26 + $0xa0] sm:$0xf]  ;;  %v3699_v61 = vrot.slane %v3698_v15, 4  ;;  %v3703_v17 = vrot.slane %v3701_v40, 5  ;;  %v2394_v34 = vshrl.u32 %v4828_v11, 16 }
 0x1f5   : > { %v4057_v51 = vadd.f32 %v6226_v4, %v4021_v28  ;;  %v2391_v43 = vrot.slane %v2389_v38, 5  ;;  %v4829_v28 = vld [vmem:[%s5452_s26 + $0x22c] sm:$0xf]  ;;  %v3706_v59 = vshrl.u32 %v5188_v1, 16  ;;  %v3709_v38 = vshll.u32 %v5188_v1, 16 }
 0x1f6   : > { %v2949_v31 = vpop.f32.mrf.mxu2  ;;  %v3715_v22 = vshll.u32 %v5189_v26, 16  ;;  %v2396_v15 = vrot.slane %v2394_v34, 4 }
 0x1f7   : > { %v4089_v41 = vmax.f32 %v4057_v51, 0.0  ;;  %v3025_v30 = vadd.f32 %v2949_v31, %v2710_v35  ;;  %v3264_v37 = vpop.f32.mrf.mxu3  ;;  %v2397_v51 = vshll.u32 %v4828_v11, 16  ;;  %v2403_v31 = vshll.u32 %v4829_v28, 16 }
 0x1f8   : > { %v2637_v63 = vpop.f32.mrf.mxu1 }
 0x1f9   : > { %v4121_v53 = vpack.c.bf16 %v4089_v41, %v4089_v41  ;;  %v3340_v13 = vadd.f32 %v3264_v37, %v3025_v30  ;;  %v2711_v12 = vadd.f32 %v2637_v63, %v5828_v23  ;;  %v3719_v41 = vshrl.u32 %v5189_v26, 16 }
 0x1fa   : > { %v3949_v9 = vpop.f32.mrf.mxu0  ;;  %v3694_v63 = vsel %vm5547_vm3, %v3689_v10, %v6273_v16  ;;  %v2399_v40 = vrot.slane %v2397_v51, 5 }
 0x1fb   : > { %4154 = vst.msk [vmem:[%s6242_s22 + $0x8] sm:$0xf] %vm4151_vm4, %v4121_v53  ;;  %v4022_v24 = vadd.f32 %v3946_v60, %v3340_v13  ;;  %4874 = vmatmul.msk.bf16.gmra.mxu1 %vm363_vm0, %v2540_v3  ;;  %5010 = vmatmul.msk.bf16.gmra.mxu2 %vm363_vm0, %v5341_v6  ;;  %v2407_v60 = vshrl.u32 %v4829_v28, 16  ;;  %v2382_v6 = vsel %vm5547_vm3, %v2377_v36, %v6268_v18  ;;  %v4830_v28 = vld [vmem:[%s5452_s26 + $0x230] sm:$0x1]  ;;  %v6305_v18 = vrot.slane %v2403_v31, 5 }
 0x1fc   : > { %5146 = vmatmul.msk.bf16.gmra.mxu3 %vm363_vm0, %v5361_v25  ;;  %v2392_v25 = vsel %vm5547_vm3, %v2387_v45, %v2391_v43  ;;  %v3708_v45 = vrot.slane %v3706_v59, 4  ;;  %v3711_v43 = vrot.slane %v3709_v38, 5  ;;  %v3721_v1 = vrot.slane %v3719_v41, 4 }
 0x1fd   : > { %5234 = vmatmul.msk.bf16.gmra.mxu0 %vm363_vm0, %v3852_v8  ;;  %v4058_v35 = vadd.f32 %v6226_v4, %v4022_v24  ;;  %v3704_v8 = vsel %vm5547_vm3, %v3699_v61, %v3703_v17  ;;  %v2409_v36 = vrot.slane %v2407_v60, 4  ;;  %v6307_v24 = vrot.slane %v3715_v22, 5  ;;  %v5190_v61 = vld [vmem:[%s5452_s26 + $0xa4] sm:$0x1] }
 0x1fe   : > { %v2952_v0 = vpop.f32.mrf.mxu2  ;;  %v2520_v10 = vunpack.c.l.b16 %v2382_v6  ;;  %v2521_v26 = vunpack.c.l.b16 %v2392_v25  ;;  %v3832_v17 = vunpack.c.l.b16 %v3694_v63  ;;  %v3833_v34 = vunpack.c.l.b16 %v3704_v8  ;;  %v5362_v25 = vld [vmem:[%s5452_s26 + $0x15c] sm:$0xff] }
 0x1ff   : > { %v4090_v30 = vmax.f32 %v4058_v35, 0.0  ;;  %v3026_v37 = vadd.f32 %v2952_v0, %v2711_v12  ;;  %v3267_v3 = vpop.f32.mrf.mxu3  ;;  %v2413_v51 = vshll.u32 %v4830_v28, 16  ;;  %v2400_v31 = vor.u32 %v2399_v40, %v2396_v15 }
 0x200   : > { %v2639_v23 = vpop.f32.mrf.mxu1  ;;  %v2410_v60 = vor.u32 %v2409_v36, %v6305_v18  ;;  %v3712_v59 = vor.u32 %v3711_v43, %v3708_v45  ;;  %v3722_v38 = vor.u32 %v3721_v1, %v6307_v24  ;;  %v3853_v63 = vpack.c.b16 %v3833_v34, %v3832_v17  ;;  %v4831_v43 = vld [vmem:[%s5452_s26 + $0x234] sm:$0xf]  ;;  %v4832_v1 = vld [vmem:[%s5452_s26 + $0x238] sm:$0xf]  ;;  %v5192_v17 = vld [vmem:[%s5452_s26 + $0xac] sm:$0xf] }
 0x201   : > { %v4122_v53 = vpack.c.bf16 %v4090_v30, %v4090_v30  ;;  %v3341_v13 = vadd.f32 %v3267_v3, %v3026_v37  ;;  %v2712_v12 = vadd.f32 %v2639_v23, %v5837_v47  ;;  %v2541_v37 = vpack.c.b16 %v2521_v26, %v2520_v10  ;;  %v5342_v3 = vld [vmem:[%s5452_s26 + $0x90] sm:$0xff] }
 0x202   : > { %v3951_v11 = vpop.f32.mrf.mxu0  ;;  %v2415_v47 = vrot.slane %v2413_v51, 5  ;;  %v2401_v40 = vrot.slane %v2400_v31, 4  ;;  %v3723_v28 = vrot.slane %v3722_v38, 4  ;;  %v2418_v51 = vshrl.u32 %v4831_v43, 16 }
 0x203   : > { %4155 = vst.msk [vmem:[%s6242_s22 + $0xc] sm:$0xf] %vm4151_vm4, %v4122_v53  ;;  %v4023_v16 = vadd.f32 %v3949_v9, %v3341_v13  ;;  %v3725_v9 = vshll.u32 %v5190_v61, 16  ;;  %v2411_v53 = vrot.slane %v2410_v60, 4  ;;  %v3713_v13 = vrot.slane %v3712_v59, 4 }
 0x204   : > { %v2406_v26 = vsel %vm5547_vm3, %v2401_v40, %v6305_v18  ;;  %v5191_v61 = vld [vmem:[%s5452_s26 + $0xa8] sm:$0xf]  ;;  %v2431_v31 = vshrl.u32 %v4832_v1, 16 }
 0x205   : > { %v4059_v35 = vadd.f32 %v6226_v4, %v4023_v16  ;;  %v3727_v36 = vrot.slane %v3725_v9, 5  ;;  %v3730_v9 = vshrl.u32 %v5191_v61, 16 }
 0x206   : > { %v2954_v0 = vpop.f32.mrf.mxu2 }
 0x207   : > { %v4091_v22 = vmax.f32 %v4059_v35, 0.0  ;;  %v3027_v41 = vadd.f32 %v2954_v0, %v2712_v12  ;;  %v3269_v30 = vpop.f32.mrf.mxu3  ;;  %v2421_v35 = vshll.u32 %v4831_v43, 16  ;;  %v2427_v12 = vshll.u32 %v4832_v1, 16 }
 0x208   : > { %v2642_v6 = vpop.f32.mrf.mxu1  ;;  %v3728_v18 = vsel %vm5547_vm3, %v3723_v28, %v3727_v36  ;;  %v4833_v28 = vld [vmem:[%s5452_s26 + $0x23c] sm:$0x1]  ;;  %v5193_v36 = vld [vmem:[%s5452_s26 + $0xb0] sm:$0x1] }
 0x209   : > { %v4123_v23 = vpack.c.bf16 %v4091_v22, %v4091_v22  ;;  %v3342_v8 = vadd.f32 %v3269_v30, %v3027_v41  ;;  %v2713_v10 = vadd.f32 %v2642_v6, %v5847_v19  ;;  %v3718_v19 = vsel %vm5547_vm3, %v3713_v13, %v6307_v24 }
 0x20a   : > { %v3954_v15 = vpop.f32.mrf.mxu0  ;;  %v3733_v22 = vshll.u32 %v5191_v61, 16  ;;  %v3739_v41 = vshll.u32 %v5192_v17, 16  ;;  %v3743_v30 = vshrl.u32 %v5192_v17, 16  ;;  %v3835_v13 = vunpack.c.l.b16 %v3728_v18 }
 0x20b   : > { %4156 = vst.msk [vmem:[%s6242_s22 + $0x10] sm:$0xf] %vm4151_vm4, %v4123_v23  ;;  %v4024_v45 = vadd.f32 %v3951_v11, %v3342_v8  ;;  %4875 = vmatmul.msk.bf16.gmra.mxu1 %vm363_vm0, %v2541_v37  ;;  %5011 = vmatmul.msk.bf16.gmra.mxu2 %vm363_vm0, %v5342_v3  ;;  %v2416_v11 = vsel %vm5547_vm3, %v2411_v53, %v2415_v47  ;;  %v2423_v47 = vrot.slane %v2421_v35, 5  ;;  %v6340_v23 = vrot.slane %v2427_v12, 5 }
 0x20c   : > { %5147 = vmatmul.msk.bf16.gmra.mxu3 %vm363_vm0, %v5362_v25  ;;  %v2522_v25 = vunpack.c.l.b16 %v2406_v26  ;;  %v2433_v8 = vrot.slane %v2431_v31, 4  ;;  %v2523_v40 = vunpack.c.l.b16 %v2416_v11  ;;  %v3834_v53 = vunpack.c.l.b16 %v3718_v19 }
 0x20d   : > { %5235 = vmatmul.msk.bf16.gmra.mxu0 %vm363_vm0, %v3853_v63  ;;  %v4060_v16 = vadd.f32 %v6226_v4, %v4024_v45  ;;  %v2420_v63 = vrot.slane %v2418_v51, 4  ;;  %v3732_v45 = vrot.slane %v3730_v9, 4  ;;  %v3735_v43 = vrot.slane %v3733_v22, 5 }
 0x20e   : > { %v2957_v34 = vpop.f32.mrf.mxu2  ;;  %v6346_v1 = vrot.slane %v3739_v41, 5  ;;  %v2437_v11 = vshll.u32 %v4833_v28, 16  ;;  %v2542_v31 = vpack.c.b16 %v2523_v40, %v2522_v25  ;;  %v3854_v19 = vpack.c.b16 %v3835_v13, %v3834_v53  ;;  %v4834_v41 = vld [vmem:[%s5452_s26 + $0x240] sm:$0xf] }
 0x20f   : > { %v4092_v60 = vmax.f32 %v4060_v16, 0.0  ;;  %v3028_v0 = vadd.f32 %v2957_v34, %v2713_v10  ;;  %v3272_v59 = vpop.f32.mrf.mxu3  ;;  %v3745_v16 = vrot.slane %v3743_v30, 4  ;;  %v2424_v17 = vor.u32 %v2423_v47, %v2420_v63  ;;  %v4835_v47 = vld [vmem:[%s5452_s26 + $0x244] sm:$0xf] }
 0x210   : > { %v2644_v38 = vpop.f32.mrf.mxu1  ;;  %v3749_v34 = vshll.u32 %v5193_v36, 16  ;;  %v3736_v18 = vor.u32 %v3735_v43, %v3732_v45  ;;  %v2442_v13 = vshrl.u32 %v4834_v41, 16  ;;  %v2445_v28 = vshll.u32 %v4834_v41, 16 }
 0x211   : > { %v4124_v37 = vpack.c.bf16 %v4092_v60, %v4092_v60  ;;  %v3343_v3 = vadd.f32 %v3272_v59, %v3028_v0  ;;  %v2714_v26 = vadd.f32 %v2644_v38, %v5855_v56  ;;  %v5343_v60 = vld [vmem:[%s5452_s26 + $0x9c] sm:$0xff]  ;;  %v5363_v59 = vld [vmem:[%s5452_s26 + $0x168] sm:$0xff]  ;;  %v3746_v56 = vor.u32 %v3745_v16, %v6346_v1 }
 0x212   : > { %v3956_v6 = vpop.f32.mrf.mxu0  ;;  %v2425_v30 = vrot.slane %v2424_v17, 4  ;;  %v3751_v63 = vrot.slane %v3749_v34, 5  ;;  %v3737_v40 = vrot.slane %v3736_v18, 4  ;;  %v2451_v43 = vshll.u32 %v4835_v47, 16 }
 0x213   : > { %4157 = vst.msk [vmem:[%s6242_s22 + $0x14] sm:$0xf] %vm4151_vm4, %v4124_v37  ;;  %v4025_v24 = vadd.f32 %v3954_v15, %v3343_v3  ;;  %v2434_v15 = vor.u32 %v2433_v8, %v6340_v23  ;;  %v2439_v3 = vrot.slane %v2437_v11, 5  ;;  %v5194_v8 = vld [vmem:[%s5452_s26 + $0xb4] sm:$0xf]  ;;  %v3747_v53 = vrot.slane %v3746_v56, 4 }
 0x214   : > { %v6376_v56 = vrot.slane %v2451_v43, 5 }
 0x215   : > { %v4061_v10 = vadd.f32 %v6226_v4, %v4025_v24  ;;  %v2435_v37 = vrot.slane %v2434_v15, 4  ;;  %v5195_v24 = vld [vmem:[%s5452_s26 + $0xb8] sm:$0xf] }
 0x216   : > { %v2959_v61 = vpop.f32.mrf.mxu2  ;;  %v3767_v17 = vshrl.u32 %v5195_v24, 16 }
 0x217   : > { %v4093_v51 = vmax.f32 %v4061_v10, 0.0  ;;  %v3029_v35 = vadd.f32 %v2959_v61, %v2714_v26  ;;  %v3274_v12 = vpop.f32.mrf.mxu3  ;;  %v3754_v10 = vshrl.u32 %v5194_v8, 16  ;;  %v3757_v26 = vshll.u32 %v5194_v8, 16 }
 0x218   : > { %v2647_v0 = vpop.f32.mrf.mxu1  ;;  %v3763_v61 = vshll.u32 %v5195_v24, 16 }
 0x219   : > { %v4125_v38 = vpack.c.bf16 %v4093_v51, %v4093_v51  ;;  %v3344_v9 = vadd.f32 %v3274_v12, %v3029_v35  ;;  %v2715_v45 = vadd.f32 %v2647_v0, %v5866_v29  ;;  %v2430_v51 = vsel %vm5547_vm3, %v2425_v30, %v6340_v23 }
 0x21a   : > { %v3959_v22 = vpop.f32.mrf.mxu0  ;;  %v2440_v35 = vsel %vm5547_vm3, %v2435_v37, %v2439_v3  ;;  %v3742_v12 = vsel %vm5547_vm3, %v3737_v40, %v6346_v1  ;;  %v2447_v0 = vrot.slane %v2445_v28, 5  ;;  %v3759_v41 = vrot.slane %v3757_v26, 5 }
 0x21b   : > { %4158 = vst.msk [vmem:[%s6242_s22 + $0x18] sm:$0xf] %vm4151_vm4, %v4125_v38  ;;  %v4026_v25 = vadd.f32 %v3956_v6, %v3344_v9  ;;  %4876 = vmatmul.msk.bf16.gmra.mxu1 %vm363_vm0, %v2542_v31  ;;  %5012 = vmatmul.msk.bf16.gmra.mxu2 %vm363_vm0, %v5343_v60  ;;  %v2455_v6 = vshrl.u32 %v4835_v47, 16  ;;  %v3752_v31 = vsel %vm5547_vm3, %v3747_v53, %v3751_v63  ;;  %v2444_v60 = vrot.slane %v2442_v13, 4  ;;  %v4836_v38 = vld [vmem:[%s5452_s26 + $0x248] sm:$0x1] }
 0x21c   : > { %5148 = vmatmul.msk.bf16.gmra.mxu3 %vm363_vm0, %v5363_v59  ;;  %v3756_v9 = vrot.slane %v3754_v10, 4  ;;  %v6379_v30 = vrot.slane %v3763_v61, 5  ;;  %v3769_v37 = vrot.slane %v3767_v17, 4  ;;  %v2524_v3 = vunpack.c.l.b16 %v2430_v51  ;;  %v5196_v47 = vld [vmem:[%s5452_s26 + $0xbc] sm:$0x1]  ;;  %v5344_v61 = vld [vmem:[%s5452_s26 + $0xa8] sm:$0xff] }
 0x21d   : > { %5236 = vmatmul.msk.bf16.gmra.mxu0 %vm363_vm0, %v3854_v19  ;;  %v4062_v36 = vadd.f32 %v6226_v4, %v4026_v25  ;;  %v2457_v23 = vrot.slane %v2455_v6, 4  ;;  %v2525_v63 = vunpack.c.l.b16 %v2440_v35  ;;  %v3836_v25 = vunpack.c.l.b16 %v3742_v12 }
 0x21e   : > { %v2962_v16 = vpop.f32.mrf.mxu2  ;;  %v3837_v8 = vunpack.c.l.b16 %v3752_v31  ;;  %v2448_v53 = vor.u32 %v2447_v0, %v2444_v60  ;;  %v2461_v13 = vshll.u32 %v4836_v38, 16  ;;  %v3770_v43 = vor.u32 %v3769_v37, %v6379_v30 }
 0x21f   : > { %v4094_v15 = vmax.f32 %v4062_v36, 0.0  ;;  %v3030_v11 = vadd.f32 %v2962_v16, %v2715_v45  ;;  %v3277_v34 = vpop.f32.mrf.mxu3  ;;  %v2458_v36 = vor.u32 %v2457_v23, %v6376_v56  ;;  %v3760_v45 = vor.u32 %v3759_v41, %v3756_v9  ;;  %v4838_v9 = vld [vmem:[%s5452_s26 + $0x250] sm:$0xf]  ;;  %v5197_v41 = vld [vmem:[%s5452_s26 + $0xc0] sm:$0xf] }
 0x220   : > { %v2649_v29 = vpop.f32.mrf.mxu1  ;;  %v2543_v26 = vpack.c.b16 %v2525_v63, %v2524_v3  ;;  %v2449_v35 = vrot.slane %v2448_v53, 4  ;;  %v3771_v60 = vrot.slane %v3770_v43, 4 }
 0x221   : > { %v4126_v59 = vpack.c.bf16 %v4094_v15, %v4094_v15  ;;  %v3345_v19 = vadd.f32 %v3277_v34, %v3030_v11  ;;  %v2716_v40 = vadd.f32 %v2649_v29, %v5876_v2  ;;  %v5364_v15 = vld [vmem:[%s5452_s26 + $0x174] sm:$0xff]  ;;  %v3855_v11 = vpack.c.b16 %v3837_v8, %v3836_v25 }
 0x222   : > { %v3961_v18 = vpop.f32.mrf.mxu0  ;;  %v2463_v29 = vrot.slane %v2461_v13, 5  ;;  %v2459_v12 = vrot.slane %v2458_v36, 4  ;;  %v3761_v31 = vrot.slane %v3760_v45, 4  ;;  %v2475_v13 = vshll.u32 %v4838_v9, 16 }
 0x223   : > { %4159 = vst.msk [vmem:[%s6242_s22 + $0x1c] sm:$0xf] %vm4151_vm4, %v4126_v59  ;;  %v4027_v1 = vadd.f32 %v3959_v22, %v3345_v19  ;;  %v3773_v22 = vshll.u32 %v5196_v47, 16  ;;  %v4837_v19 = vld [vmem:[%s5452_s26 + $0x24c] sm:$0xf]  ;;  %v3781_v36 = vshll.u32 %v5197_v41, 16 }
 0x224   : > { %v3766_v3 = vsel %vm5547_vm3, %v3761_v31, %v6379_v30  ;;  %v5198_v47 = vld [vmem:[%s5452_s26 + $0xc4] sm:$0xf] }
 0x225   : > { %v4063_v24 = vadd.f32 %v6226_v4, %v4027_v1  ;;  %v3775_v0 = vrot.slane %v3773_v22, 5  ;;  %v2464_v1 = vsel %vm5547_vm3, %v2459_v12, %v2463_v29  ;;  %v3791_v30 = vshrl.u32 %v5198_v47, 16 }
 0x226   : > { %v2964_v28 = vpop.f32.mrf.mxu2  ;;  %v3783_v29 = vrot.slane %v3781_v36, 5 }
 0x227   : > { %v4095_v6 = vmax.f32 %v4063_v24, 0.0  ;;  %v3031_v16 = vadd.f32 %v2964_v28, %v2716_v40  ;;  %v3279_v10 = vpop.f32.mrf.mxu3  ;;  %v3776_v63 = vsel %vm5547_vm3, %v3771_v60, %v3775_v0  ;;  %v2466_v24 = vshrl.u32 %v4837_v19, 16  ;;  %v4839_v60 = vld [vmem:[%s5452_s26 + $0x254] sm:$0x1]  ;;  %v5199_v0 = vld [vmem:[%s5452_s26 + $0xc8] sm:$0x1] }
 0x228   : > { %v2652_v17 = vpop.f32.mrf.mxu1  ;;  %v2469_v40 = vshll.u32 %v4837_v19, 16  ;;  %v3778_v28 = vshrl.u32 %v5197_v41, 16  ;;  %v3793_v19 = vrot.slane %v3791_v30, 4 }
 0x229   : > { %v4127_v2 = vpack.c.bf16 %v4095_v6, %v4095_v6  ;;  %v3346_v34 = vadd.f32 %v3279_v10, %v3031_v16  ;;  %v2717_v38 = vadd.f32 %v2652_v17, %v5886_v55  ;;  %v3787_v6 = vshll.u32 %v5198_v47, 16 }
 0x22a   : > { %v3964_v51 = vpop.f32.mrf.mxu0  ;;  %v2527_v10 = vunpack.c.l.b16 %v2464_v1  ;;  %v3839_v17 = vunpack.c.l.b16 %v3776_v63 }
 0x22b   : > { %4160 = vst.msk [vmem:[%s6242_s22 + $0x20] sm:$0xf] %vm4151_vm4, %v4127_v2  ;;  %v4028_v59 = vadd.f32 %v3961_v18, %v3346_v34  ;;  %4877 = vmatmul.msk.bf16.gmra.mxu1 %vm363_vm0, %v2543_v26  ;;  %5013 = vmatmul.msk.bf16.gmra.mxu2 %vm363_vm0, %v5344_v61  ;;  %v2454_v18 = vsel %vm5547_vm3, %v2449_v35, %v6376_v56  ;;  %v2479_v56 = vshrl.u32 %v4838_v9, 16  ;;  %v3838_v26 = vunpack.c.l.b16 %v3766_v3  ;;  %v5365_v3 = vld [vmem:[%s5452_s26 + $0x180] sm:$0xff] }
 0x22c   : > { %5149 = vmatmul.msk.bf16.gmra.mxu3 %vm363_vm0, %v5364_v15  ;;  %v2526_v16 = vunpack.c.l.b16 %v2454_v18  ;;  %v2468_v15 = vrot.slane %v2466_v24, 4  ;;  %v2477_v2 = vrot.slane %v2475_v13, 5  ;;  %v3780_v35 = vrot.slane %v3778_v28, 4 }
 0x22d   : > { %5237 = vmatmul.msk.bf16.gmra.mxu0 %vm363_vm0, %v3855_v11  ;;  %v4064_v23 = vadd.f32 %v6226_v4, %v4028_v59  ;;  %v2471_v11 = vrot.slane %v2469_v40, 5  ;;  %v2481_v34 = vrot.slane %v2479_v56, 4  ;;  %v3789_v59 = vrot.slane %v3787_v6, 5  ;;  %v6539_v6 = vld [vmem:[#allocation2_spill] sm:$0xff] }
 0x22e   : > { %v2967_v37 = vpop.f32.mrf.mxu2  ;;  %v2544_v41 = vpack.c.b16 %v2527_v10, %v2526_v16  ;;  %v3856_v18 = vpack.c.b16 %v3839_v17, %v3838_v26  ;;  %v3784_v40 = vor.u32 %v3783_v29, %v3780_v35 }
 0x22f   : > { %v4096_v25 = vmax.f32 %v4064_v23, 0.0  ;;  %v3032_v55 = vadd.f32 %v2967_v37, %v2717_v38  ;;  %v3282_v8 = vpop.f32.mrf.mxu3  ;;  %v5345_v37 = vld [vmem:[%s5452_s26 + $0xb4] sm:$0xff]  ;;  %v2472_v63 = vor.u32 %v2471_v11, %v2468_v15  ;;  %v2482_v47 = vor.u32 %v2481_v34, %v2477_v2 }
 0x230   : > { %v2654_v53 = vpop.f32.mrf.mxu1  ;;  %v3785_v16 = vrot.slane %v3784_v40, 4 }
 0x231   : > { %v4128_v45 = vpack.c.bf16 %v4096_v25, %v4096_v25  ;;  %v3347_v43 = vadd.f32 %v3282_v8, %v3032_v55  ;;  %v2718_v31 = vadd.f32 %v2654_v53, %v5895_v42  ;;  %v2485_v25 = vshll.u32 %v4839_v60, 16 }
 0x232   : > { %v3966_v22 = vpop.f32.mrf.mxu0  ;;  %v3797_v55 = vshll.u32 %v5199_v0, 16  ;;  %v3794_v53 = vor.u32 %v3793_v19, %v3789_v59  ;;  %v2473_v56 = vrot.slane %v2472_v63, 4  ;;  %v2483_v28 = vrot.slane %v2482_v47, 4  ;;  %v5366_v47 = vld [vmem:[%s5452_s26 + $0x18c] sm:$0xff] }
 0x233   : > { %4161 = vst.msk [vmem:[%s6242_s22 + $0x24] sm:$0xf] %vm4151_vm4, %v4128_v45  ;;  %v4029_v61 = vadd.f32 %v3964_v51, %v3347_v43  ;;  %v2487_v36 = vrot.slane %v2485_v25, 5 }
 0x234   : > { %v3799_v45 = vrot.slane %v3797_v55, 5  ;;  %v3795_v10 = vrot.slane %v3794_v53, 4  ;;  %v2478_v11 = vsel %vm5547_vm3, %v2473_v56, %v2477_v2 }
 0x235   : > { %v4065_v12 = vadd.f32 %v6226_v4, %v4029_v61  ;;  %v2488_v34 = vsel %vm5547_vm3, %v2483_v28, %v2487_v36  ;;  %v2528_v19 = vunpack.c.l.b16 %v2478_v11 }
 0x236   : > { %v2969_v23 = vpop.f32.mrf.mxu2  ;;  %v3800_v60 = vsel %vm5547_vm3, %v3795_v10, %v3799_v45 }
 0x237   : > { %v4097_v38 = vmax.f32 %v4065_v12, 0.0  ;;  %v3033_v51 = vadd.f32 %v2969_v23, %v2718_v31  ;;  %v3284_v9 = vpop.f32.mrf.mxu3  ;;  %v3790_v31 = vsel %vm5547_vm3, %v3785_v16, %v3789_v59  ;;  %v2529_v23 = vunpack.c.l.b16 %v2488_v34 }
 0x238   : > { %v2657_v1 = vpop.f32.mrf.mxu1  ;;  %v3840_v2 = vunpack.c.l.b16 %v3790_v31 }
 0x239   : > { %v4129_v8 = vpack.c.bf16 %v4097_v38, %v4097_v38  ;;  %v3348_v42 = vadd.f32 %v3284_v9, %v3033_v51  ;;  %v2719_v30 = vadd.f32 %v2657_v1, %v6539_v6  ;;  %v3841_v38 = vunpack.c.l.b16 %v3800_v60  ;;  %v6540_v9 = vld [vmem:[#allocation3_spill] sm:$0xff] }
 0x23a   : > { %v3969_v24 = vpop.f32.mrf.mxu0 }
 0x23b   : > { %4162 = vst.msk [vmem:[%s6242_s22 + $0x28] sm:$0xf] %vm4151_vm4, %v4129_v8  ;;  %v4030_v13 = vadd.f32 %v3966_v22, %v3348_v42  ;;  %4878 = vmatmul.msk.bf16.gmra.mxu1 %vm363_vm0, %v2544_v41  ;;  %5014 = vmatmul.msk.bf16.gmra.mxu2 %vm363_vm0, %v5345_v37  ;;  %v3857_v25 = vpack.c.b16 %v3841_v38, %v3840_v2 }
 0x23c   : > { %5150 = vmatmul.msk.bf16.gmra.mxu3 %vm363_vm0, %v5365_v3  ;;  %v2545_v3 = vpack.c.b16 %v2529_v23, %v2528_v19 }
 0x23d   : > { %5238 = vmatmul.msk.bf16.gmra.mxu0 %vm363_vm0, %v3856_v18  ;;  %v4066_v43 = vadd.f32 %v6226_v4, %v4030_v13 }
 0x23e   : > { %v2972_v22 = vpop.f32.mrf.mxu2 }
 0x23f   : > { %v4098_v26 = vmax.f32 %v4066_v43, 0.0  ;;  %v3034_v61 = vadd.f32 %v2972_v22, %v2719_v30  ;;  %v3287_v17 = vpop.f32.mrf.mxu3 }
 0x240   : > { %v2659_v15 = vpop.f32.mrf.mxu1 }
 0x241   : > { %v4130_v35 = vpack.c.bf16 %v4098_v26, %v4098_v26  ;;  %v3349_v29 = vadd.f32 %v3287_v17, %v3034_v61  ;;  %v2720_v41 = vadd.f32 %v2659_v15, %v6540_v9 }
 0x242   : > { %v3971_v12 = vpop.f32.mrf.mxu0 }
 0x243   : > { %4163 = vst.msk [vmem:[%s6242_s22 + $0x2c] sm:$0xf] %vm4151_vm4, %v4130_v35  ;;  %v4031_v0 = vadd.f32 %v3969_v24, %v3349_v29 }
 0x245   : > { %v4067_v51 = vadd.f32 %v6226_v4, %v4031_v0 }
 0x246   : > { %v2974_v37 = vpop.f32.mrf.mxu2 }
 0x247   : > { %v4099_v18 = vmax.f32 %v4067_v51, 0.0  ;;  %v3035_v1 = vadd.f32 %v2974_v37, %v2720_v41  ;;  %v3289_v59 = vpop.f32.mrf.mxu3 }
 0x248   : > { %v2662_v63 = vpop.f32.mrf.mxu1 }
 0x249   : > { %v4131_v55 = vpack.c.bf16 %v4099_v18, %v4099_v18  ;;  %v3350_v8 = vadd.f32 %v3289_v59, %v3035_v1  ;;  %v2721_v53 = vadd.f32 %v2662_v63, %v5942_v49 }
 0x24a   : > { %v3974_v42 = vpop.f32.mrf.mxu0 }
 0x24b   : > { %4164 = vst.msk [vmem:[%s6242_s22 + $0x30] sm:$0xf] %vm4151_vm4, %v4131_v55  ;;  %v4032_v24 = vadd.f32 %v3971_v12, %v3350_v8  ;;  %4879 = vmatmul.msk.bf16.gmra.mxu1 %vm363_vm0, %v2545_v3  ;;  %5015 = vmatmul.msk.bf16.gmra.mxu2 %vm363_vm0, %v5346_v57 }
 0x24c   : > { %5151 = vmatmul.msk.bf16.gmra.mxu3 %vm363_vm0, %v5366_v47 }
 0x24d   : > { %5239 = vmatmul.msk.bf16.gmra.mxu0 %vm363_vm0, %v3857_v25  ;;  %v4068_v40 = vadd.f32 %v6226_v4, %v4032_v24 }
 0x24e   : > { %v2977_v13 = vpop.f32.mrf.mxu2 }
 0x24f   : > { %v4100_v56 = vmax.f32 %v4068_v40, 0.0  ;;  %v3036_v28 = vadd.f32 %v2977_v13, %v2721_v53  ;;  %v3292_v36 = vpop.f32.mrf.mxu3 }
 0x250   : > { %v2664_v45 = vpop.f32.mrf.mxu1 }
 0x251   : > { %v4132_v43 = vpack.c.bf16 %v4100_v56, %v4100_v56  ;;  %v3351_v6 = vadd.f32 %v3292_v36, %v3036_v28  ;;  %v2722_v22 = vadd.f32 %v2664_v45, %v5951_v58  ;;  %v6471_v45 = vld [vmem:[%s6533_s2] ss:$0 sm:$0xff] }
 0x252   : > { %v3976_v30 = vpop.f32.mrf.mxu0 }
 0x253   : > { %4165 = vst.msk [vmem:[%s6242_s22 + $0x34] sm:$0xf] %vm4151_vm4, %v4132_v43  ;;  %v4033_v16 = vadd.f32 %v3974_v42, %v3351_v6 }
 0x255   : > { %v4069_v10 = vadd.f32 %v6226_v4, %v4033_v16 }
 0x256   : > { %v2979_v26 = vpop.f32.mrf.mxu2 }
 0x257   : > { %v4101_v61 = vmax.f32 %v4069_v10, 0.0  ;;  %v3037_v17 = vadd.f32 %v2979_v26, %v2722_v22  ;;  %v3294_v49 = vpop.f32.mrf.mxu3 }
 0x258   : > { %v2667_v15 = vpop.f32.mrf.mxu1 }
 0x259   : > { %v4133_v11 = vpack.c.bf16 %v4101_v61, %v4101_v61  ;;  %v3352_v34 = vadd.f32 %v3294_v49, %v3037_v17  ;;  %v2723_v31 = vadd.f32 %v2667_v15, %v5971_v14 }
 0x25a   : > { %v3979_v35 = vpop.f32.mrf.mxu0 }
 0x25b   : > { %4166 = vst.msk [vmem:[%s6242_s22 + $0x38] sm:$0xf] %vm4151_vm4, %v4133_v11  ;;  %v4034_v29 = vadd.f32 %v3976_v30, %v3352_v34 }
 0x25d   : > { %v4070_v12 = vadd.f32 %v6226_v4, %v4034_v29 }
 0x25e   : > { %v2982_v60 = vpop.f32.mrf.mxu2 }
 0x25f   : > { %v4102_v0 = vmax.f32 %v4070_v12, 0.0  ;;  %v3038_v19 = vadd.f32 %v2982_v60, %v2723_v31  ;;  %v3297_v58 = vpop.f32.mrf.mxu3 }
 0x260   : > { %v2669_v23 = vpop.f32.mrf.mxu1 }
 0x261   : > { %v4134_v2 = vpack.c.bf16 %v4102_v0, %v4102_v0  ;;  %v3353_v38 = vadd.f32 %v3297_v58, %v3038_v19  ;;  %v2724_v37 = vadd.f32 %v2669_v23, %v5984_v46 }
 0x262   : > { %v3981_v51 = vpop.f32.mrf.mxu0 }
 0x263   : > { %4167 = vst.msk [vmem:[%s6242_s22 + $0x3c] sm:$0xf] %vm4151_vm4, %v4134_v2  ;;  %v4035_v9 = vadd.f32 %v3979_v35, %v3353_v38 }
 0x265   : > { %v4071_v41 = vadd.f32 %v6226_v4, %v4035_v9 }
 0x266   : > { %v2984_v18 = vpop.f32.mrf.mxu2 }
 0x267   : > { %v4103_v1 = vmax.f32 %v4071_v41, 0.0  ;;  %v3039_v59 = vadd.f32 %v2984_v18, %v2724_v37  ;;  %v3299_v14 = vpop.f32.mrf.mxu3 }
 0x268   : > { %v2672_v3 = vpop.f32.mrf.mxu1 }
 0x269   : > { %v4135_v57 = vpack.c.bf16 %v4103_v1, %v4103_v1  ;;  %v3354_v63 = vadd.f32 %v3299_v14, %v3039_v59  ;;  %v2725_v8 = vadd.f32 %v2672_v3, %v6002_v27 }
 0x26a   : > { %v3984_v47 = vpop.f32.mrf.mxu0 }
 0x26b   : > { %4168 = vst.msk [vmem:[%s6242_s22 + $0x40] sm:$0xf] %vm4151_vm4, %v4135_v57  ;;  %v4036_v25 = vadd.f32 %v3981_v51, %v3354_v63 }
 0x26d   : > { %v4072_v55 = vadd.f32 %v6226_v4, %v4036_v25 }
 0x26e   : > { %v2987_v42 = vpop.f32.mrf.mxu2 }
 0x26f   : > { %v4104_v24 = vmax.f32 %v4072_v55, 0.0  ;;  %v3040_v40 = vadd.f32 %v2987_v42, %v2725_v8  ;;  %v3302_v46 = vpop.f32.mrf.mxu3 }
 0x270   : > { %v2674_v53 = vpop.f32.mrf.mxu1 }
 0x271   : > { %v4136_v13 = vpack.c.bf16 %v4104_v24, %v4104_v24  ;;  %v3355_v56 = vadd.f32 %v3302_v46, %v3040_v40  ;;  %v2726_v27 = vadd.f32 %v2674_v53, %v6011_v7 }
 0x272   : > { %v3986_v28 = vpop.f32.mrf.mxu0 }
 0x273   : > { %4169 = vst.msk [vmem:[%s6242_s22 + $0x44] sm:$0xf] %vm4151_vm4, %v4136_v13  ;;  %v4037_v36 = vadd.f32 %v3984_v47, %v3355_v56 }
 0x275   : > { %v4073_v4 = vadd.f32 %v6471_v45, %v4037_v36 }
 0x276   : > { %v2989_v43 = vpop.f32.mrf.mxu2 }
 0x277   : > { %v4105_v6 = vmax.f32 %v4073_v4, 0.0  ;;  %v3041_v30 = vadd.f32 %v2989_v43, %v2726_v27  ;;  %v3304_v16 = vpop.f32.mrf.mxu3 }
 0x278   : > { %v2677_v10 = vpop.f32.mrf.mxu1 }
 0x279   : > { %v4137_v22 = vpack.c.bf16 %v4105_v6, %v4105_v6  ;;  %v3356_v26 = vadd.f32 %v3304_v16, %v3041_v30  ;;  %v2727_v15 = vadd.f32 %v2677_v10, %v6031_v48 }
 0x27a   : > { %v3989_v61 = vpop.f32.mrf.mxu0 }
 0x27b   : > { %4170 = vst.msk [vmem:[%s6242_s22 + $0x48] sm:$0xf] %vm4151_vm4, %v4137_v22  ;;  %v4038_v17 = vadd.f32 %v3986_v28, %v3356_v26 }
 0x27d   : > { %v4074_v49 = vadd.f32 %v6471_v45, %v4038_v17 }
 0x27e   : > { %v2992_v11 = vpop.f32.mrf.mxu2 }
 0x27f   : > { %v4106_v34 = vmax.f32 %v4074_v49, 0.0  ;;  %v3042_v35 = vadd.f32 %v2992_v11, %v2727_v15  ;;  %v3307_v7 = vpop.f32.mrf.mxu3 }
 0x280   : > { %v2679_v29 = vpop.f32.mrf.mxu1 }
 0x281   : > { %v4138_v12 = vpack.c.bf16 %v4106_v34, %v4106_v34  ;;  %v3357_v31 = vadd.f32 %v3307_v7, %v3042_v35  ;;  %v2728_v58 = vadd.f32 %v2679_v29, %v6044_v50 }
 0x282   : > { %v3991_v60 = vpop.f32.mrf.mxu0 }
 0x283   : > { %4171 = vst.msk [vmem:[%s6242_s22 + $0x4c] sm:$0xf] %vm4151_vm4, %v4138_v12  ;;  %v4039_v0 = vadd.f32 %v3989_v61, %v3357_v31 }
 0x285   : > { %v4075_v19 = vadd.f32 %v6471_v45, %v4039_v0 }
 0x286   : > { %v2994_v23 = vpop.f32.mrf.mxu2 }
 0x287   : > { %v4107_v2 = vmax.f32 %v4075_v19, 0.0  ;;  %v3043_v38 = vadd.f32 %v2994_v23, %v2728_v58  ;;  %v3309_v48 = vpop.f32.mrf.mxu3 }
 0x288   : > { %v2682_v51 = vpop.f32.mrf.mxu1 }
 0x289   : > { %v4139_v9 = vpack.c.bf16 %v4107_v2, %v4107_v2  ;;  %v3358_v41 = vadd.f32 %v3309_v48, %v3043_v38  ;;  %v2729_v59 = vadd.f32 %v2682_v51, %v6062_v20 }
 0x28a   : > { %v3994_v37 = vpop.f32.mrf.mxu0 }
 0x28b   : > { %4172 = vst.msk [vmem:[%s6242_s22 + $0x50] sm:$0xf] %vm4151_vm4, %v4139_v9  ;;  %v4040_v18 = vadd.f32 %v3991_v60, %v3358_v41 }
 0x28d   : > { %v4076_v1 = vadd.f32 %v6471_v45, %v4040_v18 }
 0x28e   : > { %v2997_v14 = vpop.f32.mrf.mxu2 }
 0x28f   : > { %v4108_v3 = vmax.f32 %v4076_v1, 0.0  ;;  %v3044_v57 = vadd.f32 %v2997_v14, %v2729_v59  ;;  %v3312_v50 = vpop.f32.mrf.mxu3 }
 0x290   : > { %v2684_v63 = vpop.f32.mrf.mxu1 }
 0x291   : > { %v4140_v47 = vpack.c.bf16 %v4108_v3, %v4108_v3  ;;  %v3359_v25 = vadd.f32 %v3312_v50, %v3044_v57  ;;  %v2730_v24 = vadd.f32 %v2684_v63, %v6071_v54 }
 0x292   : > { %v3996_v55 = vpop.f32.mrf.mxu0 }
 0x293   : > { %4173 = vst.msk [vmem:[%s6242_s22 + $0x54] sm:$0xf] %vm4151_vm4, %v4140_v47  ;;  %v4041_v8 = vadd.f32 %v3994_v37, %v3359_v25 }
 0x295   : > { %v4077_v42 = vadd.f32 %v6471_v45, %v4041_v8 }
 0x296   : > { %v2999_v40 = vpop.f32.mrf.mxu2 }
 0x297   : > { %v4109_v46 = vmax.f32 %v4077_v42, 0.0  ;;  %v3045_v53 = vadd.f32 %v2999_v40, %v2730_v24  ;;  %v3314_v20 = vpop.f32.mrf.mxu3 }
 0x298   : > { %v2687_v13 = vpop.f32.mrf.mxu1 }
 0x299   : > { %v4141_v56 = vpack.c.bf16 %v4109_v46, %v4109_v46  ;;  %v3360_v28 = vadd.f32 %v3314_v20, %v3045_v53  ;;  %v2731_v43 = vadd.f32 %v2687_v13, %v6091_v44 }
 0x29a   : > { %v3999_v36 = vpop.f32.mrf.mxu0 }
 0x29b   : > { %4174 = vst.msk [vmem:[%s6242_s22 + $0x58] sm:$0xf] %vm4151_vm4, %v4141_v56  ;;  %v4042_v4 = vadd.f32 %v3996_v55, %v3360_v28 }
 0x29d   : > { %v4078_v27 = vadd.f32 %v6471_v45, %v4042_v4 }
 0x29e   : > { %v3002_v6 = vpop.f32.mrf.mxu2 }
 0x29f   : > { %v4110_v30 = vmax.f32 %v4078_v27, 0.0  ;;  %v3046_v16 = vadd.f32 %v3002_v6, %v2731_v43  ;;  %v3317_v54 = vpop.f32.mrf.mxu3 }
 0x2a0   : > { %v2689_v10 = vpop.f32.mrf.mxu1 }
 0x2a1   : > { %v4142_v22 = vpack.c.bf16 %v4110_v30, %v4110_v30  ;;  %v3361_v26 = vadd.f32 %v3317_v54, %v3046_v16  ;;  %v2732_v15 = vadd.f32 %v2689_v10, %v6104_v39 }
 0x2a2   : > { %v4001_v61 = vpop.f32.mrf.mxu0 }
 0x2a3   : > { %4175 = vst.msk [vmem:[%s6242_s22 + $0x5c] sm:$0xf] %vm4151_vm4, %v4142_v22  ;;  %v4043_v17 = vadd.f32 %v3999_v36, %v3361_v26 }
 0x2a5   : > { %v4079_v49 = vadd.f32 %v6471_v45, %v4043_v17 }
 0x2a6   : > { %v3004_v11 = vpop.f32.mrf.mxu2 }
 0x2a7   : > { %v4111_v34 = vmax.f32 %v4079_v49, 0.0  ;;  %v3047_v35 = vadd.f32 %v3004_v11, %v2732_v15  ;;  %v3319_v44 = vpop.f32.mrf.mxu3 }
 0x2a8   : > { %v2692_v7 = vpop.f32.mrf.mxu1 }
 0x2a9   : > { %v4143_v29 = vpack.c.bf16 %v4111_v34, %v4111_v34  ;;  %v3362_v12 = vadd.f32 %v3319_v44, %v3047_v35  ;;  %v2733_v19 = vadd.f32 %v2692_v7, %v6122_v21 }
 0x2aa   : > { %v4004_v31 = vpop.f32.mrf.mxu0 }
 0x2ab   : > { %4176 = vst.msk [vmem:[%s6242_s22 + $0x60] sm:$0xf] %vm4151_vm4, %v4143_v29  ;;  %v4044_v60 = vadd.f32 %v4001_v61, %v3362_v12 }
 0x2ad   : > { %v4080_v0 = vadd.f32 %v6471_v45, %v4044_v60 }
 0x2ae   : > { %v3007_v58 = vpop.f32.mrf.mxu2 }
 0x2af   : > { %v4112_v23 = vmax.f32 %v4080_v0, 0.0  ;;  %v3048_v2 = vadd.f32 %v3007_v58, %v2733_v19  ;;  %v3322_v39 = vpop.f32.mrf.mxu3 }
 0x2b0   : > { %v2694_v38 = vpop.f32.mrf.mxu1 }
 0x2b1   : > { %v4144_v48 = vpack.c.bf16 %v4112_v23, %v4112_v23  ;;  %v3363_v51 = vadd.f32 %v3322_v39, %v3048_v2  ;;  %v2734_v18 = vadd.f32 %v2694_v38, %v6131_v52 }
 0x2b2   : > { %v4006_v9 = vpop.f32.mrf.mxu0 }
 0x2b3   : > { %4177 = vst.msk [vmem:[%s6242_s22 + $0x64] sm:$0xf] %vm4151_vm4, %v4144_v48  ;;  %v4045_v41 = vadd.f32 %v4004_v31, %v3363_v51 }
 0x2b5   : > { %v4081_v37 = vadd.f32 %v6471_v45, %v4045_v41 }
 0x2b6   : > { %v3009_v1 = vpop.f32.mrf.mxu2 }
 0x2b7   : > { %v4113_v59 = vmax.f32 %v4081_v37, 0.0  ;;  %v3049_v14 = vadd.f32 %v3009_v1, %v2734_v18  ;;  %v3324_v21 = vpop.f32.mrf.mxu3 }
 0x2b8   : > { %v2697_v3 = vpop.f32.mrf.mxu1 }
 0x2b9   : > { %v4145_v57 = vpack.c.bf16 %v4113_v59, %v4113_v59  ;;  %v3364_v50 = vadd.f32 %v3324_v21, %v3049_v14  ;;  %v2735_v55 = vadd.f32 %v2697_v3, %v6151_v32 }
 0x2ba   : > { %v4009_v47 = vpop.f32.mrf.mxu0 }
 0x2bb   : > { %4178 = vst.msk [vmem:[%s6242_s22 + $0x68] sm:$0xf] %vm4151_vm4, %v4145_v57  ;;  %v4046_v63 = vadd.f32 %v4006_v9, %v3364_v50 }
 0x2bd   : > { %v4082_v25 = vadd.f32 %v6471_v45, %v4046_v63 }
 0x2be   : > { %v3012_v8 = vpop.f32.mrf.mxu2 }
 0x2bf   : > { %v4114_v42 = vmax.f32 %v4082_v25, 0.0  ;;  %v3050_v24 = vadd.f32 %v3012_v8, %v2735_v55  ;;  %v3327_v52 = vpop.f32.mrf.mxu3 }
 0x2c0   : > { %v2699_v40 = vpop.f32.mrf.mxu1 }
 0x2c1   : > { %v4146_v46 = vpack.c.bf16 %v4114_v42, %v4114_v42  ;;  %v3365_v53 = vadd.f32 %v3327_v52, %v3050_v24  ;;  %v2736_v56 = vadd.f32 %v2699_v40, %v6167_v33 }
 0x2c2   : > { %v4011_v28 = vpop.f32.mrf.mxu0 }
 0x2c3   : > { %4179 = vst.msk [vmem:[%s6242_s22 + $0x6c] sm:$0xf] %vm4151_vm4, %v4146_v46  ;;  %v4047_v20 = vadd.f32 %v4009_v47, %v3365_v53 }
 0x2c5   : > { %v4083_v13 = vadd.f32 %v6471_v45, %v4047_v20 }
 0x2c6   : > { %v3014_v36 = vpop.f32.mrf.mxu2 }
 0x2c7   : > { %v4115_v4 = vmax.f32 %v4083_v13, 0.0  ;;  %v3051_v27 = vadd.f32 %v3014_v36, %v2736_v56  ;;  %v3329_v32 = vpop.f32.mrf.mxu3 }
 0x2c8   : > { %v2702_v43 = vpop.f32.mrf.mxu1 }
 0x2c9   : > { %v4147_v6 = vpack.c.bf16 %v4115_v4, %v4115_v4  ;;  %v3366_v30 = vadd.f32 %v3329_v32, %v3051_v27  ;;  %v2737_v10 = vadd.f32 %v2702_v43, %v6189_v5 }
 0x2ca   : > { %v4014_v17 = vpop.f32.mrf.mxu0 }
 0x2cb   : > { %4180 = vst.msk [vmem:[%s6242_s22 + $0x70] sm:$0xf] %vm4151_vm4, %v4147_v6  ;;  %v4048_v16 = vadd.f32 %v4011_v28, %v3366_v30 }
 0x2cd   : > { %v4084_v54 = vadd.f32 %v6471_v45, %v4048_v16 }
 0x2ce   : > { %v3017_v22 = vpop.f32.mrf.mxu2 }
 0x2cf   : > { %v4116_v26 = vmax.f32 %v4084_v54, 0.0  ;;  %v3052_v61 = vadd.f32 %v3017_v22, %v2737_v10  ;;  %v3332_v33 = vpop.f32.mrf.mxu3 }
 0x2d0   : > { %v2704_v11 = vpop.f32.mrf.mxu1 }
 0x2d1   : > { %v4148_v49 = vpack.c.bf16 %v4116_v26, %v4116_v26  ;;  %v3367_v15 = vadd.f32 %v3332_v33, %v3052_v61  ;;  %v2738_v44 = vadd.f32 %v2704_v11, %v6200_v62 }
 0x2d2   : > { %v4016_v0 = vpop.f32.mrf.mxu0 }
 0x2d3   : > { %4181 = vst.msk [vmem:[%s6242_s22 + $0x74] sm:$0xf] %vm4151_vm4, %v4148_v49  ;;  %v4049_v34 = vadd.f32 %v4014_v17, %v3367_v15 }
 0x2d5   : > { %v4085_v35 = vadd.f32 %v6471_v45, %v4049_v34 }
 0x2d6   : > { %v3019_v7 = vpop.f32.mrf.mxu2 }
 0x2d7   : > { %v4117_v29 = vmax.f32 %v4085_v35, 0.0  ;;  %v3053_v5 = vadd.f32 %v3019_v7, %v2738_v44  ;;  %v3334_v12 = vpop.f32.mrf.mxu3 }
 0x2d9   : > { %v4149_v31 = vpack.c.bf16 %v4117_v29, %v4117_v29  ;;  %v3368_v60 = vadd.f32 %v3334_v12, %v3053_v5 }
 0x2db   : > { %4182 = vst.msk [vmem:[%s6242_s22 + $0x78] sm:$0xf] %vm4151_vm4, %v4149_v31  ;;  %v4050_v19 = vadd.f32 %v4016_v0, %v3368_v60 }
 0x2dd   : > { %v4086_v58 = vadd.f32 %v6471_v45, %v4050_v19 }
 0x2df   : > { %v4118_v23 = vmax.f32 %v4086_v58, 0.0 }
 0x2e1   : > { %v4150_v2 = vpack.c.bf16 %v4118_v23, %v4118_v23 }
 0x2e3   : > { %4183 = vst.msk [vmem:[%s6242_s22 + $0x7c] sm:$0xf] %vm4151_vm4, %v4150_v2 }
 0x2e4 PF: > { %s13_s12 = sadd.s32 1, %s5404_s12  }
 0x2e5   : > { %p10_p5 = scmp.ge.s32.totalorder %s13_s12, 4  }
 0x2e7   :  { %12 = sbr.rel (!%p10_p5) target bundleno = 1 (0x1), region = 75 }

</bundles_post_ra>
